<compile_context>
chip_gen: v7x
topology: tpu7x:2x2x1
jax: 0.10.0
libtpu: 0.0.40
codegen_flags: <defaults>
</compile_context>

<pallas_src>
import functools
import math

import jax
import jax.numpy as jnp
from jax.experimental import pallas as pl
from jax.experimental.pallas import tpu as pltpu


# ----------------------------------------------------------------------------
# Kernel 1: K-tiled fused linear (+bias, optional ReLU, optional column split)
#   y = x @ W^T + b ; grid = (M tiles ["parallel"], K tiles ["arbitrary"])
# ----------------------------------------------------------------------------
def _linear_kernel(x_ref, w_ref, b_ref, *refs, relu, n_out):
    out_refs = refs[:n_out]
    acc_ref = refs[n_out]
    k = pl.program_id(1)

    @pl.when(k == 0)
    def _():
        acc_ref[...] = jnp.zeros_like(acc_ref)

    acc_ref[...] += jnp.dot(x_ref[...], w_ref[...],
                            preferred_element_type=jnp.float32)

    @pl.when(k == pl.num_programs(1) - 1)
    def _():
        out = acc_ref[...] + b_ref[...]          # (1, N) broadcasts over rows
        if relu:
            out = jnp.maximum(out, 0.0)
        off = 0
        for r in out_refs:                       # write column splits directly
            w = r.shape[-1]
            r[...] = out[:, off:off + w].astype(r.dtype)
            off += w


def _pick_m_tile(M):
    if M % 8 != 0 or M <= 256:
        return M                                  # single full-dim tile
    return min(512, ((M // 2 + 7) // 8) * 8)      # >=2 tiles for megacore


def _pick_k_tile(K, max_t=1024):
    if K <= max_t:
        return K
    t = (max_t // 128) * 128
    while t >= 128:
        if K % t == 0:
            return t                              # multiple of 128 dividing K
        t -= 128
    return K


def linear_pallas(x, w_t, b, relu=False, splits=None):
    """x: (M, K), w_t: (K, N) (pre-transposed torch weight), b: (1, N).

    Returns y = relu?(x @ w_t + b). If `splits` is given, returns a tuple of
    column blocks of y (sizes `splits`) written directly by the kernel.
    """
    M, K = x.shape
    K2, N = w_t.shape
    assert K == K2, (K, K2)
    if splits is None:
        splits = (N,)
    assert sum(splits) == N, (splits, N)

    tm = _pick_m_tile(M)
    tk = _pick_k_tile(K)
    grid = (pl.cdiv(M, tm), K // tk)
    multi = len(splits) > 1
    if multi:
        out_shape = tuple(jax.ShapeDtypeStruct((M, s), x.dtype) for s in splits)
        out_specs = tuple(pl.BlockSpec((tm, s), lambda i, k: (i, 0))
                          for s in splits)
    else:
        out_shape = jax.ShapeDtypeStruct((M, N), x.dtype)
        out_specs = pl.BlockSpec((tm, N), lambda i, k: (i, 0))

    outs = pl.pallas_call(
        functools.partial(_linear_kernel, relu=relu, n_out=len(splits)),
        out_shape=out_shape,
        grid=grid,
        in_specs=[
            pl.BlockSpec((tm, tk), lambda i, k: (i, k)),
            pl.BlockSpec((tk, N), lambda i, k: (k, 0)),
            pl.BlockSpec((1, N), lambda i, k: (0, 0)),    # bias resident
        ],
        out_specs=out_specs,
        scratch_shapes=[pltpu.VMEM((tm, N), jnp.float32)],
        compiler_params=pltpu.CompilerParams(
            dimension_semantics=("parallel", "arbitrary")),
    )(x, w_t, b)
    if multi:
        return tuple(outs)
    return outs


# ----------------------------------------------------------------------------
# Kernel 2: fused bidirectional LSTM recurrence, time-chunked
#   gx_f / gx_b : (n, b, 4H) = x @ W_ih^T + b_ih + b_hh  (precomputed GEMM)
#   w_hh_f/b    : (H, 4H) resident
#   out         : (n, b, 2H)  fwd at lanes [0,H), bwd at [H,2H); VMEM-resident
# ----------------------------------------------------------------------------
def _bilstm_chunk_kernel(gxf_ref, gxb_ref, whhf_ref, whhb_ref, o_ref,
                         hf, cf, hb, cb, *, tt, hidden):
    c = pl.program_id(0)
    nc = pl.num_programs(0)
    H = hidden

    @pl.when(c == 0)
    def _():
        hf[...] = jnp.zeros_like(hf)
        cf[...] = jnp.zeros_like(cf)
        hb[...] = jnp.zeros_like(hb)
        cb[...] = jnp.zeros_like(cb)

    def gate_step(gates, c_prev):
        # PyTorch gate order: i, f, g, o
        i_g = jax.nn.sigmoid(gates[:, 0 * H:1 * H])
        f_g = jax.nn.sigmoid(gates[:, 1 * H:2 * H])
        g_g = jnp.tanh(gates[:, 2 * H:3 * H])
        o_g = jax.nn.sigmoid(gates[:, 3 * H:4 * H])
        c_new = f_g * c_prev + i_g * g_g
        h_new = o_g * jnp.tanh(c_new)
        return h_new, c_new

    def body(s, carry):
        # --- forward direction: local step s, global time c*tt + s ----------
        gf = gxf_ref[s] + jnp.dot(hf[...], whhf_ref[...],
                                  preferred_element_type=jnp.float32)
        h_new, c_new = gate_step(gf, cf[...])
        hf[...] = h_new
        cf[...] = c_new
        t_fwd = c * tt + s
        o_ref[t_fwd, :, pl.ds(0, H)] = h_new.astype(o_ref.dtype)

        # --- backward direction: this grid step holds chunk nc-1-c ----------
        sb = tt - 1 - s
        gb = gxb_ref[sb] + jnp.dot(hb[...], whhb_ref[...],
                                   preferred_element_type=jnp.float32)
        hb_new, cb_new = gate_step(gb, cb[...])
        hb[...] = hb_new
        cb[...] = cb_new
        t_bwd = (nc - 1 - c) * tt + sb
        o_ref[t_bwd, :, pl.ds(H, H)] = hb_new.astype(o_ref.dtype)
        return carry

    jax.lax.fori_loop(0, tt, body, 0, unroll=True)


def _pick_time_chunk(n, target=32):
    tt = min(n, target)
    while n % tt != 0:
        tt -= 1
    return tt


def bilstm_recurrence(gx_f, gx_b, w_hh_f, w_hh_b, hidden):
    n, b, g4 = gx_f.shape
    H = hidden
    assert g4 == 4 * H

    # Pad batch to a sublane multiple so per-step stores are unmasked;
    # the zero rows stay zero through the recurrence and are sliced off.
    b_pad = max(8, -(-b // 8) * 8)
    if b_pad != b:
        pad = ((0, 0), (0, b_pad - b), (0, 0))
        gx_f = jnp.pad(gx_f, pad)
        gx_b = jnp.pad(gx_b, pad)

    tt = _pick_time_chunk(n)
    nc = n // tt

    out = pl.pallas_call(
        functools.partial(_bilstm_chunk_kernel, tt=tt, hidden=H),
        out_shape=jax.ShapeDtypeStruct((n, b_pad, 2 * H), gx_f.dtype),
        grid=(nc,),
        in_specs=[
            pl.BlockSpec((tt, b_pad, g4), lambda c: (c, 0, 0)),           # fwd chunk
            pl.BlockSpec((tt, b_pad, g4), lambda c: (nc - 1 - c, 0, 0)),  # bwd chunk
            pl.BlockSpec((H, g4), lambda c: (0, 0)),                      # W_hh fwd
            pl.BlockSpec((H, g4), lambda c: (0, 0)),                      # W_hh bwd
        ],
        # Constant index_map => output stays resident in VMEM across the grid
        # (lane-concatenated fwd|bwd halves; no XLA concat afterwards).
        out_specs=pl.BlockSpec((n, b_pad, 2 * H), lambda c: (0, 0, 0)),
        scratch_shapes=[pltpu.VMEM((b_pad, H), jnp.float32)] * 4,  # hf, cf, hb, cb
        compiler_params=pltpu.CompilerParams(
            dimension_semantics=("arbitrary",)),                    # sequential
    )(gx_f, gx_b, w_hh_f, w_hh_b)

    if b_pad != b:
        out = out[:, :b, :]
    return out


def bilstm_layer(x_tm, layer_params, hidden):
    """x_tm: (seq, batch, in_dim) -> (seq, batch, 2*hidden)."""
    n, b, in_dim = x_tm.shape
    flat = x_tm.reshape(n * b, in_dim)
    # One fused input GEMM for both directions (w_ih fwd|bwd pre-concatenated
    # along N), split outputs written directly by the kernel.
    gx_f, gx_b = linear_pallas(flat, layer_params["w_ih_t"],
                               layer_params["b_gates"],
                               splits=(4 * hidden, 4 * hidden))
    gx_f = gx_f.reshape(n, b, 4 * hidden)
    gx_b = gx_b.reshape(n, b, 4 * hidden)
    return bilstm_recurrence(gx_f, gx_b,
                             layer_params["w_hh_f"], layer_params["w_hh_b"],
                             hidden)


# ----------------------------------------------------------------------------
# ImageLSTM forward
# ----------------------------------------------------------------------------
def image_lstm_forward(x, params, units, num_classes, dense=False):
    """x: (batch, channels, seq, width, height) -> (batch, seq, num_classes)."""
    if x.ndim != 5:
        raise ValueError("expected (batch, channels, seq, width, height)")
    batch = jnp.transpose(x, (0, 2, 1, 3, 4))          # torch.transpose(x, 1, 2)
    b, n, c, w, h = batch.shape
    frames = batch.reshape(b * n, c * w * h)
    # TODO(synk): the ResNeXt101 conv trunk (torch.hub 'resnext101_32x8d_wsl') has no
    # in-script Pallas equivalent; only the module-defined embedder.fc-style Linear
    # projection to `units` is implemented here (over the flattened frame).
    embed = linear_pallas(frames, params["fc_w_t"], params["fc_b"])
    h_embedding = embed.reshape(b, n, units)

    x_tm = jnp.transpose(h_embedding, (1, 0, 2))        # time-major (n, b, units)
    h_lstm1 = bilstm_layer(x_tm, params["lstm1"], units)      # (n, b, 2*units)
    h_lstm2 = bilstm_layer(h_lstm1, params["lstm2"], units)   # (n, b, 2*units)

    if dense:
        # TODO(synk): args.dense branch adds torch.cat((x, x), -1) whose shape
        # does not broadcast against (b, n, 2*units) for raw-image input; not translated.
        raise NotImplementedError("dense residual branch not translated")

    # h_conc_linear1 (F.relu(linear1(h_lstm1))) is dead in the dense=False path of the
    # PyTorch forward; the wasted GEMM is intentionally not issued here.
    flat2 = h_lstm2.reshape(n * b, 2 * units)
    hidden = linear_pallas(flat2, params["lin2_w_t"], params["lin2_b"], relu=True)

    # Lane-dense classifier: pad the tiny num_classes output to 128 lanes so the
    # final store is an unmasked vst, then slice the padding off in XLA.
    pad_cols = (-num_classes) % 128
    if pad_cols:
        w_out = jnp.pad(params["out_w_t"], ((0, 0), (0, pad_cols)))
        b_out = jnp.pad(params["out_b"], ((0, 0), (0, pad_cols)))
    else:
        w_out, b_out = params["out_w_t"], params["out_b"]
    out = linear_pallas(hidden, w_out, b_out)
    if pad_cols:
        out = out[:, :num_classes]
    return out.reshape(n, b, num_classes).transpose(1, 0, 2)   # (b, n, classes)


# ----------------------------------------------------------------------------
# Parameter construction (deterministic stand-ins for the torch parameters)
# ----------------------------------------------------------------------------
def init_params(key, embed_in, units, num_classes):
    keys = jax.random.split(key, 6)

    def dense(k, in_dim, out_dim):
        kw, kb = jax.random.split(k)
        s = 1.0 / math.sqrt(in_dim)
        w_t = jax.random.uniform(kw, (in_dim, out_dim), jnp.float32, -s, s)
        bias = jax.random.uniform(kb, (1, out_dim), jnp.float32, -s, s)
        return w_t, bias

    def lstm_layer(k, in_dim, hidden):
        kf, kb = jax.random.split(k)
        s = 1.0 / math.sqrt(hidden)

        def one_dir(kk):
            k1, k2, k3, k4 = jax.random.split(kk, 4)
            w_ih = jax.random.uniform(k1, (in_dim, 4 * hidden), jnp.float32, -s, s)
            w_hh = jax.random.uniform(k2, (hidden, 4 * hidden), jnp.float32, -s, s)
            bias = (jax.random.uniform(k3, (1, 4 * hidden), jnp.float32, -s, s)
                    + jax.random.uniform(k4, (1, 4 * hidden), jnp.float32, -s, s))
            return w_ih, w_hh, bias

        w_ih_f, w_hh_f, b_f = one_dir(kf)
        w_ih_b, w_hh_b, b_b = one_dir(kb)
        return {
            # fwd|bwd fused along the output dimension (in_dim, 8H) / (1, 8H)
            "w_ih_t": jnp.concatenate([w_ih_f, w_ih_b], axis=1),
            "b_gates": jnp.concatenate([b_f, b_b], axis=1),
            "w_hh_f": w_hh_f,
            "w_hh_b": w_hh_b,
        }

    fc_w_t, fc_b = dense(keys[0], embed_in, units)
    lin1_w_t, lin1_b = dense(keys[1], 2 * units, 2 * units)   # defined but dead path
    lin2_w_t, lin2_b = dense(keys[2], 2 * units, 2 * units)
    out_w_t, out_b = dense(keys[3], 2 * units, num_classes)
    return {
        "fc_w_t": fc_w_t, "fc_b": fc_b,
        "lstm1": lstm_layer(keys[4], units, units),
        "lstm2": lstm_layer(keys[5], 2 * units, units),
        "lin1_w_t": lin1_w_t, "lin1_b": lin1_b,
        "lin2_w_t": lin2_w_t, "lin2_b": lin2_b,
        "out_w_t": out_w_t, "out_b": out_b,
    }


# ----------------------------------------------------------------------------
# Pure-JAX reference (mirrors the PyTorch forward, dense=False path)
# ----------------------------------------------------------------------------
def _reference_forward(x, params, units, num_classes):
    b_, c_, n_, w_, h_ = x.shape
    frames = jnp.transpose(x, (0, 2, 1, 3, 4)).reshape(b_ * n_, c_ * w_ * h_)
    embed = frames @ params["fc_w_t"] + params["fc_b"]
    x_tm = jnp.transpose(embed.reshape(b_, n_, units), (1, 0, 2))
    H = units

    def ref_dir(x_tm, w_ih_t, b_gates, w_hh_t, reverse):
        n, b, in_dim = x_tm.shape
        gx = (x_tm.reshape(n * b, in_dim) @ w_ih_t + b_gates).reshape(n, b, 4 * H)
        h = jnp.zeros((b, H), jnp.float32)
        c = jnp.zeros((b, H), jnp.float32)
        order = range(n - 1, -1, -1) if reverse else range(n)
        outs = [None] * n
        for t in order:
            gates = gx[t] + h @ w_hh_t
            i = jax.nn.sigmoid(gates[:, :H])
            f = jax.nn.sigmoid(gates[:, H:2 * H])
            g = jnp.tanh(gates[:, 2 * H:3 * H])
            o = jax.nn.sigmoid(gates[:, 3 * H:])
            c = f * c + i * g
            h = o * jnp.tanh(c)
            outs[t] = h
        return jnp.stack(outs, axis=0)

    def ref_bilstm(x_tm, lp):
        G = 4 * H
        fwd = ref_dir(x_tm, lp["w_ih_t"][:, :G], lp["b_gates"][:, :G],
                      lp["w_hh_f"], False)
        bwd = ref_dir(x_tm, lp["w_ih_t"][:, G:], lp["b_gates"][:, G:],
                      lp["w_hh_b"], True)
        return jnp.concatenate([fwd, bwd], axis=-1)

    h1 = ref_bilstm(x_tm, params["lstm1"])
    h2 = ref_bilstm(h1, params["lstm2"])
    hc2 = jax.nn.relu(h2.reshape(n_ * b_, 2 * units) @ params["lin2_w_t"]
                      + params["lin2_b"])
    out = hc2 @ params["out_w_t"] + params["out_b"]
    return out.reshape(n_, b_, num_classes).transpose(1, 0, 2)


if __name__ == "__main__":
    key = jax.random.PRNGKey(0)
    b, c, n, w, h = 2, 3, 8, 8, 8          # (batch, channels, seq, width, height)
    units, num_classes = 32, 4

    k_x, k_p = jax.random.split(key)
    x = jax.random.normal(k_x, (b, c, n, w, h), dtype=jnp.float32)
    params = init_params(k_p, c * w * h, units, num_classes)

    fwd = jax.jit(functools.partial(image_lstm_forward,
                                    units=units, num_classes=num_classes))
    out = jax.block_until_ready(fwd(x, params))
    assert out.shape == (b, n, num_classes), out.shape

    ref = jax.block_until_ready(
        _reference_forward(x, params, units, num_classes))
    # Tolerance covers MXU matmul precision differences vs the XLA reference.
    assert jnp.allclose(out, ref, atol=2e-2, rtol=2e-2), \
        float(jnp.max(jnp.abs(out - ref)))

    print("KERNEL_OK")
</pallas_src>

<mosaic_0001>
module attributes {stable_mosaic.version = 11 : i64} {
  func.func @_linear_kernel(%arg0: i32, %arg1: i32, %arg2: memref<16x192xf32, #tpu.memory_space<vmem>>, %arg3: memref<192x32xf32, #tpu.memory_space<vmem>>, %arg4: memref<1x32xf32, #tpu.memory_space<vmem>>, %arg5: memref<16x32xf32, #tpu.memory_space<vmem>>, %arg6: memref<16x32xf32, #tpu.memory_space<vmem>>) attributes {dimension_semantics = [#tpu.dimension_semantics<parallel>, #tpu.dimension_semantics<arbitrary>], iteration_bounds = array<i64: 1, 1>, scalar_prefetch = 0 : i64, scratch_operands = 1 : i64, tpu.core_type = #tpu.core_type<tc>, window_params = [{transform_indices = @transform_0, window_bounds = array<i64: 16, 192>}, {transform_indices = @transform_1, window_bounds = array<i64: 192, 32>}, {pipeline_mode = #tpu.pipeline_mode<synchronous>, transform_indices = @transform_2, window_bounds = array<i64: 1, 32>}, {transform_indices = @transform_3, window_bounds = array<i64: 16, 32>}]} {
    %c0_i32 = arith.constant 0 : i32
    %0 = arith.cmpi eq, %arg1, %c0_i32 : i32
    %1 = arith.extui %0 : i1 to i32
    %c0_i32_0 = arith.constant 0 : i32
    %2 = arith.cmpi ne, %1, %c0_i32_0 : i32
    scf.if %2 {
      %cst_10 = arith.constant 0.000000e+00 : f32
      %12 = vector.broadcast %cst_10 : f32 to vector<16x32xf32>
      %c0_11 = arith.constant 0 : index
      %c0_12 = arith.constant 0 : index
      %13 = vector.load %arg6[%c0_11, %c0_12] : memref<16x32xf32, #tpu.memory_space<vmem>>, vector<16x32xf32>
      tpu.vector_store %arg6[%c0_11, %c0_12], %12 {strides = array<i32>} : memref<16x32xf32, #tpu.memory_space<vmem>>, vector<16x32xf32>,
    } else {
    }
    %c0 = arith.constant 0 : index
    %c0_1 = arith.constant 0 : index
    %3 = vector.load %arg6[%c0, %c0_1] : memref<16x32xf32, #tpu.memory_space<vmem>>, vector<16x32xf32>
    %c0_2 = arith.constant 0 : index
    %c0_3 = arith.constant 0 : index
    %4 = vector.load %arg2[%c0_2, %c0_3] : memref<16x192xf32, #tpu.memory_space<vmem>>, vector<16x192xf32>
    %c0_4 = arith.constant 0 : index
    %c0_5 = arith.constant 0 : index
    %5 = vector.load %arg3[%c0_4, %c0_5] : memref<192x32xf32, #tpu.memory_space<vmem>>, vector<192x32xf32>
    %cst = arith.constant dense<0.000000e+00> : vector<16x32xf32>
    %6 = tpu.matmul %4, %5, %cst {dimension_numbers = #tpu.dot_dimension_numbers<[1], [0], [0], [1], [0, 0, 1, 1], [], []>} : vector<16x192xf32>, vector<192x32xf32>, vector<16x32xf32> -> vector<16x32xf32>
    %7 = arith.addf %3, %6 : vector<16x32xf32>
    %c0_6 = arith.constant 0 : index
    %c0_7 = arith.constant 0 : index
    %8 = vector.load %arg6[%c0_6, %c0_7] : memref<16x32xf32, #tpu.memory_space<vmem>>, vector<16x32xf32>
    tpu.vector_store %arg6[%c0_6, %c0_7], %7 {strides = array<i32>} : memref<16x32xf32, #tpu.memory_space<vmem>>, vector<16x32xf32>,
    %c0_i32_8 = arith.constant 0 : i32
    %9 = arith.cmpi eq, %arg1, %c0_i32_8 : i32
    %10 = arith.extui %9 : i1 to i32
    %c0_i32_9 = arith.constant 0 : i32
    %11 = arith.cmpi ne, %10, %c0_i32_9 : i32
    scf.if %11 {
      %c0_10 = arith.constant 0 : index
      %c0_11 = arith.constant 0 : index
      %12 = vector.load %arg6[%c0_10, %c0_11] : memref<16x32xf32, #tpu.memory_space<vmem>>, vector<16x32xf32>
      %c0_12 = arith.constant 0 : index
      %c0_13 = arith.constant 0 : index
      %13 = vector.load %arg4[%c0_12, %c0_13] : memref<1x32xf32, #tpu.memory_space<vmem>>, vector<1x32xf32>
      %14 = vector.broadcast %13 : vector<1x32xf32> to vector<16x32xf32>
      %15 = arith.addf %12, %14 : vector<16x32xf32>
      %c0_14 = arith.constant 0 : index
      %c0_15 = arith.constant 0 : index
      %16 = vector.load %arg5[%c0_14, %c0_15] : memref<16x32xf32, #tpu.memory_space<vmem>>, vector<16x32xf32>
      tpu.vector_store %arg5[%c0_14, %c0_15], %15 {strides = array<i32>} : memref<16x32xf32, #tpu.memory_space<vmem>>, vector<16x32xf32>,
    } else {
    }
    return
  }
  func.func @transform_0(%arg0: i32, %arg1: i32) -> (i32, i32) {
    %c0_i32 = arith.constant 0 : i32
    return %arg0, %arg1 : i32, i32
  }
  func.func @transform_1(%arg0: i32, %arg1: i32) -> (i32, i32) {
    %c0_i32 = arith.constant 0 : i32
    %c0_i32_0 = arith.constant 0 : i32
    return %arg1, %c0_i32 : i32, i32
  }
  func.func @transform_2(%arg0: i32, %arg1: i32) -> (i32, i32) {
    %c0_i32 = arith.constant 0 : i32
    %c0_i32_0 = arith.constant 0 : i32
    %c0_i32_1 = arith.constant 0 : i32
    return %c0_i32, %c0_i32_0 : i32, i32
  }
  func.func @transform_3(%arg0: i32, %arg1: i32) -> (i32, i32) {
    %c0_i32 = arith.constant 0 : i32
    %c0_i32_0 = arith.constant 0 : i32
    return %arg0, %c0_i32 : i32, i32
  }
}

module attributes {stable_mosaic.version = 11 : i64} {
  func.func @_linear_kernel(%arg0: i32, %arg1: i32, %arg2: memref<16x32xf32, #tpu.memory_space<vmem>>, %arg3: memref<32x256xf32, #tpu.memory_space<vmem>>, %arg4: memref<1x256xf32, #tpu.memory_space<vmem>>, %arg5: memref<16x128xf32, #tpu.memory_space<vmem>>, %arg6: memref<16x128xf32, #tpu.memory_space<vmem>>, %arg7: memref<16x256xf32, #tpu.memory_space<vmem>>) attributes {dimension_semantics = [#tpu.dimension_semantics<parallel>, #tpu.dimension_semantics<arbitrary>], iteration_bounds = array<i64: 1, 1>, scalar_prefetch = 0 : i64, scratch_operands = 1 : i64, tpu.core_type = #tpu.core_type<tc>, window_params = [{transform_indices = @transform_0, window_bounds = array<i64: 16, 32>}, {transform_indices = @transform_1, window_bounds = array<i64: 32, 256>}, {pipeline_mode = #tpu.pipeline_mode<synchronous>, transform_indices = @transform_2, window_bounds = array<i64: 1, 256>}, {transform_indices = @transform_3, window_bounds = array<i64: 16, 128>}, {transform_indices = @transform_4, window_bounds = array<i64: 16, 128>}]} {
    %c0_i32 = arith.constant 0 : i32
    %0 = arith.cmpi eq, %arg1, %c0_i32 : i32
    %1 = arith.extui %0 : i1 to i32
    %c0_i32_0 = arith.constant 0 : i32
    %2 = arith.cmpi ne, %1, %c0_i32_0 : i32
    scf.if %2 {
      %cst_10 = arith.constant 0.000000e+00 : f32
      %12 = vector.broadcast %cst_10 : f32 to vector<16x256xf32>
      %c0_11 = arith.constant 0 : index
      %c0_12 = arith.constant 0 : index
      %13 = vector.load %arg7[%c0_11, %c0_12] : memref<16x256xf32, #tpu.memory_space<vmem>>, vector<16x256xf32>
      tpu.vector_store %arg7[%c0_11, %c0_12], %12 {strides = array<i32>} : memref<16x256xf32, #tpu.memory_space<vmem>>, vector<16x256xf32>,
    } else {
    }
    %c0 = arith.constant 0 : index
    %c0_1 = arith.constant 0 : index
    %3 = vector.load %arg7[%c0, %c0_1] : memref<16x256xf32, #tpu.memory_space<vmem>>, vector<16x256xf32>
    %c0_2 = arith.constant 0 : index
    %c0_3 = arith.constant 0 : index
    %4 = vector.load %arg2[%c0_2, %c0_3] : memref<16x32xf32, #tpu.memory_space<vmem>>, vector<16x32xf32>
    %c0_4 = arith.constant 0 : index
    %c0_5 = arith.constant 0 : index
    %5 = vector.load %arg3[%c0_4, %c0_5] : memref<32x256xf32, #tpu.memory_space<vmem>>, vector<32x256xf32>
    %cst = arith.constant dense<0.000000e+00> : vector<16x256xf32>
    %6 = tpu.matmul %4, %5, %cst {dimension_numbers = #tpu.dot_dimension_numbers<[1], [0], [0], [1], [0, 0, 1, 1], [], []>} : vector<16x32xf32>, vector<32x256xf32>, vector<16x256xf32> -> vector<16x256xf32>
    %7 = arith.addf %3, %6 : vector<16x256xf32>
    %c0_6 = arith.constant 0 : index
    %c0_7 = arith.constant 0 : index
    %8 = vector.load %arg7[%c0_6, %c0_7] : memref<16x256xf32, #tpu.memory_space<vmem>>, vector<16x256xf32>
    tpu.vector_store %arg7[%c0_6, %c0_7], %7 {strides = array<i32>} : memref<16x256xf32, #tpu.memory_space<vmem>>, vector<16x256xf32>,
    %c0_i32_8 = arith.constant 0 : i32
    %9 = arith.cmpi eq, %arg1, %c0_i32_8 : i32
    %10 = arith.extui %9 : i1 to i32
    %c0_i32_9 = arith.constant 0 : i32
    %11 = arith.cmpi ne, %10, %c0_i32_9 : i32
    scf.if %11 {
      %c0_10 = arith.constant 0 : index
      %c0_11 = arith.constant 0 : index
      %12 = vector.load %arg7[%c0_10, %c0_11] : memref<16x256xf32, #tpu.memory_space<vmem>>, vector<16x256xf32>
      %c0_12 = arith.constant 0 : index
      %c0_13 = arith.constant 0 : index
      %13 = vector.load %arg4[%c0_12, %c0_13] : memref<1x256xf32, #tpu.memory_space<vmem>>, vector<1x256xf32>
      %14 = vector.broadcast %13 : vector<1x256xf32> to vector<16x256xf32>
      %15 = arith.addf %12, %14 : vector<16x256xf32>
      %16 = vector.extract_strided_slice %15 {offsets = [0, 0], sizes = [16, 128], strides = [1, 1]} : vector<16x256xf32> to vector<16x128xf32>
      %c0_14 = arith.constant 0 : index
      %c0_15 = arith.constant 0 : index
      %17 = vector.load %arg5[%c0_14, %c0_15] : memref<16x128xf32, #tpu.memory_space<vmem>>, vector<16x128xf32>
      tpu.vector_store %arg5[%c0_14, %c0_15], %16 {strides = array<i32>} : memref<16x128xf32, #tpu.memory_space<vmem>>, vector<16x128xf32>,
      %18 = vector.extract_strided_slice %15 {offsets = [0, 128], sizes = [16, 128], strides = [1, 1]} : vector<16x256xf32> to vector<16x128xf32>
      %c0_16 = arith.constant 0 : index
      %c0_17 = arith.constant 0 : index
      %19 = vector.load %arg6[%c0_16, %c0_17] : memref<16x128xf32, #tpu.memory_space<vmem>>, vector<16x128xf32>
      tpu.vector_store %arg6[%c0_16, %c0_17], %18 {strides = array<i32>} : memref<16x128xf32, #tpu.memory_space<vmem>>, vector<16x128xf32>,
    } else {
    }
    return
  }
  func.func @transform_0(%arg0: i32, %arg1: i32) -> (i32, i32) {
    %c0_i32 = arith.constant 0 : i32
    return %arg0, %arg1 : i32, i32
  }
  func.func @transform_1(%arg0: i32, %arg1: i32) -> (i32, i32) {
    %c0_i32 = arith.constant 0 : i32
    %c0_i32_0 = arith.constant 0 : i32
    return %arg1, %c0_i32 : i32, i32
  }
  func.func @transform_2(%arg0: i32, %arg1: i32) -> (i32, i32) {
    %c0_i32 = arith.constant 0 : i32
    %c0_i32_0 = arith.constant 0 : i32
    %c0_i32_1 = arith.constant 0 : i32
    return %c0_i32, %c0_i32_0 : i32, i32
  }
  func.func @transform_3(%arg0: i32, %arg1: i32) -> (i32, i32) {
    %c0_i32 = arith.constant 0 : i32
    %c0_i32_0 = arith.constant 0 : i32
    return %arg0, %c0_i32 : i32, i32
  }
  func.func @transform_4(%arg0: i32, %arg1: i32) -> (i32, i32) {
    %c0_i32 = arith.constant 0 : i32
    %c0_i32_0 = arith.constant 0 : i32
    return %arg0, %c0_i32 : i32, i32
  }
}

module attributes {stable_mosaic.version = 11 : i64} {
  func.func @_bilstm_chunk_kernel(%arg0: i32, %arg1: memref<8x8x128xf32, #tpu.memory_space<vmem>>, %arg2: memref<8x8x128xf32, #tpu.memory_space<vmem>>, %arg3: memref<32x128xf32, #tpu.memory_space<vmem>>, %arg4: memref<32x128xf32, #tpu.memory_space<vmem>>, %arg5: memref<8x8x64xf32, #tpu.memory_space<vmem>>, %arg6: memref<8x32xf32, #tpu.memory_space<vmem>>, %arg7: memref<8x32xf32, #tpu.memory_space<vmem>>, %arg8: memref<8x32xf32, #tpu.memory_space<vmem>>, %arg9: memref<8x32xf32, #tpu.memory_space<vmem>>) attributes {dimension_semantics = [#tpu.dimension_semantics<arbitrary>], iteration_bounds = array<i64: 1>, scalar_prefetch = 0 : i64, scratch_operands = 4 : i64, tpu.core_type = #tpu.core_type<tc>, window_params = [{transform_indices = @transform_0, window_bounds = array<i64: 8, 8, 128>}, {transform_indices = @transform_1, window_bounds = array<i64: 8, 8, 128>}, {pipeline_mode = #tpu.pipeline_mode<synchronous>, transform_indices = @transform_2, window_bounds = array<i64: 32, 128>}, {pipeline_mode = #tpu.pipeline_mode<synchronous>, transform_indices = @transform_3, window_bounds = array<i64: 32, 128>}, {pipeline_mode = #tpu.pipeline_mode<synchronous>, transform_indices = @transform_4, window_bounds = array<i64: 8, 8, 64>}]} {
    %c0_i32 = arith.constant 0 : i32
    %0 = arith.cmpi eq, %arg0, %c0_i32 : i32
    %1 = arith.extui %0 : i1 to i32
    %c0_i32_0 = arith.constant 0 : i32
    %2 = arith.cmpi ne, %1, %c0_i32_0 : i32
    scf.if %2 {
      %cst_319 = arith.constant 0.000000e+00 : f32
      %675 = vector.broadcast %cst_319 : f32 to vector<8x32xf32>
      %c0_320 = arith.constant 0 : index
      %c0_321 = arith.constant 0 : index
      %676 = vector.load %arg6[%c0_320, %c0_321] : memref<8x32xf32, #tpu.memory_space<vmem>>, vector<8x32xf32>
      tpu.vector_store %arg6[%c0_320, %c0_321], %675 {strides = array<i32>} : memref<8x32xf32, #tpu.memory_space<vmem>>, vector<8x32xf32>,
      %cst_322 = arith.constant 0.000000e+00 : f32
      %677 = vector.broadcast %cst_322 : f32 to vector<8x32xf32>
      %c0_323 = arith.constant 0 : index
      %c0_324 = arith.constant 0 : index
      %678 = vector.load %arg7[%c0_323, %c0_324] : memref<8x32xf32, #tpu.memory_space<vmem>>, vector<8x32xf32>
      tpu.vector_store %arg7[%c0_323, %c0_324], %677 {strides = array<i32>} : memref<8x32xf32, #tpu.memory_space<vmem>>, vector<8x32xf32>,
      %cst_325 = arith.constant 0.000000e+00 : f32
      %679 = vector.broadcast %cst_325 : f32 to vector<8x32xf32>
      %c0_326 = arith.constant 0 : index
      %c0_327 = arith.constant 0 : index
      %680 = vector.load %arg8[%c0_326, %c0_327] : memref<8x32xf32, #tpu.memory_space<vmem>>, vector<8x32xf32>
      tpu.vector_store %arg8[%c0_326, %c0_327], %679 {strides = array<i32>} : memref<8x32xf32, #tpu.memory_space<vmem>>, vector<8x32xf32>,
      %cst_328 = arith.constant 0.000000e+00 : f32
      %681 = vector.broadcast %cst_328 : f32 to vector<8x32xf32>
      %c0_329 = arith.constant 0 : index
      %c0_330 = arith.constant 0 : index
      %682 = vector.load %arg9[%c0_329, %c0_330] : memref<8x32xf32, #tpu.memory_space<vmem>>, vector<8x32xf32>
      tpu.vector_store %arg9[%c0_329, %c0_330], %681 {strides = array<i32>} : memref<8x32xf32, #tpu.memory_space<vmem>>, vector<8x32xf32>,
    } else {
    }
    %c0_i32_1 = arith.constant 0 : i32
    %3 = arith.index_cast %c0_i32_1 : i32 to index
    %c0 = arith.constant 0 : index
    %c0_2 = arith.constant 0 : index
    %4 = vector.load %arg1[%3, %c0, %c0_2] : memref<8x8x128xf32, #tpu.memory_space<vmem>>, vector<1x8x128xf32>
    %5 = vector.shape_cast %4 : vector<1x8x128xf32> to vector<8x128xf32>
    %c0_3 = arith.constant 0 : index
    %c0_4 = arith.constant 0 : index
    %6 = vector.load %arg6[%c0_3, %c0_4] : memref<8x32xf32, #tpu.memory_space<vmem>>, vector<8x32xf32>
    %c0_5 = arith.constant 0 : index
    %c0_6 = arith.constant 0 : index
    %7 = vector.load %arg3[%c0_5, %c0_6] : memref<32x128xf32, #tpu.memory_space<vmem>>, vector<32x128xf32>
    %cst = arith.constant dense<0.000000e+00> : vector<8x128xf32>
    %8 = tpu.matmul %6, %7, %cst {dimension_numbers = #tpu.dot_dimension_numbers<[1], [0], [0], [1], [0, 0, 1, 1], [], []>} : vector<8x32xf32>, vector<32x128xf32>, vector<8x128xf32> -> vector<8x128xf32>
    %9 = arith.addf %5, %8 : vector<8x128xf32>
    %c0_7 = arith.constant 0 : index
    %c0_8 = arith.constant 0 : index
    %10 = vector.load %arg7[%c0_7, %c0_8] : memref<8x32xf32, #tpu.memory_space<vmem>>, vector<8x32xf32>
    %11 = vector.extract_strided_slice %9 {offsets = [0, 0], sizes = [8, 32], strides = [1, 1]} : vector<8x128xf32> to vector<8x32xf32>
    %12 = arith.negf %11 : vector<8x32xf32>
    %13 = math.exp %12 : vector<8x32xf32>
    %cst_9 = arith.constant 1.000000e+00 : f32
    %14 = vector.broadcast %cst_9 : f32 to vector<8x32xf32>
    %15 = arith.addf %14, %13 : vector<8x32xf32>
    %16 = arith.divf %14, %15 : vector<8x32xf32>
    %17 = vector.extract_strided_slice %9 {offsets = [0, 32], sizes = [8, 32], strides = [1, 1]} : vector<8x128xf32> to vector<8x32xf32>
    %18 = arith.negf %17 : vector<8x32xf32>
    %19 = math.exp %18 : vector<8x32xf32>
    %cst_10 = arith.constant 1.000000e+00 : f32
    %20 = vector.broadcast %cst_10 : f32 to vector<8x32xf32>
    %21 = arith.addf %20, %19 : vector<8x32xf32>
    %22 = arith.divf %20, %21 : vector<8x32xf32>
    %23 = vector.extract_strided_slice %9 {offsets = [0, 64], sizes = [8, 32], strides = [1, 1]} : vector<8x128xf32> to vector<8x32xf32>
    %24 = math.tanh %23 : vector<8x32xf32>
    %25 = vector.extract_strided_slice %9 {offsets = [0, 96], sizes = [8, 32], strides = [1, 1]} : vector<8x128xf32> to vector<8x32xf32>
    %26 = arith.negf %25 : vector<8x32xf32>
    %27 = math.exp %26 : vector<8x32xf32>
    %cst_11 = arith.constant 1.000000e+00 : f32
    %28 = vector.broadcast %cst_11 : f32 to vector<8x32xf32>
    %29 = arith.addf %28, %27 : vector<8x32xf32>
    %30 = arith.divf %28, %29 : vector<8x32xf32>
    %31 = arith.mulf %22, %10 : vector<8x32xf32>
    %32 = arith.mulf %16, %24 : vector<8x32xf32>
    %33 = arith.addf %31, %32 : vector<8x32xf32>
    %34 = math.tanh %33 : vector<8x32xf32>
    %35 = arith.mulf %30, %34 : vector<8x32xf32>
    %c0_12 = arith.constant 0 : index
    %c0_13 = arith.constant 0 : index
    %36 = vector.load %arg6[%c0_12, %c0_13] : memref<8x32xf32, #tpu.memory_space<vmem>>, vector<8x32xf32>
    tpu.vector_store %arg6[%c0_12, %c0_13], %35 {strides = array<i32>} : memref<8x32xf32, #tpu.memory_space<vmem>>, vector<8x32xf32>,
    %c0_14 = arith.constant 0 : index
    %c0_15 = arith.constant 0 : index
    %37 = vector.load %arg7[%c0_14, %c0_15] : memref<8x32xf32, #tpu.memory_space<vmem>>, vector<8x32xf32>
    tpu.vector_store %arg7[%c0_14, %c0_15], %33 {strides = array<i32>} : memref<8x32xf32, #tpu.memory_space<vmem>>, vector<8x32xf32>,
    %c8_i32 = arith.constant 8 : i32
    %38 = arith.muli %arg0, %c8_i32 : i32
    %39 = arith.addi %38, %c0_i32_1 : i32
    %40 = arith.index_cast %39 : i32 to index
    %c0_16 = arith.constant 0 : index
    %c0_17 = arith.constant 0 : index
    %41 = vector.load %arg5[%40, %c0_16, %c0_17] : memref<8x8x64xf32, #tpu.memory_space<vmem>>, vector<1x8x32xf32>
    %42 = vector.shape_cast %41 : vector<1x8x32xf32> to vector<8x32xf32>
    %43 = vector.shape_cast %35 : vector<8x32xf32> to vector<1x8x32xf32>
    tpu.vector_store %arg5[%40, %c0_16, %c0_17], %43 {strides = array<i32>} : memref<8x8x64xf32, #tpu.memory_space<vmem>>, vector<1x8x32xf32>,
    %c7_i32 = arith.constant 7 : i32
    %44 = arith.subi %c7_i32, %c0_i32_1 : i32
    %45 = arith.index_cast %44 : i32 to index
    %c0_18 = arith.constant 0 : index
    %c0_19 = arith.constant 0 : index
    %46 = vector.load %arg2[%45, %c0_18, %c0_19] : memref<8x8x128xf32, #tpu.memory_space<vmem>>, vector<1x8x128xf32>
    %47 = vector.shape_cast %46 : vector<1x8x128xf32> to vector<8x128xf32>
    %c0_20 = arith.constant 0 : index
    %c0_21 = arith.constant 0 : index
    %48 = vector.load %arg8[%c0_20, %c0_21] : memref<8x32xf32, #tpu.memory_space<vmem>>, vector<8x32xf32>
    %c0_22 = arith.constant 0 : index
    %c0_23 = arith.constant 0 : index
    %49 = vector.load %arg4[%c0_22, %c0_23] : memref<32x128xf32, #tpu.memory_space<vmem>>, vector<32x128xf32>
    %cst_24 = arith.constant dense<0.000000e+00> : vector<8x128xf32>
    %50 = tpu.matmul %48, %49, %cst_24 {dimension_numbers = #tpu.dot_dimension_numbers<[1], [0], [0], [1], [0, 0, 1, 1], [], []>} : vector<8x32xf32>, vector<32x128xf32>, vector<8x128xf32> -> vector<8x128xf32>
    %51 = arith.addf %47, %50 : vector<8x128xf32>
    %c0_25 = arith.constant 0 : index
    %c0_26 = arith.constant 0 : index
    %52 = vector.load %arg9[%c0_25, %c0_26] : memref<8x32xf32, #tpu.memory_space<vmem>>, vector<8x32xf32>
    %53 = vector.extract_strided_slice %51 {offsets = [0, 0], sizes = [8, 32], strides = [1, 1]} : vector<8x128xf32> to vector<8x32xf32>
    %54 = arith.negf %53 : vector<8x32xf32>
    %55 = math.exp %54 : vector<8x32xf32>
    %cst_27 = arith.constant 1.000000e+00 : f32
    %56 = vector.broadcast %cst_27 : f32 to vector<8x32xf32>
    %57 = arith.addf %56, %55 : vector<8x32xf32>
    %58 = arith.divf %56, %57 : vector<8x32xf32>
    %59 = vector.extract_strided_slice %51 {offsets = [0, 32], sizes = [8, 32], strides = [1, 1]} : vector<8x128xf32> to vector<8x32xf32>
    %60 = arith.negf %59 : vector<8x32xf32>
    %61 = math.exp %60 : vector<8x32xf32>
    %cst_28 = arith.constant 1.000000e+00 : f32
    %62 = vector.broadcast %cst_28 : f32 to vector<8x32xf32>
    %63 = arith.addf %62, %61 : vector<8x32xf32>
    %64 = arith.divf %62, %63 : vector<8x32xf32>
    %65 = vector.extract_strided_slice %51 {offsets = [0, 64], sizes = [8, 32], strides = [1, 1]} : vector<8x128xf32> to vector<8x32xf32>
    %66 = math.tanh %65 : vector<8x32xf32>
    %67 = vector.extract_strided_slice %51 {offsets = [0, 96], sizes = [8, 32], strides = [1, 1]} : vector<8x128xf32> to vector<8x32xf32>
    %68 = arith.negf %67 : vector<8x32xf32>
    %69 = math.exp %68 : vector<8x32xf32>
    %cst_29 = arith.constant 1.000000e+00 : f32
    %70 = vector.broadcast %cst_29 : f32 to vector<8x32xf32>
    %71 = arith.addf %70, %69 : vector<8x32xf32>
    %72 = arith.divf %70, %71 : vector<8x32xf32>
    %73 = arith.mulf %64, %52 : vector<8x32xf32>
    %74 = arith.mulf %58, %66 : vector<8x32xf32>
    %75 = arith.addf %73, %74 : vector<8x32xf32>
    %76 = math.tanh %75 : vector<8x32xf32>
    %77 = arith.mulf %72, %76 : vector<8x32xf32>
    %c0_30 = arith.constant 0 : index
    %c0_31 = arith.constant 0 : index
    %78 = vector.load %arg8[%c0_30, %c0_31] : memref<8x32xf32, #tpu.memory_space<vmem>>, vector<8x32xf32>
    tpu.vector_store %arg8[%c0_30, %c0_31], %77 {strides = array<i32>} : memref<8x32xf32, #tpu.memory_space<vmem>>, vector<8x32xf32>,
    %c0_32 = arith.constant 0 : index
    %c0_33 = arith.constant 0 : index
    %79 = vector.load %arg9[%c0_32, %c0_33] : memref<8x32xf32, #tpu.memory_space<vmem>>, vector<8x32xf32>
    tpu.vector_store %arg9[%c0_32, %c0_33], %75 {strides = array<i32>} : memref<8x32xf32, #tpu.memory_space<vmem>>, vector<8x32xf32>,
    %c0_i32_34 = arith.constant 0 : i32
    %80 = arith.subi %c0_i32_34, %arg0 : i32
    %c8_i32_35 = arith.constant 8 : i32
    %81 = arith.muli %80, %c8_i32_35 : i32
    %82 = arith.addi %81, %44 : i32
    %83 = arith.index_cast %82 : i32 to index
    %c0_36 = arith.constant 0 : index
    %c32 = arith.constant 32 : index
    %84 = vector.load %arg5[%83, %c0_36, %c32] : memref<8x8x64xf32, #tpu.memory_space<vmem>>, vector<1x8x32xf32>
    %85 = vector.shape_cast %84 : vector<1x8x32xf32> to vector<8x32xf32>
    %86 = vector.shape_cast %77 : vector<8x32xf32> to vector<1x8x32xf32>
    tpu.vector_store %arg5[%83, %c0_36, %c32], %86 {strides = array<i32>} : memref<8x8x64xf32, #tpu.memory_space<vmem>>, vector<1x8x32xf32>,
    %c1_i32 = arith.constant 1 : i32
    %87 = arith.index_cast %c1_i32 : i32 to index
    %c0_37 = arith.constant 0 : index
    %c0_38 = arith.constant 0 : index
    %88 = vector.load %arg1[%87, %c0_37, %c0_38] : memref<8x8x128xf32, #tpu.memory_space<vmem>>, vector<1x8x128xf32>
    %89 = vector.shape_cast %88 : vector<1x8x128xf32> to vector<8x128xf32>
    %c0_39 = arith.constant 0 : index
    %c0_40 = arith.constant 0 : index
    %90 = vector.load %arg6[%c0_39, %c0_40] : memref<8x32xf32, #tpu.memory_space<vmem>>, vector<8x32xf32>
    %c0_41 = arith.constant 0 : index
    %c0_42 = arith.constant 0 : index
    %91 = vector.load %arg3[%c0_41, %c0_42] : memref<32x128xf32, #tpu.memory_space<vmem>>, vector<32x128xf32>
    %cst_43 = arith.constant dense<0.000000e+00> : vector<8x128xf32>
    %92 = tpu.matmul %90, %91, %cst_43 {dimension_numbers = #tpu.dot_dimension_numbers<[1], [0], [0], [1], [0, 0, 1, 1], [], []>} : vector<8x32xf32>, vector<32x128xf32>, vector<8x128xf32> -> vector<8x128xf32>
    %93 = arith.addf %89, %92 : vector<8x128xf32>
    %c0_44 = arith.constant 0 : index
    %c0_45 = arith.constant 0 : index
    %94 = vector.load %arg7[%c0_44, %c0_45] : memref<8x32xf32, #tpu.memory_space<vmem>>, vector<8x32xf32>
    %95 = vector.extract_strided_slice %93 {offsets = [0, 0], sizes = [8, 32], strides = [1, 1]} : vector<8x128xf32> to vector<8x32xf32>
    %96 = arith.negf %95 : vector<8x32xf32>
    %97 = math.exp %96 : vector<8x32xf32>
    %cst_46 = arith.constant 1.000000e+00 : f32
    %98 = vector.broadcast %cst_46 : f32 to vector<8x32xf32>
    %99 = arith.addf %98, %97 : vector<8x32xf32>
    %100 = arith.divf %98, %99 : vector<8x32xf32>
    %101 = vector.extract_strided_slice %93 {offsets = [0, 32], sizes = [8, 32], strides = [1, 1]} : vector<8x128xf32> to vector<8x32xf32>
    %102 = arith.negf %101 : vector<8x32xf32>
    %103 = math.exp %102 : vector<8x32xf32>
    %cst_47 = arith.constant 1.000000e+00 : f32
    %104 = vector.broadcast %cst_47 : f32 to vector<8x32xf32>
    %105 = arith.addf %104, %103 : vector<8x32xf32>
    %106 = arith.divf %104, %105 : vector<8x32xf32>
    %107 = vector.extract_strided_slice %93 {offsets = [0, 64], sizes = [8, 32], strides = [1, 1]} : vector<8x128xf32> to vector<8x32xf32>
    %108 = math.tanh %107 : vector<8x32xf32>
    %109 = vector.extract_strided_slice %93 {offsets = [0, 96], sizes = [8, 32], strides = [1, 1]} : vector<8x128xf32> to vector<8x32xf32>
    %110 = arith.negf %109 : vector<8x32xf32>
    %111 = math.exp %110 : vector<8x32xf32>
    %cst_48 = arith.constant 1.000000e+00 : f32
    %112 = vector.broadcast %cst_48 : f32 to vector<8x32xf32>
    %113 = arith.addf %112, %111 : vector<8x32xf32>
    %114 = arith.divf %112, %113 : vector<8x32xf32>
    %115 = arith.mulf %106, %94 : vector<8x32xf32>
    %116 = arith.mulf %100, %108 : vector<8x32xf32>
    %117 = arith.addf %115, %116 : vector<8x32xf32>
    %118 = math.tanh %117 : vector<8x32xf32>
    %119 = arith.mulf %114, %118 : vector<8x32xf32>
    %c0_49 = arith.constant 0 : index
    %c0_50 = arith.constant 0 : index
    %120 = vector.load %arg6[%c0_49, %c0_50] : memref<8x32xf32, #tpu.memory_space<vmem>>, vector<8x32xf32>
    tpu.vector_store %arg6[%c0_49, %c0_50], %119 {strides = array<i32>} : memref<8x32xf32, #tpu.memory_space<vmem>>, vector<8x32xf32>,
    %c0_51 = arith.constant 0 : index
    %c0_52 = arith.constant 0 : index
    %121 = vector.load %arg7[%c0_51, %c0_52] : memref<8x32xf32, #tpu.memory_space<vmem>>, vector<8x32xf32>
    tpu.vector_store %arg7[%c0_51, %c0_52], %117 {strides = array<i32>} : memref<8x32xf32, #tpu.memory_space<vmem>>, vector<8x32xf32>,
    %c8_i32_53 = arith.constant 8 : i32
    %122 = arith.muli %arg0, %c8_i32_53 : i32
    %123 = arith.addi %122, %c1_i32 : i32
    %124 = arith.index_cast %123 : i32 to index
    %c0_54 = arith.constant 0 : index
    %c0_55 = arith.constant 0 : index
    %125 = vector.load %arg5[%124, %c0_54, %c0_55] : memref<8x8x64xf32, #tpu.memory_space<vmem>>, vector<1x8x32xf32>
    %126 = vector.shape_cast %125 : vector<1x8x32xf32> to vector<8x32xf32>
    %127 = vector.shape_cast %119 : vector<8x32xf32> to vector<1x8x32xf32>
    tpu.vector_store %arg5[%124, %c0_54, %c0_55], %127 {strides = array<i32>} : memref<8x8x64xf32, #tpu.memory_space<vmem>>, vector<1x8x32xf32>,
    %c7_i32_56 = arith.constant 7 : i32
    %128 = arith.subi %c7_i32_56, %c1_i32 : i32
    %129 = arith.index_cast %128 : i32 to index
    %c0_57 = arith.constant 0 : index
    %c0_58 = arith.constant 0 : index
    %130 = vector.load %arg2[%129, %c0_57, %c0_58] : memref<8x8x128xf32, #tpu.memory_space<vmem>>, vector<1x8x128xf32>
    %131 = vector.shape_cast %130 : vector<1x8x128xf32> to vector<8x128xf32>
    %c0_59 = arith.constant 0 : index
    %c0_60 = arith.constant 0 : index
    %132 = vector.load %arg8[%c0_59, %c0_60] : memref<8x32xf32, #tpu.memory_space<vmem>>, vector<8x32xf32>
    %c0_61 = arith.constant 0 : index
    %c0_62 = arith.constant 0 : index
    %133 = vector.load %arg4[%c0_61, %c0_62] : memref<32x128xf32, #tpu.memory_space<vmem>>, vector<32x128xf32>
    %cst_63 = arith.constant dense<0.000000e+00> : vector<8x128xf32>
    %134 = tpu.matmul %132, %133, %cst_63 {dimension_numbers = #tpu.dot_dimension_numbers<[1], [0], [0], [1], [0, 0, 1, 1], [], []>} : vector<8x32xf32>, vector<32x128xf32>, vector<8x128xf32> -> vector<8x128xf32>
    %135 = arith.addf %131, %134 : vector<8x128xf32>
    %c0_64 = arith.constant 0 : index
    %c0_65 = arith.constant 0 : index
    %136 = vector.load %arg9[%c0_64, %c0_65] : memref<8x32xf32, #tpu.memory_space<vmem>>, vector<8x32xf32>
    %137 = vector.extract_strided_slice %135 {offsets = [0, 0], sizes = [8, 32], strides = [1, 1]} : vector<8x128xf32> to vector<8x32xf32>
    %138 = arith.negf %137 : vector<8x32xf32>
    %139 = math.exp %138 : vector<8x32xf32>
    %cst_66 = arith.constant 1.000000e+00 : f32
    %140 = vector.broadcast %cst_66 : f32 to vector<8x32xf32>
    %141 = arith.addf %140, %139 : vector<8x32xf32>
    %142 = arith.divf %140, %141 : vector<8x32xf32>
    %143 = vector.extract_strided_slice %135 {offsets = [0, 32], sizes = [8, 32], strides = [1, 1]} : vector<8x128xf32> to vector<8x32xf32>
    %144 = arith.negf %143 : vector<8x32xf32>
    %145 = math.exp %144 : vector<8x32xf32>
    %cst_67 = arith.constant 1.000000e+00 : f32
    %146 = vector.broadcast %cst_67 : f32 to vector<8x32xf32>
    %147 = arith.addf %146, %145 : vector<8x32xf32>
    %148 = arith.divf %146, %147 : vector<8x32xf32>
    %149 = vector.extract_strided_slice %135 {offsets = [0, 64], sizes = [8, 32], strides = [1, 1]} : vector<8x128xf32> to vector<8x32xf32>
    %150 = math.tanh %149 : vector<8x32xf32>
    %151 = vector.extract_strided_slice %135 {offsets = [0, 96], sizes = [8, 32], strides = [1, 1]} : vector<8x128xf32> to vector<8x32xf32>
    %152 = arith.negf %151 : vector<8x32xf32>
    %153 = math.exp %152 : vector<8x32xf32>
    %cst_68 = arith.constant 1.000000e+00 : f32
    %154 = vector.broadcast %cst_68 : f32 to vector<8x32xf32>
    %155 = arith.addf %154, %153 : vector<8x32xf32>
    %156 = arith.divf %154, %155 : vector<8x32xf32>
    %157 = arith.mulf %148, %136 : vector<8x32xf32>
    %158 = arith.mulf %142, %150 : vector<8x32xf32>
    %159 = arith.addf %157, %158 : vector<8x32xf32>
    %160 = math.tanh %159 : vector<8x32xf32>
    %161 = arith.mulf %156, %160 : vector<8x32xf32>
    %c0_69 = arith.constant 0 : index
    %c0_70 = arith.constant 0 : index
    %162 = vector.load %arg8[%c0_69, %c0_70] : memref<8x32xf32, #tpu.memory_space<vmem>>, vector<8x32xf32>
    tpu.vector_store %arg8[%c0_69, %c0_70], %161 {strides = array<i32>} : memref<8x32xf32, #tpu.memory_space<vmem>>, vector<8x32xf32>,
    %c0_71 = arith.constant 0 : index
    %c0_72 = arith.constant 0 : index
    %163 = vector.load %arg9[%c0_71, %c0_72] : memref<8x32xf32, #tpu.memory_space<vmem>>, vector<8x32xf32>
    tpu.vector_store %arg9[%c0_71, %c0_72], %159 {strides = array<i32>} : memref<8x32xf32, #tpu.memory_space<vmem>>, vector<8x32xf32>,
    %c0_i32_73 = arith.constant 0 : i32
    %164 = arith.subi %c0_i32_73, %arg0 : i32
    %c8_i32_74 = arith.constant 8 : i32
    %165 = arith.muli %164, %c8_i32_74 : i32
    %166 = arith.addi %165, %128 : i32
    %167 = arith.index_cast %166 : i32 to index
    %c0_75 = arith.constant 0 : index
    %c32_76 = arith.constant 32 : index
    %168 = vector.load %arg5[%167, %c0_75, %c32_76] : memref<8x8x64xf32, #tpu.memory_space<vmem>>, vector<1x8x32xf32>
    %169 = vector.shape_cast %168 : vector<1x8x32xf32> to vector<8x32xf32>
    %170 = vector.shape_cast %161 : vector<8x32xf32> to vector<1x8x32xf32>
    tpu.vector_store %arg5[%167, %c0_75, %c32_76], %170 {strides = array<i32>} : memref<8x8x64xf32, #tpu.memory_space<vmem>>, vector<1x8x32xf32>,
    %c2_i32 = arith.constant 2 : i32
    %171 = arith.index_cast %c2_i32 : i32 to index
    %c0_77 = arith.constant 0 : index
    %c0_78 = arith.constant 0 : index
    %172 = vector.load %arg1[%171, %c0_77, %c0_78] : memref<8x8x128xf32, #tpu.memory_space<vmem>>, vector<1x8x128xf32>
    %173 = vector.shape_cast %172 : vector<1x8x128xf32> to vector<8x128xf32>
    %c0_79 = arith.constant 0 : index
    %c0_80 = arith.constant 0 : index
    %174 = vector.load %arg6[%c0_79, %c0_80] : memref<8x32xf32, #tpu.memory_space<vmem>>, vector<8x32xf32>
    %c0_81 = arith.constant 0 : index
    %c0_82 = arith.constant 0 : index
    %175 = vector.load %arg3[%c0_81, %c0_82] : memref<32x128xf32, #tpu.memory_space<vmem>>, vector<32x128xf32>
    %cst_83 = arith.constant dense<0.000000e+00> : vector<8x128xf32>
    %176 = tpu.matmul %174, %175, %cst_83 {dimension_numbers = #tpu.dot_dimension_numbers<[1], [0], [0], [1], [0, 0, 1, 1], [], []>} : vector<8x32xf32>, vector<32x128xf32>, vector<8x128xf32> -> vector<8x128xf32>
    %177 = arith.addf %173, %176 : vector<8x128xf32>
    %c0_84 = arith.constant 0 : index
    %c0_85 = arith.constant 0 : index
    %178 = vector.load %arg7[%c0_84, %c0_85] : memref<8x32xf32, #tpu.memory_space<vmem>>, vector<8x32xf32>
    %179 = vector.extract_strided_slice %177 {offsets = [0, 0], sizes = [8, 32], strides = [1, 1]} : vector<8x128xf32> to vector<8x32xf32>
    %180 = arith.negf %179 : vector<8x32xf32>
    %181 = math.exp %180 : vector<8x32xf32>
    %cst_86 = arith.constant 1.000000e+00 : f32
    %182 = vector.broadcast %cst_86 : f32 to vector<8x32xf32>
    %183 = arith.addf %182, %181 : vector<8x32xf32>
    %184 = arith.divf %182, %183 : vector<8x32xf32>
    %185 = vector.extract_strided_slice %177 {offsets = [0, 32], sizes = [8, 32], strides = [1, 1]} : vector<8x128xf32> to vector<8x32xf32>
    %186 = arith.negf %185 : vector<8x32xf32>
    %187 = math.exp %186 : vector<8x32xf32>
    %cst_87 = arith.constant 1.000000e+00 : f32
    %188 = vector.broadcast %cst_87 : f32 to vector<8x32xf32>
    %189 = arith.addf %188, %187 : vector<8x32xf32>
    %190 = arith.divf %188, %189 : vector<8x32xf32>
    %191 = vector.extract_strided_slice %177 {offsets = [0, 64], sizes = [8, 32], strides = [1, 1]} : vector<8x128xf32> to vector<8x32xf32>
    %192 = math.tanh %191 : vector<8x32xf32>
    %193 = vector.extract_strided_slice %177 {offsets = [0, 96], sizes = [8, 32], strides = [1, 1]} : vector<8x128xf32> to vector<8x32xf32>
    %194 = arith.negf %193 : vector<8x32xf32>
    %195 = math.exp %194 : vector<8x32xf32>
    %cst_88 = arith.constant 1.000000e+00 : f32
    %196 = vector.broadcast %cst_88 : f32 to vector<8x32xf32>
    %197 = arith.addf %196, %195 : vector<8x32xf32>
    %198 = arith.divf %196, %197 : vector<8x32xf32>
    %199 = arith.mulf %190, %178 : vector<8x32xf32>
    %200 = arith.mulf %184, %192 : vector<8x32xf32>
    %201 = arith.addf %199, %200 : vector<8x32xf32>
    %202 = math.tanh %201 : vector<8x32xf32>
    %203 = arith.mulf %198, %202 : vector<8x32xf32>
    %c0_89 = arith.constant 0 : index
    %c0_90 = arith.constant 0 : index
    %204 = vector.load %arg6[%c0_89, %c0_90] : memref<8x32xf32, #tpu.memory_space<vmem>>, vector<8x32xf32>
    tpu.vector_store %arg6[%c0_89, %c0_90], %203 {strides = array<i32>} : memref<8x32xf32, #tpu.memory_space<vmem>>, vector<8x32xf32>,
    %c0_91 = arith.constant 0 : index
    %c0_92 = arith.constant 0 : index
    %205 = vector.load %arg7[%c0_91, %c0_92] : memref<8x32xf32, #tpu.memory_space<vmem>>, vector<8x32xf32>
    tpu.vector_store %arg7[%c0_91, %c0_92], %201 {strides = array<i32>} : memref<8x32xf32, #tpu.memory_space<vmem>>, vector<8x32xf32>,
    %c8_i32_93 = arith.constant 8 : i32
    %206 = arith.muli %arg0, %c8_i32_93 : i32
    %207 = arith.addi %206, %c2_i32 : i32
    %208 = arith.index_cast %207 : i32 to index
    %c0_94 = arith.constant 0 : index
    %c0_95 = arith.constant 0 : index
    %209 = vector.load %arg5[%208, %c0_94, %c0_95] : memref<8x8x64xf32, #tpu.memory_space<vmem>>, vector<1x8x32xf32>
    %210 = vector.shape_cast %209 : vector<1x8x32xf32> to vector<8x32xf32>
    %211 = vector.shape_cast %203 : vector<8x32xf32> to vector<1x8x32xf32>
    tpu.vector_store %arg5[%208, %c0_94, %c0_95], %211 {strides = array<i32>} : memref<8x8x64xf32, #tpu.memory_space<vmem>>, vector<1x8x32xf32>,
    %c7_i32_96 = arith.constant 7 : i32
    %212 = arith.subi %c7_i32_96, %c2_i32 : i32
    %213 = arith.index_cast %212 : i32 to index
    %c0_97 = arith.constant 0 : index
    %c0_98 = arith.constant 0 : index
    %214 = vector.load %arg2[%213, %c0_97, %c0_98] : memref<8x8x128xf32, #tpu.memory_space<vmem>>, vector<1x8x128xf32>
    %215 = vector.shape_cast %214 : vector<1x8x128xf32> to vector<8x128xf32>
    %c0_99 = arith.constant 0 : index
    %c0_100 = arith.constant 0 : index
    %216 = vector.load %arg8[%c0_99, %c0_100] : memref<8x32xf32, #tpu.memory_space<vmem>>, vector<8x32xf32>
    %c0_101 = arith.constant 0 : index
    %c0_102 = arith.constant 0 : index
    %217 = vector.load %arg4[%c0_101, %c0_102] : memref<32x128xf32, #tpu.memory_space<vmem>>, vector<32x128xf32>
    %cst_103 = arith.constant dense<0.000000e+00> : vector<8x128xf32>
    %218 = tpu.matmul %216, %217, %cst_103 {dimension_numbers = #tpu.dot_dimension_numbers<[1], [0], [0], [1], [0, 0, 1, 1], [], []>} : vector<8x32xf32>, vector<32x128xf32>, vector<8x128xf32> -> vector<8x128xf32>
    %219 = arith.addf %215, %218 : vector<8x128xf32>
    %c0_104 = arith.constant 0 : index
    %c0_105 = arith.constant 0 : index
    %220 = vector.load %arg9[%c0_104, %c0_105] : memref<8x32xf32, #tpu.memory_space<vmem>>, vector<8x32xf32>
    %221 = vector.extract_strided_slice %219 {offsets = [0, 0], sizes = [8, 32], strides = [1, 1]} : vector<8x128xf32> to vector<8x32xf32>
    %222 = arith.negf %221 : vector<8x32xf32>
    %223 = math.exp %222 : vector<8x32xf32>
    %cst_106 = arith.constant 1.000000e+00 : f32
    %224 = vector.broadcast %cst_106 : f32 to vector<8x32xf32>
    %225 = arith.addf %224, %223 : vector<8x32xf32>
    %226 = arith.divf %224, %225 : vector<8x32xf32>
    %227 = vector.extract_strided_slice %219 {offsets = [0, 32], sizes = [8, 32], strides = [1, 1]} : vector<8x128xf32> to vector<8x32xf32>
    %228 = arith.negf %227 : vector<8x32xf32>
    %229 = math.exp %228 : vector<8x32xf32>
    %cst_107 = arith.constant 1.000000e+00 : f32
    %230 = vector.broadcast %cst_107 : f32 to vector<8x32xf32>
    %231 = arith.addf %230, %229 : vector<8x32xf32>
    %232 = arith.divf %230, %231 : vector<8x32xf32>
    %233 = vector.extract_strided_slice %219 {offsets = [0, 64], sizes = [8, 32], strides = [1, 1]} : vector<8x128xf32> to vector<8x32xf32>
    %234 = math.tanh %233 : vector<8x32xf32>
    %235 = vector.extract_strided_slice %219 {offsets = [0, 96], sizes = [8, 32], strides = [1, 1]} : vector<8x128xf32> to vector<8x32xf32>
    %236 = arith.negf %235 : vector<8x32xf32>
    %237 = math.exp %236 : vector<8x32xf32>
    %cst_108 = arith.constant 1.000000e+00 : f32
    %238 = vector.broadcast %cst_108 : f32 to vector<8x32xf32>
    %239 = arith.addf %238, %237 : vector<8x32xf32>
    %240 = arith.divf %238, %239 : vector<8x32xf32>
    %241 = arith.mulf %232, %220 : vector<8x32xf32>
    %242 = arith.mulf %226, %234 : vector<8x32xf32>
    %243 = arith.addf %241, %242 : vector<8x32xf32>
    %244 = math.tanh %243 : vector<8x32xf32>
    %245 = arith.mulf %240, %244 : vector<8x32xf32>
    %c0_109 = arith.constant 0 : index
    %c0_110 = arith.constant 0 : index
    %246 = vector.load %arg8[%c0_109, %c0_110] : memref<8x32xf32, #tpu.memory_space<vmem>>, vector<8x32xf32>
    tpu.vector_store %arg8[%c0_109, %c0_110], %245 {strides = array<i32>} : memref<8x32xf32, #tpu.memory_space<vmem>>, vector<8x32xf32>,
    %c0_111 = arith.constant 0 : index
    %c0_112 = arith.constant 0 : index
    %247 = vector.load %arg9[%c0_111, %c0_112] : memref<8x32xf32, #tpu.memory_space<vmem>>, vector<8x32xf32>
    tpu.vector_store %arg9[%c0_111, %c0_112], %243 {strides = array<i32>} : memref<8x32xf32, #tpu.memory_space<vmem>>, vector<8x32xf32>,
    %c0_i32_113 = arith.constant 0 : i32
    %248 = arith.subi %c0_i32_113, %arg0 : i32
    %c8_i32_114 = arith.constant 8 : i32
    %249 = arith.muli %248, %c8_i32_114 : i32
    %250 = arith.addi %249, %212 : i32
    %251 = arith.index_cast %250 : i32 to index
    %c0_115 = arith.constant 0 : index
    %c32_116 = arith.constant 32 : index
    %252 = vector.load %arg5[%251, %c0_115, %c32_116] : memref<8x8x64xf32, #tpu.memory_space<vmem>>, vector<1x8x32xf32>
    %253 = vector.shape_cast %252 : vector<1x8x32xf32> to vector<8x32xf32>
    %254 = vector.shape_cast %245 : vector<8x32xf32> to vector<1x8x32xf32>
    tpu.vector_store %arg5[%251, %c0_115, %c32_116], %254 {strides = array<i32>} : memref<8x8x64xf32, #tpu.memory_space<vmem>>, vector<1x8x32xf32>,
    %c3_i32 = arith.constant 3 : i32
    %255 = arith.index_cast %c3_i32 : i32 to index
    %c0_117 = arith.constant 0 : index
    %c0_118 = arith.constant 0 : index
    %256 = vector.load %arg1[%255, %c0_117, %c0_118] : memref<8x8x128xf32, #tpu.memory_space<vmem>>, vector<1x8x128xf32>
    %257 = vector.shape_cast %256 : vector<1x8x128xf32> to vector<8x128xf32>
    %c0_119 = arith.constant 0 : index
    %c0_120 = arith.constant 0 : index
    %258 = vector.load %arg6[%c0_119, %c0_120] : memref<8x32xf32, #tpu.memory_space<vmem>>, vector<8x32xf32>
    %c0_121 = arith.constant 0 : index
    %c0_122 = arith.constant 0 : index
    %259 = vector.load %arg3[%c0_121, %c0_122] : memref<32x128xf32, #tpu.memory_space<vmem>>, vector<32x128xf32>
    %cst_123 = arith.constant dense<0.000000e+00> : vector<8x128xf32>
    %260 = tpu.matmul %258, %259, %cst_123 {dimension_numbers = #tpu.dot_dimension_numbers<[1], [0], [0], [1], [0, 0, 1, 1], [], []>} : vector<8x32xf32>, vector<32x128xf32>, vector<8x128xf32> -> vector<8x128xf32>
    %261 = arith.addf %257, %260 : vector<8x128xf32>
    %c0_124 = arith.constant 0 : index
    %c0_125 = arith.constant 0 : index
    %262 = vector.load %arg7[%c0_124, %c0_125] : memref<8x32xf32, #tpu.memory_space<vmem>>, vector<8x32xf32>
    %263 = vector.extract_strided_slice %261 {offsets = [0, 0], sizes = [8, 32], strides = [1, 1]} : vector<8x128xf32> to vector<8x32xf32>
    %264 = arith.negf %263 : vector<8x32xf32>
    %265 = math.exp %264 : vector<8x32xf32>
    %cst_126 = arith.constant 1.000000e+00 : f32
    %266 = vector.broadcast %cst_126 : f32 to vector<8x32xf32>
    %267 = arith.addf %266, %265 : vector<8x32xf32>
    %268 = arith.divf %266, %267 : vector<8x32xf32>
    %269 = vector.extract_strided_slice %261 {offsets = [0, 32], sizes = [8, 32], strides = [1, 1]} : vector<8x128xf32> to vector<8x32xf32>
    %270 = arith.negf %269 : vector<8x32xf32>
    %271 = math.exp %270 : vector<8x32xf32>
    %cst_127 = arith.constant 1.000000e+00 : f32
    %272 = vector.broadcast %cst_127 : f32 to vector<8x32xf32>
    %273 = arith.addf %272, %271 : vector<8x32xf32>
    %274 = arith.divf %272, %273 : vector<8x32xf32>
    %275 = vector.extract_strided_slice %261 {offsets = [0, 64], sizes = [8, 32], strides = [1, 1]} : vector<8x128xf32> to vector<8x32xf32>
    %276 = math.tanh %275 : vector<8x32xf32>
    %277 = vector.extract_strided_slice %261 {offsets = [0, 96], sizes = [8, 32], strides = [1, 1]} : vector<8x128xf32> to vector<8x32xf32>
    %278 = arith.negf %277 : vector<8x32xf32>
    %279 = math.exp %278 : vector<8x32xf32>
    %cst_128 = arith.constant 1.000000e+00 : f32
    %280 = vector.broadcast %cst_128 : f32 to vector<8x32xf32>
    %281 = arith.addf %280, %279 : vector<8x32xf32>
    %282 = arith.divf %280, %281 : vector<8x32xf32>
    %283 = arith.mulf %274, %262 : vector<8x32xf32>
    %284 = arith.mulf %268, %276 : vector<8x32xf32>
    %285 = arith.addf %283, %284 : vector<8x32xf32>
    %286 = math.tanh %285 : vector<8x32xf32>
    %287 = arith.mulf %282, %286 : vector<8x32xf32>
    %c0_129 = arith.constant 0 : index
    %c0_130 = arith.constant 0 : index
    %288 = vector.load %arg6[%c0_129, %c0_130] : memref<8x32xf32, #tpu.memory_space<vmem>>, vector<8x32xf32>
    tpu.vector_store %arg6[%c0_129, %c0_130], %287 {strides = array<i32>} : memref<8x32xf32, #tpu.memory_space<vmem>>, vector<8x32xf32>,
    %c0_131 = arith.constant 0 : index
    %c0_132 = arith.constant 0 : index
    %289 = vector.load %arg7[%c0_131, %c0_132] : memref<8x32xf32, #tpu.memory_space<vmem>>, vector<8x32xf32>
    tpu.vector_store %arg7[%c0_131, %c0_132], %285 {strides = array<i32>} : memref<8x32xf32, #tpu.memory_space<vmem>>, vector<8x32xf32>,
    %c8_i32_133 = arith.constant 8 : i32
    %290 = arith.muli %arg0, %c8_i32_133 : i32
    %291 = arith.addi %290, %c3_i32 : i32
    %292 = arith.index_cast %291 : i32 to index
    %c0_134 = arith.constant 0 : index
    %c0_135 = arith.constant 0 : index
    %293 = vector.load %arg5[%292, %c0_134, %c0_135] : memref<8x8x64xf32, #tpu.memory_space<vmem>>, vector<1x8x32xf32>
    %294 = vector.shape_cast %293 : vector<1x8x32xf32> to vector<8x32xf32>
    %295 = vector.shape_cast %287 : vector<8x32xf32> to vector<1x8x32xf32>
    tpu.vector_store %arg5[%292, %c0_134, %c0_135], %295 {strides = array<i32>} : memref<8x8x64xf32, #tpu.memory_space<vmem>>, vector<1x8x32xf32>,
    %c7_i32_136 = arith.constant 7 : i32
    %296 = arith.subi %c7_i32_136, %c3_i32 : i32
    %297 = arith.index_cast %296 : i32 to index
    %c0_137 = arith.constant 0 : index
    %c0_138 = arith.constant 0 : index
    %298 = vector.load %arg2[%297, %c0_137, %c0_138] : memref<8x8x128xf32, #tpu.memory_space<vmem>>, vector<1x8x128xf32>
    %299 = vector.shape_cast %298 : vector<1x8x128xf32> to vector<8x128xf32>
    %c0_139 = arith.constant 0 : index
    %c0_140 = arith.constant 0 : index
    %300 = vector.load %arg8[%c0_139, %c0_140] : memref<8x32xf32, #tpu.memory_space<vmem>>, vector<8x32xf32>
    %c0_141 = arith.constant 0 : index
    %c0_142 = arith.constant 0 : index
    %301 = vector.load %arg4[%c0_141, %c0_142] : memref<32x128xf32, #tpu.memory_space<vmem>>, vector<32x128xf32>
    %cst_143 = arith.constant dense<0.000000e+00> : vector<8x128xf32>
    %302 = tpu.matmul %300, %301, %cst_143 {dimension_numbers = #tpu.dot_dimension_numbers<[1], [0], [0], [1], [0, 0, 1, 1], [], []>} : vector<8x32xf32>, vector<32x128xf32>, vector<8x128xf32> -> vector<8x128xf32>
    %303 = arith.addf %299, %302 : vector<8x128xf32>
    %c0_144 = arith.constant 0 : index
    %c0_145 = arith.constant 0 : index
    %304 = vector.load %arg9[%c0_144, %c0_145] : memref<8x32xf32, #tpu.memory_space<vmem>>, vector<8x32xf32>
    %305 = vector.extract_strided_slice %303 {offsets = [0, 0], sizes = [8, 32], strides = [1, 1]} : vector<8x128xf32> to vector<8x32xf32>
    %306 = arith.negf %305 : vector<8x32xf32>
    %307 = math.exp %306 : vector<8x32xf32>
    %cst_146 = arith.constant 1.000000e+00 : f32
    %308 = vector.broadcast %cst_146 : f32 to vector<8x32xf32>
    %309 = arith.addf %308, %307 : vector<8x32xf32>
    %310 = arith.divf %308, %309 : vector<8x32xf32>
    %311 = vector.extract_strided_slice %303 {offsets = [0, 32], sizes = [8, 32], strides = [1, 1]} : vector<8x128xf32> to vector<8x32xf32>
    %312 = arith.negf %311 : vector<8x32xf32>
    %313 = math.exp %312 : vector<8x32xf32>
    %cst_147 = arith.constant 1.000000e+00 : f32
    %314 = vector.broadcast %cst_147 : f32 to vector<8x32xf32>
    %315 = arith.addf %314, %313 : vector<8x32xf32>
    %316 = arith.divf %314, %315 : vector<8x32xf32>
    %317 = vector.extract_strided_slice %303 {offsets = [0, 64], sizes = [8, 32], strides = [1, 1]} : vector<8x128xf32> to vector<8x32xf32>
    %318 = math.tanh %317 : vector<8x32xf32>
    %319 = vector.extract_strided_slice %303 {offsets = [0, 96], sizes = [8, 32], strides = [1, 1]} : vector<8x128xf32> to vector<8x32xf32>
    %320 = arith.negf %319 : vector<8x32xf32>
    %321 = math.exp %320 : vector<8x32xf32>
    %cst_148 = arith.constant 1.000000e+00 : f32
    %322 = vector.broadcast %cst_148 : f32 to vector<8x32xf32>
    %323 = arith.addf %322, %321 : vector<8x32xf32>
    %324 = arith.divf %322, %323 : vector<8x32xf32>
    %325 = arith.mulf %316, %304 : vector<8x32xf32>
    %326 = arith.mulf %310, %318 : vector<8x32xf32>
    %327 = arith.addf %325, %326 : vector<8x32xf32>
    %328 = math.tanh %327 : vector<8x32xf32>
    %329 = arith.mulf %324, %328 : vector<8x32xf32>
    %c0_149 = arith.constant 0 : index
    %c0_150 = arith.constant 0 : index
    %330 = vector.load %arg8[%c0_149, %c0_150] : memref<8x32xf32, #tpu.memory_space<vmem>>, vector<8x32xf32>
    tpu.vector_store %arg8[%c0_149, %c0_150], %329 {strides = array<i32>} : memref<8x32xf32, #tpu.memory_space<vmem>>, vector<8x32xf32>,
    %c0_151 = arith.constant 0 : index
    %c0_152 = arith.constant 0 : index
    %331 = vector.load %arg9[%c0_151, %c0_152] : memref<8x32xf32, #tpu.memory_space<vmem>>, vector<8x32xf32>
    tpu.vector_store %arg9[%c0_151, %c0_152], %327 {strides = array<i32>} : memref<8x32xf32, #tpu.memory_space<vmem>>, vector<8x32xf32>,
    %c0_i32_153 = arith.constant 0 : i32
    %332 = arith.subi %c0_i32_153, %arg0 : i32
    %c8_i32_154 = arith.constant 8 : i32
    %333 = arith.muli %332, %c8_i32_154 : i32
    %334 = arith.addi %333, %296 : i32
    %335 = arith.index_cast %334 : i32 to index
    %c0_155 = arith.constant 0 : index
    %c32_156 = arith.constant 32 : index
    %336 = vector.load %arg5[%335, %c0_155, %c32_156] : memref<8x8x64xf32, #tpu.memory_space<vmem>>, vector<1x8x32xf32>
    %337 = vector.shape_cast %336 : vector<1x8x32xf32> to vector<8x32xf32>
    %338 = vector.shape_cast %329 : vector<8x32xf32> to vector<1x8x32xf32>
    tpu.vector_store %arg5[%335, %c0_155, %c32_156], %338 {strides = array<i32>} : memref<8x8x64xf32, #tpu.memory_space<vmem>>, vector<1x8x32xf32>,
    %c4_i32 = arith.constant 4 : i32
    %339 = arith.index_cast %c4_i32 : i32 to index
    %c0_157 = arith.constant 0 : index
    %c0_158 = arith.constant 0 : index
    %340 = vector.load %arg1[%339, %c0_157, %c0_158] : memref<8x8x128xf32, #tpu.memory_space<vmem>>, vector<1x8x128xf32>
    %341 = vector.shape_cast %340 : vector<1x8x128xf32> to vector<8x128xf32>
    %c0_159 = arith.constant 0 : index
    %c0_160 = arith.constant 0 : index
    %342 = vector.load %arg6[%c0_159, %c0_160] : memref<8x32xf32, #tpu.memory_space<vmem>>, vector<8x32xf32>
    %c0_161 = arith.constant 0 : index
    %c0_162 = arith.constant 0 : index
    %343 = vector.load %arg3[%c0_161, %c0_162] : memref<32x128xf32, #tpu.memory_space<vmem>>, vector<32x128xf32>
    %cst_163 = arith.constant dense<0.000000e+00> : vector<8x128xf32>
    %344 = tpu.matmul %342, %343, %cst_163 {dimension_numbers = #tpu.dot_dimension_numbers<[1], [0], [0], [1], [0, 0, 1, 1], [], []>} : vector<8x32xf32>, vector<32x128xf32>, vector<8x128xf32> -> vector<8x128xf32>
    %345 = arith.addf %341, %344 : vector<8x128xf32>
    %c0_164 = arith.constant 0 : index
    %c0_165 = arith.constant 0 : index
    %346 = vector.load %arg7[%c0_164, %c0_165] : memref<8x32xf32, #tpu.memory_space<vmem>>, vector<8x32xf32>
    %347 = vector.extract_strided_slice %345 {offsets = [0, 0], sizes = [8, 32], strides = [1, 1]} : vector<8x128xf32> to vector<8x32xf32>
    %348 = arith.negf %347 : vector<8x32xf32>
    %349 = math.exp %348 : vector<8x32xf32>
    %cst_166 = arith.constant 1.000000e+00 : f32
    %350 = vector.broadcast %cst_166 : f32 to vector<8x32xf32>
    %351 = arith.addf %350, %349 : vector<8x32xf32>
    %352 = arith.divf %350, %351 : vector<8x32xf32>
    %353 = vector.extract_strided_slice %345 {offsets = [0, 32], sizes = [8, 32], strides = [1, 1]} : vector<8x128xf32> to vector<8x32xf32>
    %354 = arith.negf %353 : vector<8x32xf32>
    %355 = math.exp %354 : vector<8x32xf32>
    %cst_167 = arith.constant 1.000000e+00 : f32
    %356 = vector.broadcast %cst_167 : f32 to vector<8x32xf32>
    %357 = arith.addf %356, %355 : vector<8x32xf32>
    %358 = arith.divf %356, %357 : vector<8x32xf32>
    %359 = vector.extract_strided_slice %345 {offsets = [0, 64], sizes = [8, 32], strides = [1, 1]} : vector<8x128xf32> to vector<8x32xf32>
    %360 = math.tanh %359 : vector<8x32xf32>
    %361 = vector.extract_strided_slice %345 {offsets = [0, 96], sizes = [8, 32], strides = [1, 1]} : vector<8x128xf32> to vector<8x32xf32>
    %362 = arith.negf %361 : vector<8x32xf32>
    %363 = math.exp %362 : vector<8x32xf32>
    %cst_168 = arith.constant 1.000000e+00 : f32
    %364 = vector.broadcast %cst_168 : f32 to vector<8x32xf32>
    %365 = arith.addf %364, %363 : vector<8x32xf32>
    %366 = arith.divf %364, %365 : vector<8x32xf32>
    %367 = arith.mulf %358, %346 : vector<8x32xf32>
    %368 = arith.mulf %352, %360 : vector<8x32xf32>
    %369 = arith.addf %367, %368 : vector<8x32xf32>
    %370 = math.tanh %369 : vector<8x32xf32>
    %371 = arith.mulf %366, %370 : vector<8x32xf32>
    %c0_169 = arith.constant 0 : index
    %c0_170 = arith.constant 0 : index
    %372 = vector.load %arg6[%c0_169, %c0_170] : memref<8x32xf32, #tpu.memory_space<vmem>>, vector<8x32xf32>
    tpu.vector_store %arg6[%c0_169, %c0_170], %371 {strides = array<i32>} : memref<8x32xf32, #tpu.memory_space<vmem>>, vector<8x32xf32>,
    %c0_171 = arith.constant 0 : index
    %c0_172 = arith.constant 0 : index
    %373 = vector.load %arg7[%c0_171, %c0_172] : memref<8x32xf32, #tpu.memory_space<vmem>>, vector<8x32xf32>
    tpu.vector_store %arg7[%c0_171, %c0_172], %369 {strides = array<i32>} : memref<8x32xf32, #tpu.memory_space<vmem>>, vector<8x32xf32>,
    %c8_i32_173 = arith.constant 8 : i32
    %374 = arith.muli %arg0, %c8_i32_173 : i32
    %375 = arith.addi %374, %c4_i32 : i32
    %376 = arith.index_cast %375 : i32 to index
    %c0_174 = arith.constant 0 : index
    %c0_175 = arith.constant 0 : index
    %377 = vector.load %arg5[%376, %c0_174, %c0_175] : memref<8x8x64xf32, #tpu.memory_space<vmem>>, vector<1x8x32xf32>
    %378 = vector.shape_cast %377 : vector<1x8x32xf32> to vector<8x32xf32>
    %379 = vector.shape_cast %371 : vector<8x32xf32> to vector<1x8x32xf32>
    tpu.vector_store %arg5[%376, %c0_174, %c0_175], %379 {strides = array<i32>} : memref<8x8x64xf32, #tpu.memory_space<vmem>>, vector<1x8x32xf32>,
    %c7_i32_176 = arith.constant 7 : i32
    %380 = arith.subi %c7_i32_176, %c4_i32 : i32
    %381 = arith.index_cast %380 : i32 to index
    %c0_177 = arith.constant 0 : index
    %c0_178 = arith.constant 0 : index
    %382 = vector.load %arg2[%381, %c0_177, %c0_178] : memref<8x8x128xf32, #tpu.memory_space<vmem>>, vector<1x8x128xf32>
    %383 = vector.shape_cast %382 : vector<1x8x128xf32> to vector<8x128xf32>
    %c0_179 = arith.constant 0 : index
    %c0_180 = arith.constant 0 : index
    %384 = vector.load %arg8[%c0_179, %c0_180] : memref<8x32xf32, #tpu.memory_space<vmem>>, vector<8x32xf32>
    %c0_181 = arith.constant 0 : index
    %c0_182 = arith.constant 0 : index
    %385 = vector.load %arg4[%c0_181, %c0_182] : memref<32x128xf32, #tpu.memory_space<vmem>>, vector<32x128xf32>
    %cst_183 = arith.constant dense<0.000000e+00> : vector<8x128xf32>
    %386 = tpu.matmul %384, %385, %cst_183 {dimension_numbers = #tpu.dot_dimension_numbers<[1], [0], [0], [1], [0, 0, 1, 1], [], []>} : vector<8x32xf32>, vector<32x128xf32>, vector<8x128xf32> -> vector<8x128xf32>
    %387 = arith.addf %383, %386 : vector<8x128xf32>
    %c0_184 = arith.constant 0 : index
    %c0_185 = arith.constant 0 : index
    %388 = vector.load %arg9[%c0_184, %c0_185] : memref<8x32xf32, #tpu.memory_space<vmem>>, vector<8x32xf32>
    %389 = vector.extract_strided_slice %387 {offsets = [0, 0], sizes = [8, 32], strides = [1, 1]} : vector<8x128xf32> to vector<8x32xf32>
    %390 = arith.negf %389 : vector<8x32xf32>
    %391 = math.exp %390 : vector<8x32xf32>
    %cst_186 = arith.constant 1.000000e+00 : f32
    %392 = vector.broadcast %cst_186 : f32 to vector<8x32xf32>
    %393 = arith.addf %392, %391 : vector<8x32xf32>
    %394 = arith.divf %392, %393 : vector<8x32xf32>
    %395 = vector.extract_strided_slice %387 {offsets = [0, 32], sizes = [8, 32], strides = [1, 1]} : vector<8x128xf32> to vector<8x32xf32>
    %396 = arith.negf %395 : vector<8x32xf32>
    %397 = math.exp %396 : vector<8x32xf32>
    %cst_187 = arith.constant 1.000000e+00 : f32
    %398 = vector.broadcast %cst_187 : f32 to vector<8x32xf32>
    %399 = arith.addf %398, %397 : vector<8x32xf32>
    %400 = arith.divf %398, %399 : vector<8x32xf32>
    %401 = vector.extract_strided_slice %387 {offsets = [0, 64], sizes = [8, 32], strides = [1, 1]} : vector<8x128xf32> to vector<8x32xf32>
    %402 = math.tanh %401 : vector<8x32xf32>
    %403 = vector.extract_strided_slice %387 {offsets = [0, 96], sizes = [8, 32], strides = [1, 1]} : vector<8x128xf32> to vector<8x32xf32>
    %404 = arith.negf %403 : vector<8x32xf32>
    %405 = math.exp %404 : vector<8x32xf32>
    %cst_188 = arith.constant 1.000000e+00 : f32
    %406 = vector.broadcast %cst_188 : f32 to vector<8x32xf32>
    %407 = arith.addf %406, %405 : vector<8x32xf32>
    %408 = arith.divf %406, %407 : vector<8x32xf32>
    %409 = arith.mulf %400, %388 : vector<8x32xf32>
    %410 = arith.mulf %394, %402 : vector<8x32xf32>
    %411 = arith.addf %409, %410 : vector<8x32xf32>
    %412 = math.tanh %411 : vector<8x32xf32>
    %413 = arith.mulf %408, %412 : vector<8x32xf32>
    %c0_189 = arith.constant 0 : index
    %c0_190 = arith.constant 0 : index
    %414 = vector.load %arg8[%c0_189, %c0_190] : memref<8x32xf32, #tpu.memory_space<vmem>>, vector<8x32xf32>
    tpu.vector_store %arg8[%c0_189, %c0_190], %413 {strides = array<i32>} : memref<8x32xf32, #tpu.memory_space<vmem>>, vector<8x32xf32>,
    %c0_191 = arith.constant 0 : index
    %c0_192 = arith.constant 0 : index
    %415 = vector.load %arg9[%c0_191, %c0_192] : memref<8x32xf32, #tpu.memory_space<vmem>>, vector<8x32xf32>
    tpu.vector_store %arg9[%c0_191, %c0_192], %411 {strides = array<i32>} : memref<8x32xf32, #tpu.memory_space<vmem>>, vector<8x32xf32>,
    %c0_i32_193 = arith.constant 0 : i32
    %416 = arith.subi %c0_i32_193, %arg0 : i32
    %c8_i32_194 = arith.constant 8 : i32
    %417 = arith.muli %416, %c8_i32_194 : i32
    %418 = arith.addi %417, %380 : i32
    %419 = arith.index_cast %418 : i32 to index
    %c0_195 = arith.constant 0 : index
    %c32_196 = arith.constant 32 : index
    %420 = vector.load %arg5[%419, %c0_195, %c32_196] : memref<8x8x64xf32, #tpu.memory_space<vmem>>, vector<1x8x32xf32>
    %421 = vector.shape_cast %420 : vector<1x8x32xf32> to vector<8x32xf32>
    %422 = vector.shape_cast %413 : vector<8x32xf32> to vector<1x8x32xf32>
    tpu.vector_store %arg5[%419, %c0_195, %c32_196], %422 {strides = array<i32>} : memref<8x8x64xf32, #tpu.memory_space<vmem>>, vector<1x8x32xf32>,
    %c5_i32 = arith.constant 5 : i32
    %423 = arith.index_cast %c5_i32 : i32 to index
    %c0_197 = arith.constant 0 : index
    %c0_198 = arith.constant 0 : index
    %424 = vector.load %arg1[%423, %c0_197, %c0_198] : memref<8x8x128xf32, #tpu.memory_space<vmem>>, vector<1x8x128xf32>
    %425 = vector.shape_cast %424 : vector<1x8x128xf32> to vector<8x128xf32>
    %c0_199 = arith.constant 0 : index
    %c0_200 = arith.constant 0 : index
    %426 = vector.load %arg6[%c0_199, %c0_200] : memref<8x32xf32, #tpu.memory_space<vmem>>, vector<8x32xf32>
    %c0_201 = arith.constant 0 : index
    %c0_202 = arith.constant 0 : index
    %427 = vector.load %arg3[%c0_201, %c0_202] : memref<32x128xf32, #tpu.memory_space<vmem>>, vector<32x128xf32>
    %cst_203 = arith.constant dense<0.000000e+00> : vector<8x128xf32>
    %428 = tpu.matmul %426, %427, %cst_203 {dimension_numbers = #tpu.dot_dimension_numbers<[1], [0], [0], [1], [0, 0, 1, 1], [], []>} : vector<8x32xf32>, vector<32x128xf32>, vector<8x128xf32> -> vector<8x128xf32>
    %429 = arith.addf %425, %428 : vector<8x128xf32>
    %c0_204 = arith.constant 0 : index
    %c0_205 = arith.constant 0 : index
    %430 = vector.load %arg7[%c0_204, %c0_205] : memref<8x32xf32, #tpu.memory_space<vmem>>, vector<8x32xf32>
    %431 = vector.extract_strided_slice %429 {offsets = [0, 0], sizes = [8, 32], strides = [1, 1]} : vector<8x128xf32> to vector<8x32xf32>
    %432 = arith.negf %431 : vector<8x32xf32>
    %433 = math.exp %432 : vector<8x32xf32>
    %cst_206 = arith.constant 1.000000e+00 : f32
    %434 = vector.broadcast %cst_206 : f32 to vector<8x32xf32>
    %435 = arith.addf %434, %433 : vector<8x32xf32>
    %436 = arith.divf %434, %435 : vector<8x32xf32>
    %437 = vector.extract_strided_slice %429 {offsets = [0, 32], sizes = [8, 32], strides = [1, 1]} : vector<8x128xf32> to vector<8x32xf32>
    %438 = arith.negf %437 : vector<8x32xf32>
    %439 = math.exp %438 : vector<8x32xf32>
    %cst_207 = arith.constant 1.000000e+00 : f32
    %440 = vector.broadcast %cst_207 : f32 to vector<8x32xf32>
    %441 = arith.addf %440, %439 : vector<8x32xf32>
    %442 = arith.divf %440, %441 : vector<8x32xf32>
    %443 = vector.extract_strided_slice %429 {offsets = [0, 64], sizes = [8, 32], strides = [1, 1]} : vector<8x128xf32> to vector<8x32xf32>
    %444 = math.tanh %443 : vector<8x32xf32>
    %445 = vector.extract_strided_slice %429 {offsets = [0, 96], sizes = [8, 32], strides = [1, 1]} : vector<8x128xf32> to vector<8x32xf32>
    %446 = arith.negf %445 : vector<8x32xf32>
    %447 = math.exp %446 : vector<8x32xf32>
    %cst_208 = arith.constant 1.000000e+00 : f32
    %448 = vector.broadcast %cst_208 : f32 to vector<8x32xf32>
    %449 = arith.addf %448, %447 : vector<8x32xf32>
    %450 = arith.divf %448, %449 : vector<8x32xf32>
    %451 = arith.mulf %442, %430 : vector<8x32xf32>
    %452 = arith.mulf %436, %444 : vector<8x32xf32>
    %453 = arith.addf %451, %452 : vector<8x32xf32>
    %454 = math.tanh %453 : vector<8x32xf32>
    %455 = arith.mulf %450, %454 : vector<8x32xf32>
    %c0_209 = arith.constant 0 : index
    %c0_210 = arith.constant 0 : index
    %456 = vector.load %arg6[%c0_209, %c0_210] : memref<8x32xf32, #tpu.memory_space<vmem>>, vector<8x32xf32>
    tpu.vector_store %arg6[%c0_209, %c0_210], %455 {strides = array<i32>} : memref<8x32xf32, #tpu.memory_space<vmem>>, vector<8x32xf32>,
    %c0_211 = arith.constant 0 : index
    %c0_212 = arith.constant 0 : index
    %457 = vector.load %arg7[%c0_211, %c0_212] : memref<8x32xf32, #tpu.memory_space<vmem>>, vector<8x32xf32>
    tpu.vector_store %arg7[%c0_211, %c0_212], %453 {strides = array<i32>} : memref<8x32xf32, #tpu.memory_space<vmem>>, vector<8x32xf32>,
    %c8_i32_213 = arith.constant 8 : i32
    %458 = arith.muli %arg0, %c8_i32_213 : i32
    %459 = arith.addi %458, %c5_i32 : i32
    %460 = arith.index_cast %459 : i32 to index
    %c0_214 = arith.constant 0 : index
    %c0_215 = arith.constant 0 : index
    %461 = vector.load %arg5[%460, %c0_214, %c0_215] : memref<8x8x64xf32, #tpu.memory_space<vmem>>, vector<1x8x32xf32>
    %462 = vector.shape_cast %461 : vector<1x8x32xf32> to vector<8x32xf32>
    %463 = vector.shape_cast %455 : vector<8x32xf32> to vector<1x8x32xf32>
    tpu.vector_store %arg5[%460, %c0_214, %c0_215], %463 {strides = array<i32>} : memref<8x8x64xf32, #tpu.memory_space<vmem>>, vector<1x8x32xf32>,
    %c7_i32_216 = arith.constant 7 : i32
    %464 = arith.subi %c7_i32_216, %c5_i32 : i32
    %465 = arith.index_cast %464 : i32 to index
    %c0_217 = arith.constant 0 : index
    %c0_218 = arith.constant 0 : index
    %466 = vector.load %arg2[%465, %c0_217, %c0_218] : memref<8x8x128xf32, #tpu.memory_space<vmem>>, vector<1x8x128xf32>
    %467 = vector.shape_cast %466 : vector<1x8x128xf32> to vector<8x128xf32>
    %c0_219 = arith.constant 0 : index
    %c0_220 = arith.constant 0 : index
    %468 = vector.load %arg8[%c0_219, %c0_220] : memref<8x32xf32, #tpu.memory_space<vmem>>, vector<8x32xf32>
    %c0_221 = arith.constant 0 : index
    %c0_222 = arith.constant 0 : index
    %469 = vector.load %arg4[%c0_221, %c0_222] : memref<32x128xf32, #tpu.memory_space<vmem>>, vector<32x128xf32>
    %cst_223 = arith.constant dense<0.000000e+00> : vector<8x128xf32>
    %470 = tpu.matmul %468, %469, %cst_223 {dimension_numbers = #tpu.dot_dimension_numbers<[1], [0], [0], [1], [0, 0, 1, 1], [], []>} : vector<8x32xf32>, vector<32x128xf32>, vector<8x128xf32> -> vector<8x128xf32>
    %471 = arith.addf %467, %470 : vector<8x128xf32>
    %c0_224 = arith.constant 0 : index
    %c0_225 = arith.constant 0 : index
    %472 = vector.load %arg9[%c0_224, %c0_225] : memref<8x32xf32, #tpu.memory_space<vmem>>, vector<8x32xf32>
    %473 = vector.extract_strided_slice %471 {offsets = [0, 0], sizes = [8, 32], strides = [1, 1]} : vector<8x128xf32> to vector<8x32xf32>
    %474 = arith.negf %473 : vector<8x32xf32>
    %475 = math.exp %474 : vector<8x32xf32>
    %cst_226 = arith.constant 1.000000e+00 : f32
    %476 = vector.broadcast %cst_226 : f32 to vector<8x32xf32>
    %477 = arith.addf %476, %475 : vector<8x32xf32>
    %478 = arith.divf %476, %477 : vector<8x32xf32>
    %479 = vector.extract_strided_slice %471 {offsets = [0, 32], sizes = [8, 32], strides = [1, 1]} : vector<8x128xf32> to vector<8x32xf32>
    %480 = arith.negf %479 : vector<8x32xf32>
    %481 = math.exp %480 : vector<8x32xf32>
    %cst_227 = arith.constant 1.000000e+00 : f32
    %482 = vector.broadcast %cst_227 : f32 to vector<8x32xf32>
    %483 = arith.addf %482, %481 : vector<8x32xf32>
    %484 = arith.divf %482, %483 : vector<8x32xf32>
    %485 = vector.extract_strided_slice %471 {offsets = [0, 64], sizes = [8, 32], strides = [1, 1]} : vector<8x128xf32> to vector<8x32xf32>
    %486 = math.tanh %485 : vector<8x32xf32>
    %487 = vector.extract_strided_slice %471 {offsets = [0, 96], sizes = [8, 32], strides = [1, 1]} : vector<8x128xf32> to vector<8x32xf32>
    %488 = arith.negf %487 : vector<8x32xf32>
    %489 = math.exp %488 : vector<8x32xf32>
    %cst_228 = arith.constant 1.000000e+00 : f32
    %490 = vector.broadcast %cst_228 : f32 to vector<8x32xf32>
    %491 = arith.addf %490, %489 : vector<8x32xf32>
    %492 = arith.divf %490, %491 : vector<8x32xf32>
    %493 = arith.mulf %484, %472 : vector<8x32xf32>
    %494 = arith.mulf %478, %486 : vector<8x32xf32>
    %495 = arith.addf %493, %494 : vector<8x32xf32>
    %496 = math.tanh %495 : vector<8x32xf32>
    %497 = arith.mulf %492, %496 : vector<8x32xf32>
    %c0_229 = arith.constant 0 : index
    %c0_230 = arith.constant 0 : index
    %498 = vector.load %arg8[%c0_229, %c0_230] : memref<8x32xf32, #tpu.memory_space<vmem>>, vector<8x32xf32>
    tpu.vector_store %arg8[%c0_229, %c0_230], %497 {strides = array<i32>} : memref<8x32xf32, #tpu.memory_space<vmem>>, vector<8x32xf32>,
    %c0_231 = arith.constant 0 : index
    %c0_232 = arith.constant 0 : index
    %499 = vector.load %arg9[%c0_231, %c0_232] : memref<8x32xf32, #tpu.memory_space<vmem>>, vector<8x32xf32>
    tpu.vector_store %arg9[%c0_231, %c0_232], %495 {strides = array<i32>} : memref<8x32xf32, #tpu.memory_space<vmem>>, vector<8x32xf32>,
    %c0_i32_233 = arith.constant 0 : i32
    %500 = arith.subi %c0_i32_233, %arg0 : i32
    %c8_i32_234 = arith.constant 8 : i32
    %501 = arith.muli %500, %c8_i32_234 : i32
    %502 = arith.addi %501, %464 : i32
    %503 = arith.index_cast %502 : i32 to index
    %c0_235 = arith.constant 0 : index
    %c32_236 = arith.constant 32 : index
    %504 = vector.load %arg5[%503, %c0_235, %c32_236] : memref<8x8x64xf32, #tpu.memory_space<vmem>>, vector<1x8x32xf32>
    %505 = vector.shape_cast %504 : vector<1x8x32xf32> to vector<8x32xf32>
    %506 = vector.shape_cast %497 : vector<8x32xf32> to vector<1x8x32xf32>
    tpu.vector_store %arg5[%503, %c0_235, %c32_236], %506 {strides = array<i32>} : memref<8x8x64xf32, #tpu.memory_space<vmem>>, vector<1x8x32xf32>,
    %c6_i32 = arith.constant 6 : i32
    %507 = arith.index_cast %c6_i32 : i32 to index
    %c0_237 = arith.constant 0 : index
    %c0_238 = arith.constant 0 : index
    %508 = vector.load %arg1[%507, %c0_237, %c0_238] : memref<8x8x128xf32, #tpu.memory_space<vmem>>, vector<1x8x128xf32>
    %509 = vector.shape_cast %508 : vector<1x8x128xf32> to vector<8x128xf32>
    %c0_239 = arith.constant 0 : index
    %c0_240 = arith.constant 0 : index
    %510 = vector.load %arg6[%c0_239, %c0_240] : memref<8x32xf32, #tpu.memory_space<vmem>>, vector<8x32xf32>
    %c0_241 = arith.constant 0 : index
    %c0_242 = arith.constant 0 : index
    %511 = vector.load %arg3[%c0_241, %c0_242] : memref<32x128xf32, #tpu.memory_space<vmem>>, vector<32x128xf32>
    %cst_243 = arith.constant dense<0.000000e+00> : vector<8x128xf32>
    %512 = tpu.matmul %510, %511, %cst_243 {dimension_numbers = #tpu.dot_dimension_numbers<[1], [0], [0], [1], [0, 0, 1, 1], [], []>} : vector<8x32xf32>, vector<32x128xf32>, vector<8x128xf32> -> vector<8x128xf32>
    %513 = arith.addf %509, %512 : vector<8x128xf32>
    %c0_244 = arith.constant 0 : index
    %c0_245 = arith.constant 0 : index
    %514 = vector.load %arg7[%c0_244, %c0_245] : memref<8x32xf32, #tpu.memory_space<vmem>>, vector<8x32xf32>
    %515 = vector.extract_strided_slice %513 {offsets = [0, 0], sizes = [8, 32], strides = [1, 1]} : vector<8x128xf32> to vector<8x32xf32>
    %516 = arith.negf %515 : vector<8x32xf32>
    %517 = math.exp %516 : vector<8x32xf32>
    %cst_246 = arith.constant 1.000000e+00 : f32
    %518 = vector.broadcast %cst_246 : f32 to vector<8x32xf32>
    %519 = arith.addf %518, %517 : vector<8x32xf32>
    %520 = arith.divf %518, %519 : vector<8x32xf32>
    %521 = vector.extract_strided_slice %513 {offsets = [0, 32], sizes = [8, 32], strides = [1, 1]} : vector<8x128xf32> to vector<8x32xf32>
    %522 = arith.negf %521 : vector<8x32xf32>
    %523 = math.exp %522 : vector<8x32xf32>
    %cst_247 = arith.constant 1.000000e+00 : f32
    %524 = vector.broadcast %cst_247 : f32 to vector<8x32xf32>
    %525 = arith.addf %524, %523 : vector<8x32xf32>
    %526 = arith.divf %524, %525 : vector<8x32xf32>
    %527 = vector.extract_strided_slice %513 {offsets = [0, 64], sizes = [8, 32], strides = [1, 1]} : vector<8x128xf32> to vector<8x32xf32>
    %528 = math.tanh %527 : vector<8x32xf32>
    %529 = vector.extract_strided_slice %513 {offsets = [0, 96], sizes = [8, 32], strides = [1, 1]} : vector<8x128xf32> to vector<8x32xf32>
    %530 = arith.negf %529 : vector<8x32xf32>
    %531 = math.exp %530 : vector<8x32xf32>
    %cst_248 = arith.constant 1.000000e+00 : f32
    %532 = vector.broadcast %cst_248 : f32 to vector<8x32xf32>
    %533 = arith.addf %532, %531 : vector<8x32xf32>
    %534 = arith.divf %532, %533 : vector<8x32xf32>
    %535 = arith.mulf %526, %514 : vector<8x32xf32>
    %536 = arith.mulf %520, %528 : vector<8x32xf32>
    %537 = arith.addf %535, %536 : vector<8x32xf32>
    %538 = math.tanh %537 : vector<8x32xf32>
    %539 = arith.mulf %534, %538 : vector<8x32xf32>
    %c0_249 = arith.constant 0 : index
    %c0_250 = arith.constant 0 : index
    %540 = vector.load %arg6[%c0_249, %c0_250] : memref<8x32xf32, #tpu.memory_space<vmem>>, vector<8x32xf32>
    tpu.vector_store %arg6[%c0_249, %c0_250], %539 {strides = array<i32>} : memref<8x32xf32, #tpu.memory_space<vmem>>, vector<8x32xf32>,
    %c0_251 = arith.constant 0 : index
    %c0_252 = arith.constant 0 : index
    %541 = vector.load %arg7[%c0_251, %c0_252] : memref<8x32xf32, #tpu.memory_space<vmem>>, vector<8x32xf32>
    tpu.vector_store %arg7[%c0_251, %c0_252], %537 {strides = array<i32>} : memref<8x32xf32, #tpu.memory_space<vmem>>, vector<8x32xf32>,
    %c8_i32_253 = arith.constant 8 : i32
    %542 = arith.muli %arg0, %c8_i32_253 : i32
    %543 = arith.addi %542, %c6_i32 : i32
    %544 = arith.index_cast %543 : i32 to index
    %c0_254 = arith.constant 0 : index
    %c0_255 = arith.constant 0 : index
    %545 = vector.load %arg5[%544, %c0_254, %c0_255] : memref<8x8x64xf32, #tpu.memory_space<vmem>>, vector<1x8x32xf32>
    %546 = vector.shape_cast %545 : vector<1x8x32xf32> to vector<8x32xf32>
    %547 = vector.shape_cast %539 : vector<8x32xf32> to vector<1x8x32xf32>
    tpu.vector_store %arg5[%544, %c0_254, %c0_255], %547 {strides = array<i32>} : memref<8x8x64xf32, #tpu.memory_space<vmem>>, vector<1x8x32xf32>,
    %c7_i32_256 = arith.constant 7 : i32
    %548 = arith.subi %c7_i32_256, %c6_i32 : i32
    %549 = arith.index_cast %548 : i32 to index
    %c0_257 = arith.constant 0 : index
    %c0_258 = arith.constant 0 : index
    %550 = vector.load %arg2[%549, %c0_257, %c0_258] : memref<8x8x128xf32, #tpu.memory_space<vmem>>, vector<1x8x128xf32>
    %551 = vector.shape_cast %550 : vector<1x8x128xf32> to vector<8x128xf32>
    %c0_259 = arith.constant 0 : index
    %c0_260 = arith.constant 0 : index
    %552 = vector.load %arg8[%c0_259, %c0_260] : memref<8x32xf32, #tpu.memory_space<vmem>>, vector<8x32xf32>
    %c0_261 = arith.constant 0 : index
    %c0_262 = arith.constant 0 : index
    %553 = vector.load %arg4[%c0_261, %c0_262] : memref<32x128xf32, #tpu.memory_space<vmem>>, vector<32x128xf32>
    %cst_263 = arith.constant dense<0.000000e+00> : vector<8x128xf32>
    %554 = tpu.matmul %552, %553, %cst_263 {dimension_numbers = #tpu.dot_dimension_numbers<[1], [0], [0], [1], [0, 0, 1, 1], [], []>} : vector<8x32xf32>, vector<32x128xf32>, vector<8x128xf32> -> vector<8x128xf32>
    %555 = arith.addf %551, %554 : vector<8x128xf32>
    %c0_264 = arith.constant 0 : index
    %c0_265 = arith.constant 0 : index
    %556 = vector.load %arg9[%c0_264, %c0_265] : memref<8x32xf32, #tpu.memory_space<vmem>>, vector<8x32xf32>
    %557 = vector.extract_strided_slice %555 {offsets = [0, 0], sizes = [8, 32], strides = [1, 1]} : vector<8x128xf32> to vector<8x32xf32>
    %558 = arith.negf %557 : vector<8x32xf32>
    %559 = math.exp %558 : vector<8x32xf32>
    %cst_266 = arith.constant 1.000000e+00 : f32
    %560 = vector.broadcast %cst_266 : f32 to vector<8x32xf32>
    %561 = arith.addf %560, %559 : vector<8x32xf32>
    %562 = arith.divf %560, %561 : vector<8x32xf32>
    %563 = vector.extract_strided_slice %555 {offsets = [0, 32], sizes = [8, 32], strides = [1, 1]} : vector<8x128xf32> to vector<8x32xf32>
    %564 = arith.negf %563 : vector<8x32xf32>
    %565 = math.exp %564 : vector<8x32xf32>
    %cst_267 = arith.constant 1.000000e+00 : f32
    %566 = vector.broadcast %cst_267 : f32 to vector<8x32xf32>
    %567 = arith.addf %566, %565 : vector<8x32xf32>
    %568 = arith.divf %566, %567 : vector<8x32xf32>
    %569 = vector.extract_strided_slice %555 {offsets = [0, 64], sizes = [8, 32], strides = [1, 1]} : vector<8x128xf32> to vector<8x32xf32>
    %570 = math.tanh %569 : vector<8x32xf32>
    %571 = vector.extract_strided_slice %555 {offsets = [0, 96], sizes = [8, 32], strides = [1, 1]} : vector<8x128xf32> to vector<8x32xf32>
    %572 = arith.negf %571 : vector<8x32xf32>
    %573 = math.exp %572 : vector<8x32xf32>
    %cst_268 = arith.constant 1.000000e+00 : f32
    %574 = vector.broadcast %cst_268 : f32 to vector<8x32xf32>
    %575 = arith.addf %574, %573 : vector<8x32xf32>
    %576 = arith.divf %574, %575 : vector<8x32xf32>
    %577 = arith.mulf %568, %556 : vector<8x32xf32>
    %578 = arith.mulf %562, %570 : vector<8x32xf32>
    %579 = arith.addf %577, %578 : vector<8x32xf32>
    %580 = math.tanh %579 : vector<8x32xf32>
    %581 = arith.mulf %576, %580 : vector<8x32xf32>
    %c0_269 = arith.constant 0 : index
    %c0_270 = arith.constant 0 : index
    %582 = vector.load %arg8[%c0_269, %c0_270] : memref<8x32xf32, #tpu.memory_space<vmem>>, vector<8x32xf32>
    tpu.vector_store %arg8[%c0_269, %c0_270], %581 {strides = array<i32>} : memref<8x32xf32, #tpu.memory_space<vmem>>, vector<8x32xf32>,
    %c0_271 = arith.constant 0 : index
    %c0_272 = arith.constant 0 : index
    %583 = vector.load %arg9[%c0_271, %c0_272] : memref<8x32xf32, #tpu.memory_space<vmem>>, vector<8x32xf32>
    tpu.vector_store %arg9[%c0_271, %c0_272], %579 {strides = array<i32>} : memref<8x32xf32, #tpu.memory_space<vmem>>, vector<8x32xf32>,
    %c0_i32_273 = arith.constant 0 : i32
    %584 = arith.subi %c0_i32_273, %arg0 : i32
    %c8_i32_274 = arith.constant 8 : i32
    %585 = arith.muli %584, %c8_i32_274 : i32
    %586 = arith.addi %585, %548 : i32
    %587 = arith.index_cast %586 : i32 to index
    %c0_275 = arith.constant 0 : index
    %c32_276 = arith.constant 32 : index
    %588 = vector.load %arg5[%587, %c0_275, %c32_276] : memref<8x8x64xf32, #tpu.memory_space<vmem>>, vector<1x8x32xf32>
    %589 = vector.shape_cast %588 : vector<1x8x32xf32> to vector<8x32xf32>
    %590 = vector.shape_cast %581 : vector<8x32xf32> to vector<1x8x32xf32>
    tpu.vector_store %arg5[%587, %c0_275, %c32_276], %590 {strides = array<i32>} : memref<8x8x64xf32, #tpu.memory_space<vmem>>, vector<1x8x32xf32>,
    %c7_i32_277 = arith.constant 7 : i32
    %591 = arith.index_cast %c7_i32_277 : i32 to index
    %c0_278 = arith.constant 0 : index
    %c0_279 = arith.constant 0 : index
    %592 = vector.load %arg1[%591, %c0_278, %c0_279] : memref<8x8x128xf32, #tpu.memory_space<vmem>>, vector<1x8x128xf32>
    %593 = vector.shape_cast %592 : vector<1x8x128xf32> to vector<8x128xf32>
    %c0_280 = arith.constant 0 : index
    %c0_281 = arith.constant 0 : index
    %594 = vector.load %arg6[%c0_280, %c0_281] : memref<8x32xf32, #tpu.memory_space<vmem>>, vector<8x32xf32>
    %c0_282 = arith.constant 0 : index
    %c0_283 = arith.constant 0 : index
    %595 = vector.load %arg3[%c0_282, %c0_283] : memref<32x128xf32, #tpu.memory_space<vmem>>, vector<32x128xf32>
    %cst_284 = arith.constant dense<0.000000e+00> : vector<8x128xf32>
    %596 = tpu.matmul %594, %595, %cst_284 {dimension_numbers = #tpu.dot_dimension_numbers<[1], [0], [0], [1], [0, 0, 1, 1], [], []>} : vector<8x32xf32>, vector<32x128xf32>, vector<8x128xf32> -> vector<8x128xf32>
    %597 = arith.addf %593, %596 : vector<8x128xf32>
    %c0_285 = arith.constant 0 : index
    %c0_286 = arith.constant 0 : index
    %598 = vector.load %arg7[%c0_285, %c0_286] : memref<8x32xf32, #tpu.memory_space<vmem>>, vector<8x32xf32>
    %599 = vector.extract_strided_slice %597 {offsets = [0, 0], sizes = [8, 32], strides = [1, 1]} : vector<8x128xf32> to vector<8x32xf32>
    %600 = arith.negf %599 : vector<8x32xf32>
    %601 = math.exp %600 : vector<8x32xf32>
    %cst_287 = arith.constant 1.000000e+00 : f32
    %602 = vector.broadcast %cst_287 : f32 to vector<8x32xf32>
    %603 = arith.addf %602, %601 : vector<8x32xf32>
    %604 = arith.divf %602, %603 : vector<8x32xf32>
    %605 = vector.extract_strided_slice %597 {offsets = [0, 32], sizes = [8, 32], strides = [1, 1]} : vector<8x128xf32> to vector<8x32xf32>
    %606 = arith.negf %605 : vector<8x32xf32>
    %607 = math.exp %606 : vector<8x32xf32>
    %cst_288 = arith.constant 1.000000e+00 : f32
    %608 = vector.broadcast %cst_288 : f32 to vector<8x32xf32>
    %609 = arith.addf %608, %607 : vector<8x32xf32>
    %610 = arith.divf %608, %609 : vector<8x32xf32>
    %611 = vector.extract_strided_slice %597 {offsets = [0, 64], sizes = [8, 32], strides = [1, 1]} : vector<8x128xf32> to vector<8x32xf32>
    %612 = math.tanh %611 : vector<8x32xf32>
    %613 = vector.extract_strided_slice %597 {offsets = [0, 96], sizes = [8, 32], strides = [1, 1]} : vector<8x128xf32> to vector<8x32xf32>
    %614 = arith.negf %613 : vector<8x32xf32>
    %615 = math.exp %614 : vector<8x32xf32>
    %cst_289 = arith.constant 1.000000e+00 : f32
    %616 = vector.broadcast %cst_289 : f32 to vector<8x32xf32>
    %617 = arith.addf %616, %615 : vector<8x32xf32>
    %618 = arith.divf %616, %617 : vector<8x32xf32>
    %619 = arith.mulf %610, %598 : vector<8x32xf32>
    %620 = arith.mulf %604, %612 : vector<8x32xf32>
    %621 = arith.addf %619, %620 : vector<8x32xf32>
    %622 = math.tanh %621 : vector<8x32xf32>
    %623 = arith.mulf %618, %622 : vector<8x32xf32>
    %c0_290 = arith.constant 0 : index
    %c0_291 = arith.constant 0 : index
    %624 = vector.load %arg6[%c0_290, %c0_291] : memref<8x32xf32, #tpu.memory_space<vmem>>, vector<8x32xf32>
    tpu.vector_store %arg6[%c0_290, %c0_291], %623 {strides = array<i32>} : memref<8x32xf32, #tpu.memory_space<vmem>>, vector<8x32xf32>,
    %c0_292 = arith.constant 0 : index
    %c0_293 = arith.constant 0 : index
    %625 = vector.load %arg7[%c0_292, %c0_293] : memref<8x32xf32, #tpu.memory_space<vmem>>, vector<8x32xf32>
    tpu.vector_store %arg7[%c0_292, %c0_293], %621 {strides = array<i32>} : memref<8x32xf32, #tpu.memory_space<vmem>>, vector<8x32xf32>,
    %c8_i32_294 = arith.constant 8 : i32
    %626 = arith.muli %arg0, %c8_i32_294 : i32
    %627 = arith.addi %626, %c7_i32_277 : i32
    %628 = arith.index_cast %627 : i32 to index
    %c0_295 = arith.constant 0 : index
    %c0_296 = arith.constant 0 : index
    %629 = vector.load %arg5[%628, %c0_295, %c0_296] : memref<8x8x64xf32, #tpu.memory_space<vmem>>, vector<1x8x32xf32>
    %630 = vector.shape_cast %629 : vector<1x8x32xf32> to vector<8x32xf32>
    %631 = vector.shape_cast %623 : vector<8x32xf32> to vector<1x8x32xf32>
    tpu.vector_store %arg5[%628, %c0_295, %c0_296], %631 {strides = array<i32>} : memref<8x8x64xf32, #tpu.memory_space<vmem>>, vector<1x8x32xf32>,
    %c7_i32_297 = arith.constant 7 : i32
    %632 = arith.subi %c7_i32_297, %c7_i32_277 : i32
    %633 = arith.index_cast %632 : i32 to index
    %c0_298 = arith.constant 0 : index
    %c0_299 = arith.constant 0 : index
    %634 = vector.load %arg2[%633, %c0_298, %c0_299] : memref<8x8x128xf32, #tpu.memory_space<vmem>>, vector<1x8x128xf32>
    %635 = vector.shape_cast %634 : vector<1x8x128xf32> to vector<8x128xf32>
    %c0_300 = arith.constant 0 : index
    %c0_301 = arith.constant 0 : index
    %636 = vector.load %arg8[%c0_300, %c0_301] : memref<8x32xf32, #tpu.memory_space<vmem>>, vector<8x32xf32>
    %c0_302 = arith.constant 0 : index
    %c0_303 = arith.constant 0 : index
    %637 = vector.load %arg4[%c0_302, %c0_303] : memref<32x128xf32, #tpu.memory_space<vmem>>, vector<32x128xf32>
    %cst_304 = arith.constant dense<0.000000e+00> : vector<8x128xf32>
    %638 = tpu.matmul %636, %637, %cst_304 {dimension_numbers = #tpu.dot_dimension_numbers<[1], [0], [0], [1], [0, 0, 1, 1], [], []>} : vector<8x32xf32>, vector<32x128xf32>, vector<8x128xf32> -> vector<8x128xf32>
    %639 = arith.addf %635, %638 : vector<8x128xf32>
    %c0_305 = arith.constant 0 : index
    %c0_306 = arith.constant 0 : index
    %640 = vector.load %arg9[%c0_305, %c0_306] : memref<8x32xf32, #tpu.memory_space<vmem>>, vector<8x32xf32>
    %641 = vector.extract_strided_slice %639 {offsets = [0, 0], sizes = [8, 32], strides = [1, 1]} : vector<8x128xf32> to vector<8x32xf32>
    %642 = arith.negf %641 : vector<8x32xf32>
    %643 = math.exp %642 : vector<8x32xf32>
    %cst_307 = arith.constant 1.000000e+00 : f32
    %644 = vector.broadcast %cst_307 : f32 to vector<8x32xf32>
    %645 = arith.addf %644, %643 : vector<8x32xf32>
    %646 = arith.divf %644, %645 : vector<8x32xf32>
    %647 = vector.extract_strided_slice %639 {offsets = [0, 32], sizes = [8, 32], strides = [1, 1]} : vector<8x128xf32> to vector<8x32xf32>
    %648 = arith.negf %647 : vector<8x32xf32>
    %649 = math.exp %648 : vector<8x32xf32>
    %cst_308 = arith.constant 1.000000e+00 : f32
    %650 = vector.broadcast %cst_308 : f32 to vector<8x32xf32>
    %651 = arith.addf %650, %649 : vector<8x32xf32>
    %652 = arith.divf %650, %651 : vector<8x32xf32>
    %653 = vector.extract_strided_slice %639 {offsets = [0, 64], sizes = [8, 32], strides = [1, 1]} : vector<8x128xf32> to vector<8x32xf32>
    %654 = math.tanh %653 : vector<8x32xf32>
    %655 = vector.extract_strided_slice %639 {offsets = [0, 96], sizes = [8, 32], strides = [1, 1]} : vector<8x128xf32> to vector<8x32xf32>
    %656 = arith.negf %655 : vector<8x32xf32>
    %657 = math.exp %656 : vector<8x32xf32>
    %cst_309 = arith.constant 1.000000e+00 : f32
    %658 = vector.broadcast %cst_309 : f32 to vector<8x32xf32>
    %659 = arith.addf %658, %657 : vector<8x32xf32>
    %660 = arith.divf %658, %659 : vector<8x32xf32>
    %661 = arith.mulf %652, %640 : vector<8x32xf32>
    %662 = arith.mulf %646, %654 : vector<8x32xf32>
    %663 = arith.addf %661, %662 : vector<8x32xf32>
    %664 = math.tanh %663 : vector<8x32xf32>
    %665 = arith.mulf %660, %664 : vector<8x32xf32>
    %c0_310 = arith.constant 0 : index
    %c0_311 = arith.constant 0 : index
    %666 = vector.load %arg8[%c0_310, %c0_311] : memref<8x32xf32, #tpu.memory_space<vmem>>, vector<8x32xf32>
    tpu.vector_store %arg8[%c0_310, %c0_311], %665 {strides = array<i32>} : memref<8x32xf32, #tpu.memory_space<vmem>>, vector<8x32xf32>,
    %c0_312 = arith.constant 0 : index
    %c0_313 = arith.constant 0 : index
    %667 = vector.load %arg9[%c0_312, %c0_313] : memref<8x32xf32, #tpu.memory_space<vmem>>, vector<8x32xf32>
    tpu.vector_store %arg9[%c0_312, %c0_313], %663 {strides = array<i32>} : memref<8x32xf32, #tpu.memory_space<vmem>>, vector<8x32xf32>,
    %c0_i32_314 = arith.constant 0 : i32
    %668 = arith.subi %c0_i32_314, %arg0 : i32
    %c8_i32_315 = arith.constant 8 : i32
    %669 = arith.muli %668, %c8_i32_315 : i32
    %670 = arith.addi %669, %632 : i32
    %671 = arith.index_cast %670 : i32 to index
    %c0_316 = arith.constant 0 : index
    %c32_317 = arith.constant 32 : index
    %672 = vector.load %arg5[%671, %c0_316, %c32_317] : memref<8x8x64xf32, #tpu.memory_space<vmem>>, vector<1x8x32xf32>
    %673 = vector.shape_cast %672 : vector<1x8x32xf32> to vector<8x32xf32>
    %674 = vector.shape_cast %665 : vector<8x32xf32> to vector<1x8x32xf32>
    tpu.vector_store %arg5[%671, %c0_316, %c32_317], %674 {strides = array<i32>} : memref<8x8x64xf32, #tpu.memory_space<vmem>>, vector<1x8x32xf32>,
    %c8_i32_318 = arith.constant 8 : i32
    return
  }
  func.func @transform_0(%arg0: i32) -> (i32, i32, i32) {
    %c0_i32 = arith.constant 0 : i32
    %c0_i32_0 = arith.constant 0 : i32
    %c0_i32_1 = arith.constant 0 : i32
    return %arg0, %c0_i32, %c0_i32_0 : i32, i32, i32
  }
  func.func @transform_1(%arg0: i32) -> (i32, i32, i32) {
    %c0_i32 = arith.constant 0 : i32
    %0 = arith.subi %c0_i32, %arg0 : i32
    %c0_i32_0 = arith.constant 0 : i32
    %c0_i32_1 = arith.constant 0 : i32
    %c0_i32_2 = arith.constant 0 : i32
    return %0, %c0_i32_0, %c0_i32_1 : i32, i32, i32
  }
  func.func @transform_2(%arg0: i32) -> (i32, i32) {
    %c0_i32 = arith.constant 0 : i32
    %c0_i32_0 = arith.constant 0 : i32
    %c0_i32_1 = arith.constant 0 : i32
    return %c0_i32, %c0_i32_0 : i32, i32
  }
  func.func @transform_3(%arg0: i32) -> (i32, i32) {
    %c0_i32 = arith.constant 0 : i32
    %c0_i32_0 = arith.constant 0 : i32
    %c0_i32_1 = arith.constant 0 : i32
    return %c0_i32, %c0_i32_0 : i32, i32
  }
  func.func @transform_4(%arg0: i32) -> (i32, i32, i32) {
    %c0_i32 = arith.constant 0 : i32
    %c0_i32_0 = arith.constant 0 : i32
    %c0_i32_1 = arith.constant 0 : i32
    %c0_i32_2 = arith.constant 0 : i32
    return %c0_i32, %c0_i32_0, %c0_i32_1 : i32, i32, i32
  }
}

module attributes {stable_mosaic.version = 11 : i64} {
  func.func @_linear_kernel(%arg0: i32, %arg1: i32, %arg2: memref<16x64xf32, #tpu.memory_space<vmem>>, %arg3: memref<64x256xf32, #tpu.memory_space<vmem>>, %arg4: memref<1x256xf32, #tpu.memory_space<vmem>>, %arg5: memref<16x128xf32, #tpu.memory_space<vmem>>, %arg6: memref<16x128xf32, #tpu.memory_space<vmem>>, %arg7: memref<16x256xf32, #tpu.memory_space<vmem>>) attributes {dimension_semantics = [#tpu.dimension_semantics<parallel>, #tpu.dimension_semantics<arbitrary>], iteration_bounds = array<i64: 1, 1>, scalar_prefetch = 0 : i64, scratch_operands = 1 : i64, tpu.core_type = #tpu.core_type<tc>, window_params = [{transform_indices = @transform_0, window_bounds = array<i64: 16, 64>}, {transform_indices = @transform_1, window_bounds = array<i64: 64, 256>}, {pipeline_mode = #tpu.pipeline_mode<synchronous>, transform_indices = @transform_2, window_bounds = array<i64: 1, 256>}, {transform_indices = @transform_3, window_bounds = array<i64: 16, 128>}, {transform_indices = @transform_4, window_bounds = array<i64: 16, 128>}]} {
    %c0_i32 = arith.constant 0 : i32
    %0 = arith.cmpi eq, %arg1, %c0_i32 : i32
    %1 = arith.extui %0 : i1 to i32
    %c0_i32_0 = arith.constant 0 : i32
    %2 = arith.cmpi ne, %1, %c0_i32_0 : i32
    scf.if %2 {
      %cst_10 = arith.constant 0.000000e+00 : f32
      %12 = vector.broadcast %cst_10 : f32 to vector<16x256xf32>
      %c0_11 = arith.constant 0 : index
      %c0_12 = arith.constant 0 : index
      %13 = vector.load %arg7[%c0_11, %c0_12] : memref<16x256xf32, #tpu.memory_space<vmem>>, vector<16x256xf32>
      tpu.vector_store %arg7[%c0_11, %c0_12], %12 {strides = array<i32>} : memref<16x256xf32, #tpu.memory_space<vmem>>, vector<16x256xf32>,
    } else {
    }
    %c0 = arith.constant 0 : index
    %c0_1 = arith.constant 0 : index
    %3 = vector.load %arg7[%c0, %c0_1] : memref<16x256xf32, #tpu.memory_space<vmem>>, vector<16x256xf32>
    %c0_2 = arith.constant 0 : index
    %c0_3 = arith.constant 0 : index
    %4 = vector.load %arg2[%c0_2, %c0_3] : memref<16x64xf32, #tpu.memory_space<vmem>>, vector<16x64xf32>
    %c0_4 = arith.constant 0 : index
    %c0_5 = arith.constant 0 : index
    %5 = vector.load %arg3[%c0_4, %c0_5] : memref<64x256xf32, #tpu.memory_space<vmem>>, vector<64x256xf32>
    %cst = arith.constant dense<0.000000e+00> : vector<16x256xf32>
    %6 = tpu.matmul %4, %5, %cst {dimension_numbers = #tpu.dot_dimension_numbers<[1], [0], [0], [1], [0, 0, 1, 1], [], []>} : vector<16x64xf32>, vector<64x256xf32>, vector<16x256xf32> -> vector<16x256xf32>
    %7 = arith.addf %3, %6 : vector<16x256xf32>
    %c0_6 = arith.constant 0 : index
    %c0_7 = arith.constant 0 : index
    %8 = vector.load %arg7[%c0_6, %c0_7] : memref<16x256xf32, #tpu.memory_space<vmem>>, vector<16x256xf32>
    tpu.vector_store %arg7[%c0_6, %c0_7], %7 {strides = array<i32>} : memref<16x256xf32, #tpu.memory_space<vmem>>, vector<16x256xf32>,
    %c0_i32_8 = arith.constant 0 : i32
    %9 = arith.cmpi eq, %arg1, %c0_i32_8 : i32
    %10 = arith.extui %9 : i1 to i32
    %c0_i32_9 = arith.constant 0 : i32
    %11 = arith.cmpi ne, %10, %c0_i32_9 : i32
    scf.if %11 {
      %c0_10 = arith.constant 0 : index
      %c0_11 = arith.constant 0 : index
      %12 = vector.load %arg7[%c0_10, %c0_11] : memref<16x256xf32, #tpu.memory_space<vmem>>, vector<16x256xf32>
      %c0_12 = arith.constant 0 : index
      %c0_13 = arith.constant 0 : index
      %13 = vector.load %arg4[%c0_12, %c0_13] : memref<1x256xf32, #tpu.memory_space<vmem>>, vector<1x256xf32>
      %14 = vector.broadcast %13 : vector<1x256xf32> to vector<16x256xf32>
      %15 = arith.addf %12, %14 : vector<16x256xf32>
      %16 = vector.extract_strided_slice %15 {offsets = [0, 0], sizes = [16, 128], strides = [1, 1]} : vector<16x256xf32> to vector<16x128xf32>
      %c0_14 = arith.constant 0 : index
      %c0_15 = arith.constant 0 : index
      %17 = vector.load %arg5[%c0_14, %c0_15] : memref<16x128xf32, #tpu.memory_space<vmem>>, vector<16x128xf32>
      tpu.vector_store %arg5[%c0_14, %c0_15], %16 {strides = array<i32>} : memref<16x128xf32, #tpu.memory_space<vmem>>, vector<16x128xf32>,
      %18 = vector.extract_strided_slice %15 {offsets = [0, 128], sizes = [16, 128], strides = [1, 1]} : vector<16x256xf32> to vector<16x128xf32>
      %c0_16 = arith.constant 0 : index
      %c0_17 = arith.constant 0 : index
      %19 = vector.load %arg6[%c0_16, %c0_17] : memref<16x128xf32, #tpu.memory_space<vmem>>, vector<16x128xf32>
      tpu.vector_store %arg6[%c0_16, %c0_17], %18 {strides = array<i32>} : memref<16x128xf32, #tpu.memory_space<vmem>>, vector<16x128xf32>,
    } else {
    }
    return
  }
  func.func @transform_0(%arg0: i32, %arg1: i32) -> (i32, i32) {
    %c0_i32 = arith.constant 0 : i32
    return %arg0, %arg1 : i32, i32
  }
  func.func @transform_1(%arg0: i32, %arg1: i32) -> (i32, i32) {
    %c0_i32 = arith.constant 0 : i32
    %c0_i32_0 = arith.constant 0 : i32
    return %arg1, %c0_i32 : i32, i32
  }
  func.func @transform_2(%arg0: i32, %arg1: i32) -> (i32, i32) {
    %c0_i32 = arith.constant 0 : i32
    %c0_i32_0 = arith.constant 0 : i32
    %c0_i32_1 = arith.constant 0 : i32
    return %c0_i32, %c0_i32_0 : i32, i32
  }
  func.func @transform_3(%arg0: i32, %arg1: i32) -> (i32, i32) {
    %c0_i32 = arith.constant 0 : i32
    %c0_i32_0 = arith.constant 0 : i32
    return %arg0, %c0_i32 : i32, i32
  }
  func.func @transform_4(%arg0: i32, %arg1: i32) -> (i32, i32) {
    %c0_i32 = arith.constant 0 : i32
    %c0_i32_0 = arith.constant 0 : i32
    return %arg0, %c0_i32 : i32, i32
  }
}

module attributes {stable_mosaic.version = 11 : i64} {
  func.func @_linear_kernel(%arg0: i32, %arg1: i32, %arg2: memref<16x64xf32, #tpu.memory_space<vmem>>, %arg3: memref<64x64xf32, #tpu.memory_space<vmem>>, %arg4: memref<1x64xf32, #tpu.memory_space<vmem>>, %arg5: memref<16x64xf32, #tpu.memory_space<vmem>>, %arg6: memref<16x64xf32, #tpu.memory_space<vmem>>) attributes {dimension_semantics = [#tpu.dimension_semantics<parallel>, #tpu.dimension_semantics<arbitrary>], iteration_bounds = array<i64: 1, 1>, scalar_prefetch = 0 : i64, scratch_operands = 1 : i64, tpu.core_type = #tpu.core_type<tc>, window_params = [{transform_indices = @transform_0, window_bounds = array<i64: 16, 64>}, {transform_indices = @transform_1, window_bounds = array<i64: 64, 64>}, {pipeline_mode = #tpu.pipeline_mode<synchronous>, transform_indices = @transform_2, window_bounds = array<i64: 1, 64>}, {transform_indices = @transform_3, window_bounds = array<i64: 16, 64>}]} {
    %c0_i32 = arith.constant 0 : i32
    %0 = arith.cmpi eq, %arg1, %c0_i32 : i32
    %1 = arith.extui %0 : i1 to i32
    %c0_i32_0 = arith.constant 0 : i32
    %2 = arith.cmpi ne, %1, %c0_i32_0 : i32
    scf.if %2 {
      %cst_10 = arith.constant 0.000000e+00 : f32
      %12 = vector.broadcast %cst_10 : f32 to vector<16x64xf32>
      %c0_11 = arith.constant 0 : index
      %c0_12 = arith.constant 0 : index
      %13 = vector.load %arg6[%c0_11, %c0_12] : memref<16x64xf32, #tpu.memory_space<vmem>>, vector<16x64xf32>
      tpu.vector_store %arg6[%c0_11, %c0_12], %12 {strides = array<i32>} : memref<16x64xf32, #tpu.memory_space<vmem>>, vector<16x64xf32>,
    } else {
    }
    %c0 = arith.constant 0 : index
    %c0_1 = arith.constant 0 : index
    %3 = vector.load %arg6[%c0, %c0_1] : memref<16x64xf32, #tpu.memory_space<vmem>>, vector<16x64xf32>
    %c0_2 = arith.constant 0 : index
    %c0_3 = arith.constant 0 : index
    %4 = vector.load %arg2[%c0_2, %c0_3] : memref<16x64xf32, #tpu.memory_space<vmem>>, vector<16x64xf32>
    %c0_4 = arith.constant 0 : index
    %c0_5 = arith.constant 0 : index
    %5 = vector.load %arg3[%c0_4, %c0_5] : memref<64x64xf32, #tpu.memory_space<vmem>>, vector<64x64xf32>
    %cst = arith.constant dense<0.000000e+00> : vector<16x64xf32>
    %6 = tpu.matmul %4, %5, %cst {dimension_numbers = #tpu.dot_dimension_numbers<[1], [0], [0], [1], [0, 0, 1, 1], [], []>} : vector<16x64xf32>, vector<64x64xf32>, vector<16x64xf32> -> vector<16x64xf32>
    %7 = arith.addf %3, %6 : vector<16x64xf32>
    %c0_6 = arith.constant 0 : index
    %c0_7 = arith.constant 0 : index
    %8 = vector.load %arg6[%c0_6, %c0_7] : memref<16x64xf32, #tpu.memory_space<vmem>>, vector<16x64xf32>
    tpu.vector_store %arg6[%c0_6, %c0_7], %7 {strides = array<i32>} : memref<16x64xf32, #tpu.memory_space<vmem>>, vector<16x64xf32>,
    %c0_i32_8 = arith.constant 0 : i32
    %9 = arith.cmpi eq, %arg1, %c0_i32_8 : i32
    %10 = arith.extui %9 : i1 to i32
    %c0_i32_9 = arith.constant 0 : i32
    %11 = arith.cmpi ne, %10, %c0_i32_9 : i32
    scf.if %11 {
      %c0_10 = arith.constant 0 : index
      %c0_11 = arith.constant 0 : index
      %12 = vector.load %arg6[%c0_10, %c0_11] : memref<16x64xf32, #tpu.memory_space<vmem>>, vector<16x64xf32>
      %c0_12 = arith.constant 0 : index
      %c0_13 = arith.constant 0 : index
      %13 = vector.load %arg4[%c0_12, %c0_13] : memref<1x64xf32, #tpu.memory_space<vmem>>, vector<1x64xf32>
      %14 = vector.broadcast %13 : vector<1x64xf32> to vector<16x64xf32>
      %15 = arith.addf %12, %14 : vector<16x64xf32>
      %cst_14 = arith.constant 0.000000e+00 : f32
      %16 = vector.broadcast %cst_14 : f32 to vector<16x64xf32>
      %17 = arith.maximumf %15, %16 : vector<16x64xf32>
      %c0_15 = arith.constant 0 : index
      %c0_16 = arith.constant 0 : index
      %18 = vector.load %arg5[%c0_15, %c0_16] : memref<16x64xf32, #tpu.memory_space<vmem>>, vector<16x64xf32>
      tpu.vector_store %arg5[%c0_15, %c0_16], %17 {strides = array<i32>} : memref<16x64xf32, #tpu.memory_space<vmem>>, vector<16x64xf32>,
    } else {
    }
    return
  }
  func.func @transform_0(%arg0: i32, %arg1: i32) -> (i32, i32) {
    %c0_i32 = arith.constant 0 : i32
    return %arg0, %arg1 : i32, i32
  }
  func.func @transform_1(%arg0: i32, %arg1: i32) -> (i32, i32) {
    %c0_i32 = arith.constant 0 : i32
    %c0_i32_0 = arith.constant 0 : i32
    return %arg1, %c0_i32 : i32, i32
  }
  func.func @transform_2(%arg0: i32, %arg1: i32) -> (i32, i32) {
    %c0_i32 = arith.constant 0 : i32
    %c0_i32_0 = arith.constant 0 : i32
    %c0_i32_1 = arith.constant 0 : i32
    return %c0_i32, %c0_i32_0 : i32, i32
  }
  func.func @transform_3(%arg0: i32, %arg1: i32) -> (i32, i32) {
    %c0_i32 = arith.constant 0 : i32
    %c0_i32_0 = arith.constant 0 : i32
    return %arg0, %c0_i32 : i32, i32
  }
}

module attributes {stable_mosaic.version = 11 : i64} {
  func.func @_linear_kernel(%arg0: i32, %arg1: i32, %arg2: memref<16x64xf32, #tpu.memory_space<vmem>>, %arg3: memref<64x128xf32, #tpu.memory_space<vmem>>, %arg4: memref<1x128xf32, #tpu.memory_space<vmem>>, %arg5: memref<16x128xf32, #tpu.memory_space<vmem>>, %arg6: memref<16x128xf32, #tpu.memory_space<vmem>>) attributes {dimension_semantics = [#tpu.dimension_semantics<parallel>, #tpu.dimension_semantics<arbitrary>], iteration_bounds = array<i64: 1, 1>, scalar_prefetch = 0 : i64, scratch_operands = 1 : i64, tpu.core_type = #tpu.core_type<tc>, window_params = [{transform_indices = @transform_0, window_bounds = array<i64: 16, 64>}, {transform_indices = @transform_1, window_bounds = array<i64: 64, 128>}, {pipeline_mode = #tpu.pipeline_mode<synchronous>, transform_indices = @transform_2, window_bounds = array<i64: 1, 128>}, {transform_indices = @transform_3, window_bounds = array<i64: 16, 128>}]} {
    %c0_i32 = arith.constant 0 : i32
    %0 = arith.cmpi eq, %arg1, %c0_i32 : i32
    %1 = arith.extui %0 : i1 to i32
    %c0_i32_0 = arith.constant 0 : i32
    %2 = arith.cmpi ne, %1, %c0_i32_0 : i32
    scf.if %2 {
      %cst_10 = arith.constant 0.000000e+00 : f32
      %12 = vector.broadcast %cst_10 : f32 to vector<16x128xf32>
      %c0_11 = arith.constant 0 : index
      %c0_12 = arith.constant 0 : index
      %13 = vector.load %arg6[%c0_11, %c0_12] : memref<16x128xf32, #tpu.memory_space<vmem>>, vector<16x128xf32>
      tpu.vector_store %arg6[%c0_11, %c0_12], %12 {strides = array<i32>} : memref<16x128xf32, #tpu.memory_space<vmem>>, vector<16x128xf32>,
    } else {
    }
    %c0 = arith.constant 0 : index
    %c0_1 = arith.constant 0 : index
    %3 = vector.load %arg6[%c0, %c0_1] : memref<16x128xf32, #tpu.memory_space<vmem>>, vector<16x128xf32>
    %c0_2 = arith.constant 0 : index
    %c0_3 = arith.constant 0 : index
    %4 = vector.load %arg2[%c0_2, %c0_3] : memref<16x64xf32, #tpu.memory_space<vmem>>, vector<16x64xf32>
    %c0_4 = arith.constant 0 : index
    %c0_5 = arith.constant 0 : index
    %5 = vector.load %arg3[%c0_4, %c0_5] : memref<64x128xf32, #tpu.memory_space<vmem>>, vector<64x128xf32>
    %cst = arith.constant dense<0.000000e+00> : vector<16x128xf32>
    %6 = tpu.matmul %4, %5, %cst {dimension_numbers = #tpu.dot_dimension_numbers<[1], [0], [0], [1], [0, 0, 1, 1], [], []>} : vector<16x64xf32>, vector<64x128xf32>, vector<16x128xf32> -> vector<16x128xf32>
    %7 = arith.addf %3, %6 : vector<16x128xf32>
    %c0_6 = arith.constant 0 : index
    %c0_7 = arith.constant 0 : index
    %8 = vector.load %arg6[%c0_6, %c0_7] : memref<16x128xf32, #tpu.memory_space<vmem>>, vector<16x128xf32>
    tpu.vector_store %arg6[%c0_6, %c0_7], %7 {strides = array<i32>} : memref<16x128xf32, #tpu.memory_space<vmem>>, vector<16x128xf32>,
    %c0_i32_8 = arith.constant 0 : i32
    %9 = arith.cmpi eq, %arg1, %c0_i32_8 : i32
    %10 = arith.extui %9 : i1 to i32
    %c0_i32_9 = arith.constant 0 : i32
    %11 = arith.cmpi ne, %10, %c0_i32_9 : i32
    scf.if %11 {
      %c0_10 = arith.constant 0 : index
      %c0_11 = arith.constant 0 : index
      %12 = vector.load %arg6[%c0_10, %c0_11] : memref<16x128xf32, #tpu.memory_space<vmem>>, vector<16x128xf32>
      %c0_12 = arith.constant 0 : index
      %c0_13 = arith.constant 0 : index
      %13 = vector.load %arg4[%c0_12, %c0_13] : memref<1x128xf32, #tpu.memory_space<vmem>>, vector<1x128xf32>
      %14 = vector.broadcast %13 : vector<1x128xf32> to vector<16x128xf32>
      %15 = arith.addf %12, %14 : vector<16x128xf32>
      %c0_14 = arith.constant 0 : index
      %c0_15 = arith.constant 0 : index
      %16 = vector.load %arg5[%c0_14, %c0_15] : memref<16x128xf32, #tpu.memory_space<vmem>>, vector<16x128xf32>
      tpu.vector_store %arg5[%c0_14, %c0_15], %15 {strides = array<i32>} : memref<16x128xf32, #tpu.memory_space<vmem>>, vector<16x128xf32>,
    } else {
    }
    return
  }
  func.func @transform_0(%arg0: i32, %arg1: i32) -> (i32, i32) {
    %c0_i32 = arith.constant 0 : i32
    return %arg0, %arg1 : i32, i32
  }
  func.func @transform_1(%arg0: i32, %arg1: i32) -> (i32, i32) {
    %c0_i32 = arith.constant 0 : i32
    %c0_i32_0 = arith.constant 0 : i32
    return %arg1, %c0_i32 : i32, i32
  }
  func.func @transform_2(%arg0: i32, %arg1: i32) -> (i32, i32) {
    %c0_i32 = arith.constant 0 : i32
    %c0_i32_0 = arith.constant 0 : i32
    %c0_i32_1 = arith.constant 0 : i32
    return %c0_i32, %c0_i32_0 : i32, i32
  }
  func.func @transform_3(%arg0: i32, %arg1: i32) -> (i32, i32) {
    %c0_i32 = arith.constant 0 : i32
    %c0_i32_0 = arith.constant 0 : i32
    return %arg0, %c0_i32 : i32, i32
  }
}

</mosaic_0001>

<bundles_post_ra>
// kernel: image_lstm_forward.7
= control target key start
LH: loop header
LB: loop body
LE: loop exit
PB: predicated region body
PF: predicated region fallthrough
CT: control target
= control target key end

     0   :  { %vm18_vm0 = vcmask 261120   ;;  %v223_v0 = vmov 0.0|0.0   ;;  %v224_v4 = vmov 0.0   ;;  %vm51_vm1 = vcmask 523264   ;;  %s368_s1 = inlined_call_operand.vmem [shape: f32[192,32], index: 1, kind: input, shape index: {}]   ;;  %s369_s0 = inlined_call_operand.vmem [shape: f32[16,192], index: 0, kind: input, shape index: {}]   ;;  %s370_s2 = inlined_call_operand.vmem [shape: f32[1,32], index: 2, kind: input, shape index: {}]   ;;  %s371_s3 = inlined_call_operand.vmem [shape: f32[16,32], index: 3, kind: output, shape index: {}]  }
   0x1   :  { %161 = vmatprep.subr.bf16.mxu0 %v223_v0  ;;  %197 = vmatprep.subr.bf16.mxu1 %v223_v0  ;;  %v27_v1 = vld [vmem:[%s368_s1] sm:$0xff]  ;;  %v28_v2 = vld [vmem:[%s368_s1 + $0x8] sm:$0xff]  ;;  %v29_v3 = vld [vmem:[%s368_s1 + $0x10] sm:$0xff]  ;;  %19 = vst.msk [vmem:[#allocation2] sm:$0xff] %vm18_vm0, %v224_v4 }
   0x2   :  { %20 = vst.msk [vmem:[#allocation2 + $0x8] sm:$0xff] %vm18_vm0, %v224_v4  ;;  %v162_v5 = vpack.c.bf16 %v28_v2, %v27_v1  ;;  %v30_v6 = vld [vmem:[%s368_s1 + $0x18] sm:$0xff]  ;;  %v31_v8 = vld [vmem:[%s368_s1 + $0x20] sm:$0xff]  ;;  %v32_v9 = vld [vmem:[%s368_s1 + $0x28] sm:$0xff] }
   0x3   :  { %v165_v7 = vpack.c.bf16 %v30_v6, %v29_v3  ;;  %v168_v10 = vpack.c.bf16 %v32_v9, %v31_v8  ;;  %v33_v11 = vld [vmem:[%s368_s1 + $0x30] sm:$0xff]  ;;  %v34_v12 = vld [vmem:[%s368_s1 + $0x38] sm:$0xff]  ;;  %v24_v13 = vld [vmem:[%s369_s0 + $0x8] sm:$0xff] }
   0x4   :  { %163 = vmatpush1.bf16.msra.mxu0 %v162_v5  ;;  %209 = vmatpush1.bf16.msra.mxu1 %v162_v5  ;;  %v26_v14 = vld [vmem:[%s369_s0 + $0x18] sm:$0xff]  ;;  %v171_v15 = vpack.c.bf16 %v34_v12, %v33_v11  ;;  %v35_v16 = vld [vmem:[%s368_s1 + $0x40] sm:$0xff]  ;;  %v36_v17 = vld [vmem:[%s368_s1 + $0x48] sm:$0xff] }
   0x5   :  { %164 = vmatprep.subr.bf16.mxu0 %v223_v0  ;;  %198 = vmatprep.subr.bf16.mxu1 %v223_v0  ;;  %v174_v18 = vpack.c.bf16 %v36_v17, %v35_v16  ;;  %v37_v19 = vld [vmem:[%s368_s1 + $0x50] sm:$0xff]  ;;  %v38_v20 = vld [vmem:[%s368_s1 + $0x58] sm:$0xff]  ;;  %v39_v22 = vld [vmem:[%s368_s1 + $0x60] sm:$0xff] }
   0x6   :  { %158 = vmatprep.mubr.msk.f32.mxu0 %vm51_vm1, %v24_v13  ;;  %159 = vmatprep.mubr.msk.f32.mxu1 %vm51_vm1, %v26_v14  ;;  %v177_v21 = vpack.c.bf16 %v38_v20, %v37_v19  ;;  %v40_v23 = vld [vmem:[%s368_s1 + $0x68] sm:$0xff]  ;;  %v41_v25 = vld [vmem:[%s368_s1 + $0x70] sm:$0xff]  ;;  %v42_v26 = vld [vmem:[%s368_s1 + $0x78] sm:$0xff] }
   0x7   :  { %v180_v24 = vpack.c.bf16 %v40_v23, %v39_v22  ;;  %v183_v27 = vpack.c.bf16 %v42_v26, %v41_v25  ;;  %v43_v28 = vld [vmem:[%s368_s1 + $0x80] sm:$0xff]  ;;  %v44_v29 = vld [vmem:[%s368_s1 + $0x88] sm:$0xff]  ;;  %v45_v31 = vld [vmem:[%s368_s1 + $0x90] sm:$0xff] }
   0x8   :  { %166 = vmatpush1.bf16.msra.mxu0 %v165_v7  ;;  %210 = vmatpush1.bf16.msra.mxu1 %v165_v7  ;;  %v186_v30 = vpack.c.bf16 %v44_v29, %v43_v28  ;;  %v46_v32 = vld [vmem:[%s368_s1 + $0x98] sm:$0xff]  ;;  %v47_v34 = vld [vmem:[%s368_s1 + $0xa0] sm:$0xff]  ;;  %v48_v35 = vld [vmem:[%s368_s1 + $0xa8] sm:$0xff] }
   0x9   :  { %167 = vmatprep.subr.bf16.mxu0 %v223_v0  ;;  %199 = vmatprep.subr.bf16.mxu1 %v223_v0  ;;  %v189_v33 = vpack.c.bf16 %v46_v32, %v45_v31  ;;  %v192_v36 = vpack.c.bf16 %v48_v35, %v47_v34  ;;  %v49_v37 = vld [vmem:[%s368_s1 + $0xb0] sm:$0xff]  ;;  %v50_v38 = vld [vmem:[%s368_s1 + $0xb8] sm:$0xff]  ;;  %v23_v40 = vld [vmem:[%s369_s0] sm:$0xff] }
   0xa   :  { %v195_v39 = vpack.c.bf16 %v50_v38, %v49_v37  ;;  %v25_v41 = vld [vmem:[%s369_s0 + $0x10] sm:$0xff]  ;;  %v21_v42 = vld [vmem:[#allocation2] sm:$0xff]  ;;  %v22_v43 = vld [vmem:[#allocation2 + $0x8] sm:$0xff] }
   0xb   :  { %v160_v50 = vld [vmem:[%s370_s2] ss:$0 sm:$0xff] }
   0xc   :  { %169 = vmatpush1.bf16.msra.mxu0 %v168_v10  ;;  %211 = vmatpush1.bf16.msra.mxu1 %v168_v10 }
   0xd   :  { %170 = vmatprep.subr.bf16.mxu0 %v223_v0  ;;  %200 = vmatprep.subr.bf16.mxu1 %v223_v0 }
  0x10   :  { %172 = vmatpush1.bf16.msra.mxu0 %v171_v15  ;;  %212 = vmatpush1.bf16.msra.mxu1 %v171_v15 }
  0x11   :  { %173 = vmatprep.subr.bf16.mxu0 %v223_v0  ;;  %201 = vmatprep.subr.bf16.mxu1 %v223_v0 }
  0x14   :  { %175 = vmatpush1.bf16.msra.mxu0 %v174_v18  ;;  %213 = vmatpush1.bf16.msra.mxu1 %v174_v18 }
  0x15   :  { %176 = vmatprep.subr.bf16.mxu0 %v223_v0  ;;  %202 = vmatprep.subr.bf16.mxu1 %v223_v0 }
  0x18   :  { %178 = vmatpush1.bf16.msra.mxu0 %v177_v21  ;;  %214 = vmatpush1.bf16.msra.mxu1 %v177_v21 }
  0x19   :  { %179 = vmatprep.subr.bf16.mxu0 %v223_v0  ;;  %203 = vmatprep.subr.bf16.mxu1 %v223_v0 }
  0x1c   :  { %181 = vmatpush1.bf16.msra.mxu0 %v180_v24  ;;  %215 = vmatpush1.bf16.msra.mxu1 %v180_v24 }
  0x1d   :  { %182 = vmatprep.subr.bf16.mxu0 %v223_v0  ;;  %204 = vmatprep.subr.bf16.mxu1 %v223_v0 }
  0x20   :  { %184 = vmatpush1.bf16.msra.mxu0 %v183_v27  ;;  %216 = vmatpush1.bf16.msra.mxu1 %v183_v27 }
  0x21   :  { %185 = vmatprep.subr.bf16.mxu0 %v223_v0  ;;  %205 = vmatprep.subr.bf16.mxu1 %v223_v0 }
  0x24   :  { %187 = vmatpush1.bf16.msra.mxu0 %v186_v30  ;;  %217 = vmatpush1.bf16.msra.mxu1 %v186_v30 }
  0x25   :  { %188 = vmatprep.subr.bf16.mxu0 %v223_v0  ;;  %206 = vmatprep.subr.bf16.mxu1 %v223_v0 }
  0x28   :  { %190 = vmatpush1.bf16.msra.mxu0 %v189_v33  ;;  %218 = vmatpush1.bf16.msra.mxu1 %v189_v33 }
  0x29   :  { %191 = vmatprep.subr.bf16.mxu0 %v223_v0  ;;  %207 = vmatprep.subr.bf16.mxu1 %v223_v0 }
  0x2c   :  { %193 = vmatpush1.bf16.msra.mxu0 %v192_v36  ;;  %219 = vmatpush1.bf16.msra.mxu1 %v192_v36 }
  0x2d   :  { %194 = vmatprep.subr.bf16.mxu0 %v223_v0  ;;  %208 = vmatprep.subr.bf16.mxu1 %v223_v0 }
  0x30   :  { %196 = vmatpush1.bf16.msra.mxu0 %v195_v39  ;;  %220 = vmatpush1.bf16.msra.mxu1 %v195_v39 }
  0x33   :  { %123 = vmatmul.mubr.f32.vlgmr.msra.gmra.mrb[0].mxu0 %v23_v40  ;;  %128 = vmatmul.mubr.f32.vlgmr.msra.gmra.mrb[0].mxu1 %v25_v41 }
 0x106   :  { %v124_v44 = vpop.f32.mrb[0].mxu0  ;;  %v129_v45 = vpop.f32.mrb[0].mxu1 }
 0x107   :  { %v133_v46 = vadd.f32 %v124_v44, %v21_v42  ;;  %v134_v47 = vadd.f32 %v129_v45, %v22_v43  ;;  %v126_v48 = vpop.f32.mrb[1].mxu0  ;;  %v131_v49 = vpop.f32.mrb[1].mxu1 }
 0x109   :  { %136 = vst.msk [vmem:[#allocation2] sm:$0xff] %vm18_vm0, %v133_v46  ;;  %137 = vst.msk [vmem:[#allocation2 + $0x8] sm:$0xff] %vm18_vm0, %v134_v47 }
 0x110   :  { %v141_v51 = vld [vmem:[#allocation2] sm:$0xff]  ;;  %v142_v52 = vld [vmem:[#allocation2 + $0x8] sm:$0xff] }
 0x111   :  { %v150_v53 = vadd.f32 %v160_v50, %v141_v51  ;;  %v151_v54 = vadd.f32 %v160_v50, %v142_v52 }
 0x113   :  { %152 = vst.msk [vmem:[%s371_s3] sm:$0xff] %vm18_vm0, %v150_v53  ;;  %153 = vst.msk [vmem:[%s371_s3 + $0x8] sm:$0xff] %vm18_vm0, %v151_v54 }

// kernel: image_lstm_forward.8
= control target key start
LH: loop header
LB: loop body
LE: loop exit
PB: predicated region body
PF: predicated region fallthrough
CT: control target
= control target key end

     0   :  { %v180_v3 = vmov 0.0   ;;  %vm38_vm0 = vcmask 261120   ;;  %v139_v15 = vlaneseq  ;;  %s251_s1 = inlined_call_operand.vmem [shape: f32[32,256], index: 1, kind: input, shape index: {}]   ;;  %s252_s0 = inlined_call_operand.vmem [shape: f32[16,32], index: 0, kind: input, shape index: {}]   ;;  %s253_s2 = inlined_call_operand.vmem [shape: f32[1,256], index: 2, kind: input, shape index: {}]   ;;  %s254_s3 = inlined_call_operand.vmem [shape: f32[16,128], index: 3, kind: output, shape index: {0}]   ;;  %s255_s4 = inlined_call_operand.vmem [shape: f32[16,128], index: 4, kind: output, shape index: {1}]  }
   0x1   :  { %v31_v0 = vld [vmem:[%s251_s1 + $0x8] sm:$0xff]  ;;  %v33_v1 = vld [vmem:[%s251_s1 + $0x18] sm:$0xff]  ;;  %v30_v2 = vld [vmem:[%s251_s1] sm:$0xff]  ;;  %109 = vmatprep.mubr.f32.mxu0 %v180_v3  ;;  %115 = vmatprep.mubr.f32.mxu1 %v180_v3 }
   0x2   :  { %v167_v4 = vpack.c.bf16 %v33_v1, %v31_v0  ;;  %v32_v5 = vld [vmem:[%s251_s1 + $0x10] sm:$0xff]  ;;  %v35_v6 = vld [vmem:[%s251_s1 + $0x28] sm:$0xff]  ;;  %v37_v7 = vld [vmem:[%s251_s1 + $0x38] sm:$0xff]  ;;  %v140_v16 = vshrl.u32 %v139_v15, 7 }
   0x3   :  { %v169_v8 = vpack.c.bf16 %v32_v5, %v30_v2  ;;  %v171_v9 = vpack.c.bf16 %v37_v7, %v35_v6  ;;  %v34_v10 = vld [vmem:[%s251_s1 + $0x20] sm:$0xff]  ;;  %v36_v11 = vld [vmem:[%s251_s1 + $0x30] sm:$0xff]  ;;  %v29_v14 = vld [vmem:[%s252_s0 + $0x8] sm:$0xff] }
   0x4   :  { %168 = vmatprep.subr.bf16.mxu0 %v167_v4  ;;  %175 = vmatprep.subr.bf16.mxu1 %v167_v4  ;;  %v173_v12 = vpack.c.bf16 %v36_v11, %v34_v10  ;;  %v28_v13 = vld [vmem:[%s252_s0] sm:$0xff]  ;;  %v141_v17 = vsub.s32 0, %v140_v16  ;;  %v145_v19 = vsub.s32 1, %v140_v16 }
   0x5   :  { %170 = vmatpush1.bf16.msra.mxu0 %v169_v8  ;;  %177 = vmatpush1.bf16.msra.mxu1 %v169_v8  ;;  %v137_v18 = vld [vmem:[%s253_s2] sm:$0x3] }
   0x6   :  { %172 = vmatprep.subr.bf16.mxu0 %v171_v9  ;;  %176 = vmatprep.subr.bf16.mxu1 %v171_v9  ;;  %v142_v20 = vrot.slane %v137_v18, %v141_v17  ;;  %v146_v21 = vrot.slane %v137_v18, %v145_v19 }
   0x9   :  { %174 = vmatpush1.bf16.msra.mxu0 %v173_v12  ;;  %178 = vmatpush1.bf16.msra.mxu1 %v173_v12 }
   0xc   :  { %165 = vmatmul.mubr.msk.f32.vlgmr.msra.gmra.mrb[0].mxu0 %vm38_vm0, %v28_v13  ;;  %166 = vmatmul.mubr.msk.f32.vlgmr.msra.gmra.mrb[0].mxu1 %vm38_vm0, %v29_v14 }
  0xdf   :  { %v111_v22 = vpop.f32.mrb[0].mxu0  ;;  %v117_v23 = vpop.f32.mrb[0].mxu1 }
  0xe0   :  { %v149_v24 = vadd.f32 %v142_v20, %v111_v22  ;;  %v151_v25 = vadd.f32 %v142_v20, %v117_v23  ;;  %v113_v26 = vpop.f32.mrb[1].mxu0  ;;  %v119_v27 = vpop.f32.mrb[1].mxu1 }
  0xe1   :  { %v150_v28 = vadd.f32 %v146_v21, %v113_v26  ;;  %v152_v29 = vadd.f32 %v146_v21, %v119_v27 }
  0xe2   :  { %153 = vst [vmem:[%s254_s3] sm:$0xff] %v149_v24  ;;  %154 = vst [vmem:[%s254_s3 + $0x8] sm:$0xff] %v151_v25 }
  0xe3   :  { %155 = vst [vmem:[%s255_s4] sm:$0xff] %v150_v28  ;;  %156 = vst [vmem:[%s255_s4 + $0x8] sm:$0xff] %v152_v29 }

// kernel: image_lstm_forward.10
= control target key start
LH: loop header
LB: loop body
LE: loop exit
PB: predicated region body
PF: predicated region fallthrough
CT: control target
= control target key end

     0   :  { %v200_v3 = vmov 0.0   ;;  %vm46_vm0 = vcmask 523264   ;;  %v147_v27 = vlaneseq  ;;  %s295_s1 = inlined_call_operand.vmem [shape: f32[64,256], index: 1, kind: input, shape index: {}]   ;;  %s296_s0 = inlined_call_operand.vmem [shape: f32[16,64], index: 0, kind: input, shape index: {}]   ;;  %s297_s2 = inlined_call_operand.vmem [shape: f32[1,256], index: 2, kind: input, shape index: {}]   ;;  %s298_s3 = inlined_call_operand.vmem [shape: f32[16,128], index: 3, kind: output, shape index: {0}]   ;;  %s299_s4 = inlined_call_operand.vmem [shape: f32[16,128], index: 4, kind: output, shape index: {1}]  }
   0x1   :  { %v31_v0 = vld [vmem:[%s295_s1 + $0x8] sm:$0xff]  ;;  %v33_v1 = vld [vmem:[%s295_s1 + $0x18] sm:$0xff]  ;;  %v30_v2 = vld [vmem:[%s295_s1] sm:$0xff]  ;;  %117 = vmatprep.mubr.f32.mxu0 %v200_v3  ;;  %123 = vmatprep.mubr.f32.mxu1 %v200_v3 }
   0x2   :  { %v175_v4 = vpack.c.bf16 %v33_v1, %v31_v0  ;;  %v32_v5 = vld [vmem:[%s295_s1 + $0x10] sm:$0xff]  ;;  %v35_v6 = vld [vmem:[%s295_s1 + $0x28] sm:$0xff]  ;;  %v37_v7 = vld [vmem:[%s295_s1 + $0x38] sm:$0xff]  ;;  %v148_v28 = vshrl.u32 %v147_v27, 7 }
   0x3   :  { %v177_v8 = vpack.c.bf16 %v32_v5, %v30_v2  ;;  %v179_v9 = vpack.c.bf16 %v37_v7, %v35_v6  ;;  %v34_v10 = vld [vmem:[%s295_s1 + $0x20] sm:$0xff]  ;;  %v36_v11 = vld [vmem:[%s295_s1 + $0x30] sm:$0xff]  ;;  %v39_v12 = vld [vmem:[%s295_s1 + $0x48] sm:$0xff] }
   0x4   :  { %176 = vmatprep.subr.bf16.mxu0 %v175_v4  ;;  %191 = vmatprep.subr.bf16.mxu1 %v175_v4  ;;  %v41_v13 = vld [vmem:[%s295_s1 + $0x58] sm:$0xff]  ;;  %v181_v14 = vpack.c.bf16 %v36_v11, %v34_v10  ;;  %v38_v16 = vld [vmem:[%s295_s1 + $0x40] sm:$0xff]  ;;  %v40_v17 = vld [vmem:[%s295_s1 + $0x50] sm:$0xff]  ;;  %v149_v29 = vsub.s32 0, %v148_v28  ;;  %v153_v31 = vsub.s32 1, %v148_v28 }
   0x5   :  { %178 = vmatpush1.bf16.msra.mxu0 %v177_v8  ;;  %195 = vmatpush1.bf16.msra.mxu1 %v177_v8  ;;  %v183_v15 = vpack.c.bf16 %v41_v13, %v39_v12  ;;  %v43_v18 = vld [vmem:[%s295_s1 + $0x68] sm:$0xff]  ;;  %v45_v19 = vld [vmem:[%s295_s1 + $0x78] sm:$0xff]  ;;  %v185_v20 = vpack.c.bf16 %v40_v17, %v38_v16  ;;  %v42_v22 = vld [vmem:[%s295_s1 + $0x60] sm:$0xff] }
   0x6   :  { %180 = vmatprep.subr.bf16.mxu0 %v179_v9  ;;  %192 = vmatprep.subr.bf16.mxu1 %v179_v9  ;;  %v187_v21 = vpack.c.bf16 %v45_v19, %v43_v18  ;;  %v44_v23 = vld [vmem:[%s295_s1 + $0x70] sm:$0xff]  ;;  %v28_v25 = vld [vmem:[%s296_s0] sm:$0xff]  ;;  %v29_v26 = vld [vmem:[%s296_s0 + $0x8] sm:$0xff] }
   0x7   :  { %v189_v24 = vpack.c.bf16 %v44_v23, %v42_v22  ;;  %v145_v30 = vld [vmem:[%s297_s2] sm:$0x3] }
   0x8   :  { %v150_v32 = vrot.slane %v145_v30, %v149_v29  ;;  %v154_v33 = vrot.slane %v145_v30, %v153_v31 }
   0x9   :  { %182 = vmatpush1.bf16.msra.mxu0 %v181_v14  ;;  %196 = vmatpush1.bf16.msra.mxu1 %v181_v14 }
   0xa   :  { %184 = vmatprep.subr.bf16.mxu0 %v183_v15  ;;  %193 = vmatprep.subr.bf16.mxu1 %v183_v15 }
   0xd   :  { %186 = vmatpush1.bf16.msra.mxu0 %v185_v20  ;;  %197 = vmatpush1.bf16.msra.mxu1 %v185_v20 }
   0xe   :  { %188 = vmatprep.subr.bf16.mxu0 %v187_v21  ;;  %194 = vmatprep.subr.bf16.mxu1 %v187_v21 }
  0x11   :  { %190 = vmatpush1.bf16.msra.mxu0 %v189_v24  ;;  %198 = vmatpush1.bf16.msra.mxu1 %v189_v24 }
  0x14   :  { %173 = vmatmul.mubr.msk.f32.vlgmr.msra.gmra.mrb[0].mxu0 %vm46_vm0, %v28_v25  ;;  %174 = vmatmul.mubr.msk.f32.vlgmr.msra.gmra.mrb[0].mxu1 %vm46_vm0, %v29_v26 }
  0xe7   :  { %v119_v34 = vpop.f32.mrb[0].mxu0  ;;  %v125_v35 = vpop.f32.mrb[0].mxu1 }
  0xe8   :  { %v157_v36 = vadd.f32 %v150_v32, %v119_v34  ;;  %v159_v37 = vadd.f32 %v150_v32, %v125_v35  ;;  %v121_v38 = vpop.f32.mrb[1].mxu0  ;;  %v127_v39 = vpop.f32.mrb[1].mxu1 }
  0xe9   :  { %v158_v40 = vadd.f32 %v154_v33, %v121_v38  ;;  %v160_v41 = vadd.f32 %v154_v33, %v127_v39 }
  0xea   :  { %161 = vst [vmem:[%s298_s3] sm:$0xff] %v157_v36  ;;  %162 = vst [vmem:[%s298_s3 + $0x8] sm:$0xff] %v159_v37 }
  0xeb   :  { %163 = vst [vmem:[%s299_s4] sm:$0xff] %v158_v40  ;;  %164 = vst [vmem:[%s299_s4 + $0x8] sm:$0xff] %v160_v41 }

// kernel: image_lstm_forward.12
= control target key start
LH: loop header
LB: loop body
LE: loop exit
PB: predicated region body
PF: predicated region fallthrough
CT: control target
= control target key end

     0   :  { %vm18_vm0 = vcmask 523264   ;;  %v190_v3 = vmov 0.0   ;;  %s258_s1 = inlined_call_operand.vmem [shape: f32[64,64], index: 1, kind: input, shape index: {}]   ;;  %s259_s0 = inlined_call_operand.vmem [shape: f32[16,64], index: 0, kind: input, shape index: {}]   ;;  %s260_s2 = inlined_call_operand.vmem [shape: f32[1,64], index: 2, kind: input, shape index: {}]   ;;  %s261_s3 = inlined_call_operand.vmem [shape: f32[16,64], index: 3, kind: output, shape index: {}]  }
   0x1   :  { %v25_v0 = vld [vmem:[%s258_s1] sm:$0xff]  ;;  %v26_v1 = vld [vmem:[%s258_s1 + $0x8] sm:$0xff]  ;;  %v27_v2 = vld [vmem:[%s258_s1 + $0x10] sm:$0xff]  ;;  %20 = vst.msk [vmem:[#allocation2 + $0x8] sm:$0xff] %vm18_vm0, %v190_v3 }
   0x2   :  { %19 = vst.msk [vmem:[#allocation2] sm:$0xff] %vm18_vm0, %v190_v3  ;;  %v173_v4 = vpack.c.bf16 %v26_v1, %v25_v0  ;;  %v28_v5 = vld [vmem:[%s258_s1 + $0x18] sm:$0xff]  ;;  %v29_v7 = vld [vmem:[%s258_s1 + $0x20] sm:$0xff]  ;;  %v30_v8 = vld [vmem:[%s258_s1 + $0x28] sm:$0xff] }
   0x3   :  { %v177_v6 = vpack.c.bf16 %v28_v5, %v27_v2  ;;  %v23_v9 = vld [vmem:[%s259_s0] sm:$0xff]  ;;  %v181_v10 = vpack.c.bf16 %v30_v8, %v29_v7  ;;  %v31_v11 = vld [vmem:[%s258_s1 + $0x30] sm:$0xff]  ;;  %v32_v12 = vld [vmem:[%s258_s1 + $0x38] sm:$0xff] }
   0x4   :  { %174 = vmatprep.subr.bf16.mxu0 %v173_v4  ;;  %170 = vmatprep.mubr.msk.f32.mxu0 %vm18_vm0, %v23_v9  ;;  %v185_v13 = vpack.c.bf16 %v32_v12, %v31_v11  ;;  %v24_v14 = vld [vmem:[%s259_s0 + $0x8] sm:$0xff]  ;;  %v143_v21 = vld [vmem:[%s260_s2] ss:$0 sm:$0xff] }
   0x5   :  { %176 = vmatpush3.bf16.msra.mxu0 %v173_v4 }
   0x6   :  { %178 = vmatprep.subr.bf16.mxu0 %v177_v6 }
   0x8   :  { %v22_v15 = vld [vmem:[#allocation2 + $0x8] sm:$0xff] }
   0x9   :  { %180 = vmatpush3.bf16.msra.mxu0 %v177_v6  ;;  %v21_v16 = vld [vmem:[#allocation2] sm:$0xff] }
   0xa   :  { %182 = vmatprep.subr.bf16.mxu0 %v181_v10 }
   0xd   :  { %184 = vmatpush3.bf16.msra.mxu0 %v181_v10 }
   0xe   :  { %186 = vmatprep.subr.bf16.mxu0 %v185_v13 }
  0x11   :  { %188 = vmatpush3.bf16.msra.mxu0 %v185_v13 }
  0x14   :  { %171 = vmatmul.mubr.msk.f32.vlgmr.msra.gmra.mrb[0].mxu0 %vm18_vm0, %v24_v14 }
  0xe7   :  { %v172_v17 = vpop.f32.mrb[0].mxu0 }
  0xe8   :  { %v116_v18 = vadd.f32 %v172_v17, %v22_v15  ;;  %v106_v19 = vpop.f32.mrb[1].mxu0 }
  0xe9   :  { %v115_v20 = vadd.f32 %v106_v19, %v21_v16 }
  0xea   :  { %118 = vst.msk [vmem:[#allocation2 + $0x8] sm:$0xff] %vm18_vm0, %v116_v18 }
  0xeb   :  { %117 = vst.msk [vmem:[#allocation2] sm:$0xff] %vm18_vm0, %v115_v20 }
  0xf1   :  { %v123_v22 = vld [vmem:[#allocation2 + $0x8] sm:$0xff] }
  0xf2   :  { %v132_v23 = vadd.f32 %v143_v21, %v123_v22  ;;  %v122_v24 = vld [vmem:[#allocation2] sm:$0xff] }
  0xf3   :  { %v131_v25 = vadd.f32 %v143_v21, %v122_v24 }
  0xf4   :  { %v134_v26 = vmax.f32 %v132_v23, 0.0 }
  0xf5   :  { %v133_v27 = vmax.f32 %v131_v25, 0.0 }
  0xf6   :  { %136 = vst.msk [vmem:[%s261_s3 + $0x8] sm:$0xff] %vm18_vm0, %v134_v26 }
  0xf7   :  { %135 = vst.msk [vmem:[%s261_s3] sm:$0xff] %vm18_vm0, %v133_v27 }

// kernel: image_lstm_forward.13
= control target key start
LH: loop header
LB: loop body
LE: loop exit
PB: predicated region body
PF: predicated region fallthrough
CT: control target
= control target key end

     0   :  { %vm32_vm0 = vcmask 523264   ;;  %s247_s1 = inlined_call_operand.vmem [shape: f32[64,128], index: 1, kind: input, shape index: {}]   ;;  %s248_s0 = inlined_call_operand.vmem [shape: f32[16,64], index: 0, kind: input, shape index: {}]   ;;  %s249_s2 = inlined_call_operand.vmem [shape: f32[1,128], index: 2, kind: input, shape index: {}]   ;;  %s250_s3 = inlined_call_operand.vmem [shape: f32[16,128], index: 3, kind: output, shape index: {}]  }
   0x1   :  { %v24_v0 = vld [vmem:[%s247_s1] sm:$0xff]  ;;  %v25_v1 = vld [vmem:[%s247_s1 + $0x8] sm:$0xff]  ;;  %v26_v2 = vld [vmem:[%s247_s1 + $0x10] sm:$0xff] }
   0x2   :  { %v170_v3 = vpack.c.bf16 %v25_v1, %v24_v0  ;;  %v27_v4 = vld [vmem:[%s247_s1 + $0x18] sm:$0xff]  ;;  %v28_v6 = vld [vmem:[%s247_s1 + $0x20] sm:$0xff]  ;;  %v29_v7 = vld [vmem:[%s247_s1 + $0x28] sm:$0xff] }
   0x3   :  { %v174_v5 = vpack.c.bf16 %v27_v4, %v26_v2  ;;  %v22_v8 = vld [vmem:[%s248_s0] sm:$0xff]  ;;  %v178_v9 = vpack.c.bf16 %v29_v7, %v28_v6  ;;  %v30_v10 = vld [vmem:[%s247_s1 + $0x30] sm:$0xff]  ;;  %v31_v11 = vld [vmem:[%s247_s1 + $0x38] sm:$0xff] }
   0x4   :  { %171 = vmatprep.subr.bf16.mxu0 %v170_v3  ;;  %167 = vmatprep.mubr.msk.f32.mxu0 %vm32_vm0, %v22_v8  ;;  %v182_v12 = vpack.c.bf16 %v31_v11, %v30_v10  ;;  %v23_v13 = vld [vmem:[%s248_s0 + $0x8] sm:$0xff]  ;;  %v140_v14 = vld [vmem:[%s249_s2] ss:$0 sm:$0xff] }
   0x5   :  { %173 = vmatpush3.bf16.msra.mxu0 %v170_v3 }
   0x6   :  { %175 = vmatprep.subr.bf16.mxu0 %v174_v5 }
   0x9   :  { %177 = vmatpush3.bf16.msra.mxu0 %v174_v5 }
   0xa   :  { %179 = vmatprep.subr.bf16.mxu0 %v178_v9 }
   0xd   :  { %181 = vmatpush3.bf16.msra.mxu0 %v178_v9 }
   0xe   :  { %183 = vmatprep.subr.bf16.mxu0 %v182_v12 }
  0x11   :  { %185 = vmatpush3.bf16.msra.mxu0 %v182_v12 }
  0x14   :  { %168 = vmatmul.mubr.msk.f32.vlgmr.msra.gmra.mrb[0].mxu0 %vm32_vm0, %v23_v13 }
  0xe7   :  { %v169_v15 = vpop.f32.mrb[0].mxu0 }
  0xe8   :  { %v131_v16 = vadd.f32 %v169_v15, %v140_v14  ;;  %v105_v17 = vpop.f32.mrb[1].mxu0 }
  0xe9   :  { %v130_v18 = vadd.f32 %v140_v14, %v105_v17 }
  0xea   :  { %133 = vst [vmem:[%s250_s3 + $0x8] sm:$0xff] %v131_v16 }
  0xeb   :  { %132 = vst [vmem:[%s250_s3] sm:$0xff] %v130_v18 }

// kernel: image_lstm_forward.9
= control target key start
LH: loop header
LB: loop body
LE: loop exit
PB: predicated region body
PF: predicated region fallthrough
CT: control target
= control target key end

     0   :  { %vm43_vm0 = vcmask 261120   ;;  %v2650_v0 = vmov 0.0|0.0   ;;  %v2651_v4 = vmov 0.0   ;;  %vm2652_vm1 = vmmov 0   ;;  %s2653_s5 = smov 32   ;;  %s2654_s10 = smov 64   ;;  %s3137_s2 = inlined_call_operand.vmem [shape: f32[32,128], index: 2, kind: input, shape index: {}]   ;;  %s3138_s3 = inlined_call_operand.vmem [shape: f32[32,128], index: 3, kind: input, shape index: {}]   ;;  %s3139_s0 = inlined_call_operand.vmem [shape: f32[8,8,128], index: 0, kind: input, shape index: {}]   ;;  %s3140_s1 = inlined_call_operand.vmem [shape: f32[8,8,128], index: 1, kind: input, shape index: {}]   ;;  %s3141_s4 = inlined_call_operand.vmem [shape: f32[8,8,64], index: 4, kind: output, shape index: {}]  }
   0x1   :  { %2420 = vmatprep.subr.bf16.mxu0 %v2650_v0  ;;  %v50_v1 = vld [vmem:[%s3137_s2] sm:$0xff]  ;;  %v51_v2 = vld [vmem:[%s3137_s2 + $0x8] sm:$0xff]  ;;  %2426 = vmatprep.subr.bf16.mxu1 %v2650_v0  ;;  %44 = vst.msk [vmem:[#allocation2] sm:$0xff] %vm43_vm0, %v2651_v4  ;;  %45 = vst.msk [vmem:[#allocation3] sm:$0xff] %vm43_vm0, %v2651_v4  ;;  %s2655_s11 = smov 96   ;;  %vm300_vm2 = vcmask 523520  }
   0x2   :  { %v175_v3 = vld [vmem:[%s3138_s3] sm:$0xff]  ;;  %46 = vst.msk [vmem:[#allocation4] sm:$0xff] %vm43_vm0, %v2651_v4  ;;  %47 = vst.msk [vmem:[#allocation5] sm:$0xff] %vm43_vm0, %v2651_v4  ;;  %v2700_v5 = vpack.c.bf16 %v51_v2, %v50_v1  ;;  %v176_v6 = vld [vmem:[%s3138_s3 + $0x8] sm:$0xff]  ;;  %2252 = vmatprep.mubr.msk.f32.mxu0 %vm2652_vm1, %v2651_v4  ;;  %2263 = vmatprep.mubr.msk.f32.mxu1 %vm2652_vm1, %v2651_v4 }
   0x3   :  { %v52_v7 = vld [vmem:[%s3137_s2 + $0x10] sm:$0xff]  ;;  %v53_v8 = vld [vmem:[%s3137_s2 + $0x18] sm:$0xff]  ;;  %v2715_v9 = vpack.c.bf16 %v176_v6, %v175_v3  ;;  %v48_v18 = vld [vmem:[%s3139_s0] sm:$0xff] }
   0x4   :  { %v177_v10 = vld [vmem:[%s3138_s3 + $0x10] sm:$0xff]  ;;  %v178_v11 = vld [vmem:[%s3138_s3 + $0x18] sm:$0xff]  ;;  %2422 = vmatpush3.bf16.msra.mxu0 %v2700_v5  ;;  %v2724_v12 = vpack.c.bf16 %v53_v8, %v52_v7  ;;  %v2110_v60 = vld [vmem:[%s3139_s0 + $0x8] sm:$0xff] }
   0x5   :  { %2423 = vmatprep.subr.bf16.mxu0 %v2650_v0  ;;  %2428 = vmatpush3.bf16.msra.mxu1 %v2715_v9  ;;  %v2728_v13 = vpack.c.bf16 %v178_v11, %v177_v10  ;;  %v2106_v19 = vld [vmem:[%s3140_s1 + $0x38] sm:$0xff]  ;;  %v2114_v1 = vld [vmem:[%s3140_s1 + $0x30] sm:$0xff] }
   0x6   :  { %2429 = vmatprep.subr.bf16.mxu1 %v2650_v0 }
   0x8   :  { %2425 = vmatpush3.bf16.msra.mxu0 %v2724_v12  ;;  %v49_v14 = vld [vmem:[#allocation2] sm:$0xff]  ;;  %v129_v15 = vld [vmem:[#allocation3] sm:$0xff] }
   0x9   :  { %2431 = vmatpush3.bf16.msra.mxu1 %v2728_v13  ;;  %v174_v16 = vld [vmem:[#allocation4] sm:$0xff]  ;;  %138 = vrot.lane.b32.xlu1 %v129_v15, %s2653_s5  ;;  %v253_v17 = vld [vmem:[#allocation5] sm:$0xff] }
   0xa   :  { %2432 = vmatprep.subr.bf16.mxu0 %v2650_v0  ;;  %2438 = vmatprep.subr.bf16.mxu1 %v2650_v0 }
   0xb   :  { %2253 = vmatmul.mubr.msk.f32.vlgmr.msra.gmra.mrb[0].mxu0 %vm43_vm0, %v49_v14 }
   0xc   :  { %2264 = vmatmul.mubr.msk.f32.vlgmr.msra.gmra.mrb[0].mxu1 %vm43_vm0, %v174_v16  ;;  %2434 = vmatpush3.bf16.msra.mxu0 %v2700_v5 }
   0xd   :  { %262 = vrot.lane.b32.xlu1 %v253_v17, %s2653_s5  ;;  %2435 = vmatprep.subr.bf16.mxu0 %v2650_v0 }
   0xe   :  { %2440 = vmatpush3.bf16.msra.mxu1 %v2715_v9  ;;  %2274 = vmatprep.mubr.msk.f32.mxu0 %vm2652_vm1, %v2651_v4 }
   0xf   :  { %2441 = vmatprep.subr.bf16.mxu1 %v2650_v0  ;;  %2285 = vmatprep.mubr.msk.f32.mxu1 %vm2652_vm1, %v2651_v4 }
  0x10   :  { %2437 = vmatpush3.bf16.msra.mxu0 %v2724_v12 }
  0x11   :  { %2444 = vmatprep.subr.bf16.mxu0 %v2650_v0 }
  0x12   :  { %2443 = vmatpush3.bf16.msra.mxu1 %v2728_v13 }
  0x13   :  { %2450 = vmatprep.subr.bf16.mxu1 %v2650_v0 }
  0x7b   :  { %v139_v40 = vpop.permute.xlu1 %138 }
  0x7f   :  { %v263_v42 = vpop.permute.xlu1 %262 }
  0xde   :  { %v124_v20 = vpop.f32.mrb[0].mxu0 }
  0xdf   :  { %v128_v21 = vadd.f32 %v124_v20, %v48_v18  ;;  %v2254_v22 = vpop.f32.mrb[1].mxu0  ;;  %v248_v23 = vpop.f32.mrb[0].mxu1 }
  0xe0   :  { %v252_v24 = vadd.f32 %v2106_v19, %v248_v23  ;;  %v2265_v25 = vpop.f32.mrb[1].mxu1 }
  0xe1   :  { %2522 = vtanh.f32 %v128_v21  ;;  %v2105_v28 = vmul.f32 -1.442695, %v128_v21 }
  0xe2   :  { %2524 = vtanh.f32 %v252_v24  ;;  %v2108_v29 = vmul.f32 -1.442695, %v252_v24 }
  0xe3   :  { %2526 = vpow2.f32 %v2105_v28 }
  0xe4   :  { %2528 = vpow2.f32 %v2108_v29 }
  0xeb   :  { %v2523_v26 = vpop.eup %2522 }
  0xec   :  { %143 = vrot.lane.b32.xlu0 %v2523_v26, %s2654_s10  ;;  %v2525_v27 = vpop.eup %2524 }
  0xed   :  { %v2527_v30 = vpop.eup %2526 }
  0xee   :  { %v133_v31 = vadd.f32 1.0, %v2527_v30  ;;  %v2529_v32 = vpop.eup %2528 }
  0xef   :  { %v257_v33 = vadd.f32 1.0, %v2529_v32 }
  0xf0   :  { %267 = vrot.lane.b32.xlu0 %v2525_v27, %s2654_s10  ;;  %2530 = vrcp.f32 %v133_v31 }
  0xf1   :  { %2532 = vrcp.f32 %v257_v33 }
  0xfa   :  { %v2531_v34 = vpop.eup %2530 }
  0xfb   :  { %v2533_v37 = vpop.eup %2532  ;;  %v141_v41 = vmul.f32 %v2531_v34, %v139_v40 }
  0xfc   :  { %v265_v45 = vmul.f32 %v2533_v37, %v263_v42 }
 0x15e   :  { %v144_v35 = vpop.permute.xlu0 %143 }
 0x15f   :  { %v146_v36 = vmul.f32 %v2531_v34, %v144_v35 }
 0x161   :  { %148 = vrot.lane.b32.xlu0 %v146_v36, %s2653_s5 }
 0x162   :  { %v268_v38 = vpop.permute.xlu0 %267 }
 0x163   :  { %v270_v39 = vmul.f32 %v2533_v37, %v268_v38 }
 0x165   :  { %272 = vrot.lane.b32.xlu1 %v270_v39, %s2653_s5 }
 0x1d3   :  { %v149_v43 = vpop.permute.xlu0 %148 }
 0x1d4   :  { %v151_v44 = vadd.f32 %v149_v43, %v141_v41 }
 0x1d6   :  { %2534 = vtanh.f32 %v151_v44 }
 0x1d7   :  { %v273_v46 = vpop.permute.xlu1 %272 }
 0x1d8   :  { %v275_v47 = vadd.f32 %v273_v46, %v265_v45  ;;  %v2118_v46 = vld [vmem:[%s3139_s0 + $0x10] sm:$0xff] }
 0x1da   :  { %2536 = vtanh.f32 %v275_v47 }
 0x1e0   :  { %v2535_v48 = vpop.eup %2534 }
 0x1e1   :  { %154 = vrot.lane.b32.xlu0 %v2535_v48, %s2654_s10 }
 0x1e4   :  { %v2537_v49 = vpop.eup %2536 }
 0x1e5   :  { %278 = vrot.lane.b32.xlu1 %v2537_v49, %s2654_s10 }
 0x253   :  { %v155_v50 = vpop.permute.xlu0 %154 }
 0x254   :  { %v157_v51 = vmul.f32 %v2531_v34, %v155_v50  ;;  %v2122_v50 = vld [vmem:[%s3140_s1 + $0x28] sm:$0xff] }
 0x256   :  { %159 = vrot.lane.b32.xlu0 %v157_v51, %s2653_s5 }
 0x257   :  { %v279_v52 = vpop.permute.xlu1 %278 }
 0x258   :  { %v2764_v53 = vmul.f32 %v2533_v37, %v279_v52 }
 0x25a   :  { %283 = vrot.lane.b32.xlu1 %v2764_v53, %s2653_s5  ;;  %164 = vrot.lane.b32.xlu0 %v151_v44, %s2655_s11 }
 0x25e   :  { %288 = vrot.lane.b32.xlu1 %v275_v47, %s2655_s11 }
 0x2c8   :  { %v160_v54 = vpop.permute.xlu0 %159 }
 0x2c9   :  { %162 = vst.msk [vmem:[#allocation2] sm:$0xff] %vm43_vm0, %v160_v54  ;;  %171 = vst.msk [vmem:[%s3141_s4] sm:$0xff] %vm43_vm0, %v160_v54 }
 0x2cc   :  { %v284_v55 = vpop.permute.xlu1 %283  ;;  %v165_v56 = vpop.permute.xlu0 %164 }
 0x2cd   :  { %286 = vst.msk [vmem:[#allocation4] sm:$0xff] %vm43_vm0, %v284_v55  ;;  %167 = vst.msk [vmem:[#allocation3] sm:$0xff] %vm43_vm0, %v165_v56 }
 0x2d0   :  { %v289_v57 = vpop.permute.xlu1 %288  ;;  %v304_v58 = vld [vmem:[#allocation2] sm:$0xff] }
 0x2d1   :  { %291 = vst.msk [vmem:[#allocation5] sm:$0xff] %vm43_vm0, %v289_v57  ;;  %2275 = vmatmul.mubr.msk.f32.vlgmr.msra.gmra.mrb[2].mxu0 %vm43_vm0, %v304_v58 }
 0x2d2   :  { %2446 = vmatpush3.bf16.msra.mxu0 %v2700_v5  ;;  %2296 = vmatprep.mubr.msk.f32.mxu0 %vm2652_vm1, %v2651_v4 }
 0x2d3   :  { %2447 = vmatprep.subr.bf16.mxu0 %v2650_v0 }
 0x2d4   :  { %v428_v59 = vld [vmem:[#allocation4] sm:$0xff]  ;;  %v383_v10 = vld [vmem:[#allocation3] sm:$0xff] }
 0x2d5   :  { %2286 = vmatmul.mubr.msk.f32.vlgmr.msra.gmra.mrb[2].mxu1 %vm43_vm0, %v428_v59 }
 0x2d6   :  { %2449 = vmatpush3.bf16.msra.mxu0 %v2724_v12  ;;  %2452 = vmatpush3.bf16.msra.mxu1 %v2715_v9 }
 0x2d7   :  { %2453 = vmatprep.subr.bf16.mxu1 %v2650_v0  ;;  %2307 = vmatprep.mubr.msk.f32.mxu1 %vm2652_vm1, %v2651_v4 }
 0x2d8   :  { %2456 = vmatprep.subr.bf16.mxu0 %v2650_v0  ;;  %v507_v11 = vld [vmem:[#allocation5] sm:$0xff] }
 0x2da   :  { %2455 = vmatpush3.bf16.msra.mxu1 %v2728_v13 }
 0x2db   :  { %2462 = vmatprep.subr.bf16.mxu1 %v2650_v0 }
 0x3a4   :  { %v378_v61 = vpop.f32.mrb[2].mxu0 }
 0x3a5   :  { %v382_v62 = vadd.f32 %v2110_v60, %v378_v61  ;;  %v2276_v63 = vpop.f32.mrb[3].mxu0 }
 0x3a7   :  { %2538 = vtanh.f32 %v382_v62  ;;  %v2112_v14 = vmul.f32 -1.442695, %v382_v62 }
 0x3a8   :  { %v502_v2 = vpop.f32.mrb[2].mxu1 }
 0x3a9   :  { %v506_v3 = vadd.f32 %v2114_v1, %v502_v2  ;;  %v2287_v6 = vpop.f32.mrb[3].mxu1 }
 0x3ab   :  { %2540 = vtanh.f32 %v506_v3  ;;  %v2116_v15 = vmul.f32 -1.442695, %v506_v3 }
 0x3ac   :  { %2542 = vpow2.f32 %v2112_v14 }
 0x3ad   :  { %2544 = vpow2.f32 %v2116_v15 }
 0x3b1   :  { %v2539_v7 = vpop.eup %2538 }
 0x3b2   :  { %397 = vrot.lane.b32.xlu0 %v2539_v7, %s2654_s10 }
 0x3b5   :  { %v2541_v8 = vpop.eup %2540 }
 0x3b6   :  { %521 = vrot.lane.b32.xlu1 %v2541_v8, %s2654_s10  ;;  %392 = vrot.lane.b32.xlu0 %v383_v10, %s2653_s5  ;;  %v2543_v16 = vpop.eup %2542 }
 0x3b7   :  { %v387_v17 = vadd.f32 1.0, %v2543_v16  ;;  %v2545_v18 = vpop.eup %2544 }
 0x3b8   :  { %v511_v19 = vadd.f32 1.0, %v2545_v18 }
 0x3b9   :  { %2546 = vrcp.f32 %v387_v17 }
 0x3ba   :  { %516 = vrot.lane.b32.xlu1 %v507_v11, %s2653_s5  ;;  %2548 = vrcp.f32 %v511_v19 }
 0x3c3   :  { %v2547_v20 = vpop.eup %2546 }
 0x3c4   :  { %v2549_v23 = vpop.eup %2548 }
 0x424   :  { %v398_v21 = vpop.permute.xlu0 %397 }
 0x425   :  { %v400_v22 = vmul.f32 %v2547_v20, %v398_v21 }
 0x427   :  { %402 = vrot.lane.b32.xlu0 %v400_v22, %s2653_s5 }
 0x428   :  { %v522_v24 = vpop.permute.xlu1 %521  ;;  %v393_v26 = vpop.permute.xlu0 %392 }
 0x429   :  { %v524_v25 = vmul.f32 %v2549_v23, %v522_v24  ;;  %v395_v27 = vmul.f32 %v2547_v20, %v393_v26 }
 0x42b   :  { %526 = vrot.lane.b32.xlu1 %v524_v25, %s2653_s5 }
 0x42c   :  { %v517_v28 = vpop.permute.xlu1 %516 }
 0x42d   :  { %v519_v31 = vmul.f32 %v2549_v23, %v517_v28 }
 0x499   :  { %v403_v29 = vpop.permute.xlu0 %402 }
 0x49a   :  { %v405_v30 = vadd.f32 %v403_v29, %v395_v27 }
 0x49c   :  { %2550 = vtanh.f32 %v405_v30 }
 0x49d   :  { %v527_v32 = vpop.permute.xlu1 %526 }
 0x49e   :  { %v529_v33 = vadd.f32 %v527_v32, %v519_v31 }
 0x4a0   :  { %2552 = vtanh.f32 %v529_v33 }
 0x4a6   :  { %v2551_v34 = vpop.eup %2550 }
 0x4a7   :  { %408 = vrot.lane.b32.xlu0 %v2551_v34, %s2654_s10 }
 0x4aa   :  { %v2553_v35 = vpop.eup %2552 }
 0x4ab   :  { %532 = vrot.lane.b32.xlu1 %v2553_v35, %s2654_s10 }
 0x519   :  { %v409_v36 = vpop.permute.xlu0 %408 }
 0x51a   :  { %v411_v37 = vmul.f32 %v2547_v20, %v409_v36 }
 0x51c   :  { %413 = vrot.lane.b32.xlu0 %v411_v37, %s2653_s5  ;;  %v2130_v37 = vld [vmem:[%s3140_s1 + $0x20] sm:$0xff] }
 0x51d   :  { %v533_v38 = vpop.permute.xlu1 %532 }
 0x51e   :  { %v2807_v39 = vmul.f32 %v2549_v23, %v533_v38 }
 0x520   :  { %537 = vrot.lane.b32.xlu1 %v2807_v39, %s2653_s5  ;;  %418 = vrot.lane.b32.xlu0 %v405_v30, %s2655_s11 }
 0x524   :  { %542 = vrot.lane.b32.xlu1 %v529_v33, %s2655_s11  ;;  %v2126_v33 = vld [vmem:[%s3139_s0 + $0x18] sm:$0xff] }
 0x58e   :  { %v414_v40 = vpop.permute.xlu0 %413 }
 0x58f   :  { %416 = vst.msk [vmem:[#allocation2] sm:$0xff] %vm43_vm0, %v414_v40  ;;  %2113 = vst.msk [vmem:[%s3141_s4 + $0x8] sm:$0xff] %vm43_vm0, %v414_v40 }
 0x592   :  { %v538_v41 = vpop.permute.xlu1 %537  ;;  %v419_v42 = vpop.permute.xlu0 %418 }
 0x593   :  { %540 = vst.msk [vmem:[#allocation4] sm:$0xff] %vm43_vm0, %v538_v41  ;;  %421 = vst.msk [vmem:[#allocation3] sm:$0xff] %vm43_vm0, %v419_v42 }
 0x596   :  { %v543_v43 = vpop.permute.xlu1 %542  ;;  %v555_v44 = vld [vmem:[#allocation2] sm:$0xff] }
 0x597   :  { %545 = vst.msk [vmem:[#allocation5] sm:$0xff] %vm43_vm0, %v543_v43  ;;  %2297 = vmatmul.mubr.msk.f32.vlgmr.msra.gmra.mrb[4].mxu0 %vm43_vm0, %v555_v44 }
 0x598   :  { %2458 = vmatpush3.bf16.msra.mxu0 %v2700_v5  ;;  %2318 = vmatprep.mubr.msk.f32.mxu0 %vm2652_vm1, %v2651_v4 }
 0x599   :  { %2459 = vmatprep.subr.bf16.mxu0 %v2650_v0 }
 0x59a   :  { %v679_v45 = vld [vmem:[#allocation4] sm:$0xff]  ;;  %v634_v57 = vld [vmem:[#allocation3] sm:$0xff] }
 0x59b   :  { %2308 = vmatmul.mubr.msk.f32.vlgmr.msra.gmra.mrb[4].mxu1 %vm43_vm0, %v679_v45 }
 0x59c   :  { %2461 = vmatpush3.bf16.msra.mxu0 %v2724_v12  ;;  %2464 = vmatpush3.bf16.msra.mxu1 %v2715_v9 }
 0x59d   :  { %2465 = vmatprep.subr.bf16.mxu1 %v2650_v0  ;;  %2329 = vmatprep.mubr.msk.f32.mxu1 %vm2652_vm1, %v2651_v4 }
 0x59e   :  { %2468 = vmatprep.subr.bf16.mxu0 %v2650_v0  ;;  %v758_v58 = vld [vmem:[#allocation5] sm:$0xff] }
 0x5a0   :  { %2467 = vmatpush3.bf16.msra.mxu1 %v2728_v13 }
 0x5a1   :  { %2474 = vmatprep.subr.bf16.mxu1 %v2650_v0 }
 0x66a   :  { %v629_v47 = vpop.f32.mrb[4].mxu0 }
 0x66b   :  { %v633_v48 = vadd.f32 %v2118_v46, %v629_v47  ;;  %v2298_v49 = vpop.f32.mrb[5].mxu0 }
 0x66d   :  { %2554 = vtanh.f32 %v633_v48  ;;  %v2120_v59 = vmul.f32 -1.442695, %v633_v48 }
 0x66e   :  { %v753_v51 = vpop.f32.mrb[4].mxu1 }
 0x66f   :  { %v757_v52 = vadd.f32 %v2122_v50, %v753_v51  ;;  %v2309_v54 = vpop.f32.mrb[5].mxu1 }
 0x671   :  { %2556 = vtanh.f32 %v757_v52  ;;  %v2124_v60 = vmul.f32 -1.442695, %v757_v52 }
 0x672   :  { %2558 = vpow2.f32 %v2120_v59 }
 0x673   :  { %2560 = vpow2.f32 %v2124_v60 }
 0x677   :  { %v2555_v55 = vpop.eup %2554 }
 0x678   :  { %648 = vrot.lane.b32.xlu0 %v2555_v55, %s2654_s10 }
 0x67b   :  { %v2557_v56 = vpop.eup %2556 }
 0x67c   :  { %772 = vrot.lane.b32.xlu1 %v2557_v56, %s2654_s10  ;;  %643 = vrot.lane.b32.xlu0 %v634_v57, %s2653_s5  ;;  %v2559_v61 = vpop.eup %2558 }
 0x67d   :  { %v638_v62 = vadd.f32 1.0, %v2559_v61  ;;  %v2561_v63 = vpop.eup %2560 }
 0x67e   :  { %v762_v1 = vadd.f32 1.0, %v2561_v63 }
 0x67f   :  { %2562 = vrcp.f32 %v638_v62 }
 0x680   :  { %767 = vrot.lane.b32.xlu1 %v758_v58, %s2653_s5  ;;  %2564 = vrcp.f32 %v762_v1 }
 0x689   :  { %v2563_v2 = vpop.eup %2562 }
 0x68a   :  { %v2565_v7 = vpop.eup %2564 }
 0x6ea   :  { %v649_v3 = vpop.permute.xlu0 %648 }
 0x6eb   :  { %v651_v6 = vmul.f32 %v2563_v2, %v649_v3 }
 0x6ed   :  { %653 = vrot.lane.b32.xlu0 %v651_v6, %s2653_s5 }
 0x6ee   :  { %v773_v8 = vpop.permute.xlu1 %772  ;;  %v644_v11 = vpop.permute.xlu0 %643 }
 0x6ef   :  { %v775_v10 = vmul.f32 %v2565_v7, %v773_v8  ;;  %v646_v14 = vmul.f32 %v2563_v2, %v644_v11 }
 0x6f1   :  { %777 = vrot.lane.b32.xlu1 %v775_v10, %s2653_s5 }
 0x6f2   :  { %v768_v15 = vpop.permute.xlu1 %767 }
 0x6f3   :  { %v770_v18 = vmul.f32 %v2565_v7, %v768_v15 }
 0x75f   :  { %v654_v16 = vpop.permute.xlu0 %653 }
 0x760   :  { %v656_v17 = vadd.f32 %v654_v16, %v646_v14 }
 0x762   :  { %2566 = vtanh.f32 %v656_v17 }
 0x763   :  { %v778_v19 = vpop.permute.xlu1 %777 }
 0x764   :  { %v780_v20 = vadd.f32 %v778_v19, %v770_v18 }
 0x766   :  { %2568 = vtanh.f32 %v780_v20 }
 0x76c   :  { %v2567_v21 = vpop.eup %2566 }
 0x76d   :  { %659 = vrot.lane.b32.xlu0 %v2567_v21, %s2654_s10 }
 0x770   :  { %v2569_v22 = vpop.eup %2568 }
 0x771   :  { %783 = vrot.lane.b32.xlu1 %v2569_v22, %s2654_s10 }
 0x7df   :  { %v660_v23 = vpop.permute.xlu0 %659 }
 0x7e0   :  { %v662_v24 = vmul.f32 %v2563_v2, %v660_v23 }
 0x7e2   :  { %664 = vrot.lane.b32.xlu0 %v662_v24, %s2653_s5 }
 0x7e3   :  { %v784_v25 = vpop.permute.xlu1 %783 }
 0x7e4   :  { %v2850_v26 = vmul.f32 %v2565_v7, %v784_v25 }
 0x7e6   :  { %788 = vrot.lane.b32.xlu1 %v2850_v26, %s2653_s5  ;;  %669 = vrot.lane.b32.xlu0 %v656_v17, %s2655_s11 }
 0x7ea   :  { %793 = vrot.lane.b32.xlu1 %v780_v20, %s2655_s11 }
 0x854   :  { %v665_v27 = vpop.permute.xlu0 %664 }
 0x855   :  { %667 = vst.msk [vmem:[#allocation2] sm:$0xff] %vm43_vm0, %v665_v27  ;;  %2121 = vst.msk [vmem:[%s3141_s4 + $0x10] sm:$0xff] %vm43_vm0, %v665_v27 }
 0x858   :  { %v789_v28 = vpop.permute.xlu1 %788  ;;  %v670_v29 = vpop.permute.xlu0 %669 }
 0x859   :  { %791 = vst.msk [vmem:[#allocation4] sm:$0xff] %vm43_vm0, %v789_v28  ;;  %672 = vst.msk [vmem:[#allocation3] sm:$0xff] %vm43_vm0, %v670_v29 }
 0x85c   :  { %v794_v30 = vpop.permute.xlu1 %793  ;;  %v806_v31 = vld [vmem:[#allocation2] sm:$0xff] }
 0x85d   :  { %796 = vst.msk [vmem:[#allocation5] sm:$0xff] %vm43_vm0, %v794_v30  ;;  %2319 = vmatmul.mubr.msk.f32.vlgmr.msra.gmra.mrb[6].mxu0 %vm43_vm0, %v806_v31 }
 0x85e   :  { %2470 = vmatpush3.bf16.msra.mxu0 %v2700_v5  ;;  %2340 = vmatprep.mubr.msk.f32.mxu0 %vm2652_vm1, %v2651_v4 }
 0x85f   :  { %2471 = vmatprep.subr.bf16.mxu0 %v2650_v0 }
 0x860   :  { %v930_v32 = vld [vmem:[#allocation4] sm:$0xff]  ;;  %v885_v44 = vld [vmem:[#allocation3] sm:$0xff] }
 0x861   :  { %2330 = vmatmul.mubr.msk.f32.vlgmr.msra.gmra.mrb[6].mxu1 %vm43_vm0, %v930_v32 }
 0x862   :  { %2473 = vmatpush3.bf16.msra.mxu0 %v2724_v12  ;;  %2476 = vmatpush3.bf16.msra.mxu1 %v2715_v9 }
 0x863   :  { %2477 = vmatprep.subr.bf16.mxu1 %v2650_v0  ;;  %2351 = vmatprep.mubr.msk.f32.mxu1 %vm2652_vm1, %v2651_v4 }
 0x864   :  { %2480 = vmatprep.subr.bf16.mxu0 %v2650_v0  ;;  %v1009_v45 = vld [vmem:[#allocation5] sm:$0xff] }
 0x866   :  { %2479 = vmatpush3.bf16.msra.mxu1 %v2728_v13 }
 0x867   :  { %2486 = vmatprep.subr.bf16.mxu1 %v2650_v0 }
 0x930   :  { %v880_v34 = vpop.f32.mrb[6].mxu0 }
 0x931   :  { %v884_v35 = vadd.f32 %v2126_v33, %v880_v34  ;;  %v2320_v36 = vpop.f32.mrb[7].mxu0 }
 0x933   :  { %2570 = vtanh.f32 %v884_v35  ;;  %v2128_v46 = vmul.f32 -1.442695, %v884_v35 }
 0x934   :  { %v1004_v38 = vpop.f32.mrb[6].mxu1 }
 0x935   :  { %v1008_v40 = vadd.f32 %v2130_v37, %v1004_v38  ;;  %v2331_v41 = vpop.f32.mrb[7].mxu1 }
 0x937   :  { %2572 = vtanh.f32 %v1008_v40  ;;  %v2132_v47 = vmul.f32 -1.442695, %v1008_v40 }
 0x938   :  { %2574 = vpow2.f32 %v2128_v46 }
 0x939   :  { %2576 = vpow2.f32 %v2132_v47 }
 0x93d   :  { %v2571_v42 = vpop.eup %2570 }
 0x93e   :  { %899 = vrot.lane.b32.xlu0 %v2571_v42, %s2654_s10 }
 0x941   :  { %v2573_v43 = vpop.eup %2572 }
 0x942   :  { %1023 = vrot.lane.b32.xlu1 %v2573_v43, %s2654_s10  ;;  %894 = vrot.lane.b32.xlu0 %v885_v44, %s2653_s5  ;;  %v2575_v48 = vpop.eup %2574 }
 0x943   :  { %v889_v49 = vadd.f32 1.0, %v2575_v48  ;;  %v2577_v50 = vpop.eup %2576 }
 0x944   :  { %v1013_v51 = vadd.f32 1.0, %v2577_v50 }
 0x945   :  { %2578 = vrcp.f32 %v889_v49 }
 0x946   :  { %1018 = vrot.lane.b32.xlu1 %v1009_v45, %s2653_s5  ;;  %2580 = vrcp.f32 %v1013_v51 }
 0x94f   :  { %v2579_v52 = vpop.eup %2578 }
 0x950   :  { %v2581_v56 = vpop.eup %2580 }
 0x9b0   :  { %v900_v54 = vpop.permute.xlu0 %899 }
 0x9b1   :  { %v902_v55 = vmul.f32 %v2579_v52, %v900_v54 }
 0x9b3   :  { %904 = vrot.lane.b32.xlu0 %v902_v55, %s2653_s5 }
 0x9b4   :  { %v1024_v57 = vpop.permute.xlu1 %1023  ;;  %v895_v59 = vpop.permute.xlu0 %894 }
 0x9b5   :  { %v1026_v58 = vmul.f32 %v2581_v56, %v1024_v57  ;;  %v897_v60 = vmul.f32 %v2579_v52, %v895_v59 }
 0x9b7   :  { %1028 = vrot.lane.b32.xlu1 %v1026_v58, %s2653_s5 }
 0x9b8   :  { %v1019_v61 = vpop.permute.xlu1 %1018 }
 0x9b9   :  { %v1021_v1 = vmul.f32 %v2581_v56, %v1019_v61 }
 0xa25   :  { %v905_v62 = vpop.permute.xlu0 %904 }
 0xa26   :  { %v907_v63 = vadd.f32 %v905_v62, %v897_v60 }
 0xa28   :  { %2582 = vtanh.f32 %v907_v63 }
 0xa29   :  { %v1029_v2 = vpop.permute.xlu1 %1028 }
 0xa2a   :  { %v1031_v3 = vadd.f32 %v1029_v2, %v1021_v1  ;;  %v2142_v1 = vld [vmem:[%s3139_s0 + $0x28] sm:$0xff] }
 0xa2c   :  { %2584 = vtanh.f32 %v1031_v3 }
 0xa32   :  { %v2583_v6 = vpop.eup %2582 }
 0xa33   :  { %910 = vrot.lane.b32.xlu0 %v2583_v6, %s2654_s10 }
 0xa36   :  { %v2585_v7 = vpop.eup %2584 }
 0xa37   :  { %1034 = vrot.lane.b32.xlu1 %v2585_v7, %s2654_s10  ;;  %v2146_v7 = vld [vmem:[%s3140_s1 + $0x10] sm:$0xff] }
 0xaa5   :  { %v911_v8 = vpop.permute.xlu0 %910 }
 0xaa6   :  { %v913_v10 = vmul.f32 %v2579_v52, %v911_v8 }
 0xaa8   :  { %915 = vrot.lane.b32.xlu0 %v913_v10, %s2653_s5 }
 0xaa9   :  { %v1035_v11 = vpop.permute.xlu1 %1034 }
 0xaaa   :  { %v2893_v14 = vmul.f32 %v2581_v56, %v1035_v11 }
 0xaac   :  { %1039 = vrot.lane.b32.xlu1 %v2893_v14, %s2653_s5  ;;  %920 = vrot.lane.b32.xlu0 %v907_v63, %s2655_s11 }
 0xab0   :  { %1044 = vrot.lane.b32.xlu1 %v1031_v3, %s2655_s11 }
 0xb1a   :  { %v916_v15 = vpop.permute.xlu0 %915 }
 0xb1b   :  { %918 = vst.msk [vmem:[#allocation2] sm:$0xff] %vm43_vm0, %v916_v15  ;;  %2129 = vst.msk [vmem:[%s3141_s4 + $0x18] sm:$0xff] %vm43_vm0, %v916_v15 }
 0xb1e   :  { %v1040_v16 = vpop.permute.xlu1 %1039  ;;  %v921_v17 = vpop.permute.xlu0 %920 }
 0xb1f   :  { %1042 = vst.msk [vmem:[#allocation4] sm:$0xff] %vm43_vm0, %v1040_v16  ;;  %923 = vst.msk [vmem:[#allocation3] sm:$0xff] %vm43_vm0, %v921_v17 }
 0xb22   :  { %v1045_v18 = vpop.permute.xlu1 %1044  ;;  %v1057_v19 = vld [vmem:[#allocation2] sm:$0xff] }
 0xb23   :  { %1047 = vst.msk [vmem:[#allocation5] sm:$0xff] %vm43_vm0, %v1045_v18  ;;  %2341 = vmatmul.mubr.msk.f32.vlgmr.msra.gmra.mrb[8].mxu0 %vm43_vm0, %v1057_v19 }
 0xb24   :  { %2482 = vmatpush3.bf16.msra.mxu0 %v2700_v5  ;;  %2362 = vmatprep.mubr.msk.f32.mxu0 %vm2652_vm1, %v2651_v4  ;;  %v2134_v5 = vld [vmem:[%s3139_s0 + $0x20] sm:$0xff] }
 0xb25   :  { %2483 = vmatprep.subr.bf16.mxu0 %v2650_v0 }
 0xb26   :  { %v1181_v20 = vld [vmem:[#allocation4] sm:$0xff]  ;;  %v1136_v28 = vld [vmem:[#allocation3] sm:$0xff] }
 0xb27   :  { %2352 = vmatmul.mubr.msk.f32.vlgmr.msra.gmra.mrb[8].mxu1 %vm43_vm0, %v1181_v20 }
 0xb28   :  { %2485 = vmatpush3.bf16.msra.mxu0 %v2724_v12  ;;  %2488 = vmatpush3.bf16.msra.mxu1 %v2715_v9  ;;  %v2138_v9 = vld [vmem:[%s3140_s1 + $0x18] sm:$0xff] }
 0xb29   :  { %2489 = vmatprep.subr.bf16.mxu1 %v2650_v0  ;;  %2373 = vmatprep.mubr.msk.f32.mxu1 %vm2652_vm1, %v2651_v4 }
 0xb2a   :  { %2492 = vmatprep.subr.bf16.mxu0 %v2650_v0  ;;  %v1260_v29 = vld [vmem:[#allocation5] sm:$0xff] }
 0xb2c   :  { %2491 = vmatpush3.bf16.msra.mxu1 %v2728_v13 }
 0xb2d   :  { %2498 = vmatprep.subr.bf16.mxu1 %v2650_v0 }
 0xbf6   :  { %v1131_v21 = vpop.f32.mrb[8].mxu0 }
 0xbf7   :  { %v1135_v22 = vadd.f32 %v2134_v5, %v1131_v21  ;;  %v2342_v12 = vpop.f32.mrb[9].mxu0 }
 0xbf9   :  { %2586 = vtanh.f32 %v1135_v22  ;;  %v2136_v30 = vmul.f32 -1.442695, %v1135_v22 }
 0xbfa   :  { %v1255_v23 = vpop.f32.mrb[8].mxu1 }
 0xbfb   :  { %v1259_v24 = vadd.f32 %v2138_v9, %v1255_v23  ;;  %v2353_v25 = vpop.f32.mrb[9].mxu1 }
 0xbfd   :  { %2588 = vtanh.f32 %v1259_v24  ;;  %v2140_v31 = vmul.f32 -1.442695, %v1259_v24 }
 0xbfe   :  { %2590 = vpow2.f32 %v2136_v30 }
 0xbff   :  { %2592 = vpow2.f32 %v2140_v31 }
 0xc03   :  { %v2587_v27 = vpop.eup %2586 }
 0xc04   :  { %1150 = vrot.lane.b32.xlu0 %v2587_v27, %s2654_s10 }
 0xc07   :  { %v2589_v13 = vpop.eup %2588 }
 0xc08   :  { %1274 = vrot.lane.b32.xlu1 %v2589_v13, %s2654_s10  ;;  %1145 = vrot.lane.b32.xlu0 %v1136_v28, %s2653_s5  ;;  %v2591_v32 = vpop.eup %2590 }
 0xc09   :  { %v1140_v33 = vadd.f32 1.0, %v2591_v32  ;;  %v2593_v34 = vpop.eup %2592 }
 0xc0a   :  { %v1264_v35 = vadd.f32 1.0, %v2593_v34 }
 0xc0b   :  { %2594 = vrcp.f32 %v1140_v33 }
 0xc0c   :  { %1269 = vrot.lane.b32.xlu1 %v1260_v29, %s2653_s5  ;;  %2596 = vrcp.f32 %v1264_v35 }
 0xc15   :  { %v2595_v36 = vpop.eup %2594 }
 0xc16   :  { %v2597_v40 = vpop.eup %2596 }
 0xc76   :  { %v1151_v37 = vpop.permute.xlu0 %1150 }
 0xc77   :  { %v1153_v38 = vmul.f32 %v2595_v36, %v1151_v37 }
 0xc79   :  { %1155 = vrot.lane.b32.xlu0 %v1153_v38, %s2653_s5  ;;  %v1560_v38 = vld [vmem:[%s3137_s2] sm:$0xff] }
 0xc7a   :  { %v1275_v41 = vpop.permute.xlu1 %1274  ;;  %v1146_v43 = vpop.permute.xlu0 %1145 }
 0xc7b   :  { %v1277_v42 = vmul.f32 %v2597_v40, %v1275_v41  ;;  %v1148_v44 = vmul.f32 %v2595_v36, %v1146_v43  ;;  %v1563_v43 = vld [vmem:[%s3137_s2 + $0x18] sm:$0xff] }
 0xc7d   :  { %1279 = vrot.lane.b32.xlu1 %v1277_v42, %s2653_s5  ;;  %v1562_v42 = vld [vmem:[%s3137_s2 + $0x10] sm:$0xff] }
 0xc7e   :  { %v1270_v45 = vpop.permute.xlu1 %1269 }
 0xc7f   :  { %v1272_v48 = vmul.f32 %v2597_v40, %v1270_v45  ;;  %v2496_v45 = vpack.c.bf16 %v1563_v43, %v1562_v42 }
 0xceb   :  { %v1156_v46 = vpop.permute.xlu0 %1155 }
 0xcec   :  { %v1158_v47 = vadd.f32 %v1156_v46, %v1148_v44  ;;  %v1684_v44 = vld [vmem:[%s3138_s3] sm:$0xff]  ;;  %v1685_v46 = vld [vmem:[%s3138_s3 + $0x8] sm:$0xff] }
 0xcee   :  { %2598 = vtanh.f32 %v1158_v47 }
 0xcef   :  { %v1280_v49 = vpop.permute.xlu1 %1279 }
 0xcf0   :  { %v1282_v50 = vadd.f32 %v1280_v49, %v1272_v48  ;;  %v1686_v48 = vld [vmem:[%s3138_s3 + $0x10] sm:$0xff]  ;;  %v1687_v49 = vld [vmem:[%s3138_s3 + $0x18] sm:$0xff] }
 0xcf2   :  { %2600 = vtanh.f32 %v1282_v50 }
 0xcf8   :  { %v2599_v51 = vpop.eup %2598 }
 0xcf9   :  { %1161 = vrot.lane.b32.xlu0 %v2599_v51, %s2654_s10 }
 0xcfc   :  { %v2601_v52 = vpop.eup %2600 }
 0xcfd   :  { %1285 = vrot.lane.b32.xlu1 %v2601_v52, %s2654_s10 }
 0xd6b   :  { %v1162_v54 = vpop.permute.xlu0 %1161 }
 0xd6c   :  { %v1164_v55 = vmul.f32 %v2595_v36, %v1162_v54 }
 0xd6e   :  { %1166 = vrot.lane.b32.xlu0 %v1164_v55, %s2653_s5 }
 0xd6f   :  { %v1286_v56 = vpop.permute.xlu1 %1285 }
 0xd70   :  { %v2936_v57 = vmul.f32 %v2597_v40, %v1286_v56  ;;  %v1561_v40 = vld [vmem:[%s3137_s2 + $0x8] sm:$0xff] }
 0xd71   :  { %v2493_v41 = vpack.c.bf16 %v1561_v40, %v1560_v38 }
 0xd72   :  { %1290 = vrot.lane.b32.xlu1 %v2936_v57, %s2653_s5  ;;  %1171 = vrot.lane.b32.xlu0 %v1158_v47, %s2655_s11  ;;  %v2499_v47 = vpack.c.bf16 %v1685_v46, %v1684_v44 }
 0xd76   :  { %1295 = vrot.lane.b32.xlu1 %v1282_v50, %s2655_s11  ;;  %v2502_v50 = vpack.c.bf16 %v1687_v49, %v1686_v48 }
 0xde0   :  { %v2942_v58 = vpop.permute.xlu0 %1166 }
 0xde1   :  { %1169 = vst.msk [vmem:[#allocation2] sm:$0xff] %vm43_vm0, %v2942_v58 }
 0xde4   :  { %v1291_v59 = vpop.permute.xlu1 %1290  ;;  %v1172_v60 = vpop.permute.xlu0 %1171 }
 0xde5   :  { %1293 = vst.msk [vmem:[#allocation4] sm:$0xff] %vm43_vm0, %v1291_v59  ;;  %1174 = vst.msk [vmem:[#allocation3] sm:$0xff] %vm43_vm0, %v1172_v60 }
 0xde8   :  { %v1296_v61 = vpop.permute.xlu1 %1295  ;;  %v1308_v62 = vld [vmem:[#allocation2] sm:$0xff] }
 0xde9   :  { %1298 = vst.msk [vmem:[#allocation5] sm:$0xff] %vm43_vm0, %v1296_v61  ;;  %2363 = vmatmul.mubr.msk.f32.vlgmr.msra.gmra.mrb[10].mxu0 %vm43_vm0, %v1308_v62 }
 0xdea   :  { %2384 = vmatprep.mubr.msk.f32.mxu0 %vm2652_vm1, %v2651_v4  ;;  %2494 = vmatpush3.bf16.msra.mxu0 %v2493_v41 }
 0xdeb   :  { %2495 = vmatprep.subr.bf16.mxu0 %v2650_v0 }
 0xdec   :  { %v1432_v63 = vld [vmem:[#allocation4] sm:$0xff]  ;;  %v1387_v17 = vld [vmem:[#allocation3] sm:$0xff] }
 0xded   :  { %2374 = vmatmul.mubr.msk.f32.vlgmr.msra.gmra.mrb[10].mxu1 %vm43_vm0, %v1432_v63 }
 0xdee   :  { %2395 = vmatprep.mubr.msk.f32.mxu1 %vm2652_vm1, %v2651_v4  ;;  %2497 = vmatpush3.bf16.msra.mxu0 %v2496_v45 }
 0xdef   :  { %2500 = vmatpush3.bf16.msra.mxu1 %v2499_v47  ;;  %2504 = vmatprep.subr.bf16.mxu0 %v2650_v0 }
 0xdf0   :  { %v1511_v18 = vld [vmem:[#allocation5] sm:$0xff]  ;;  %2501 = vmatprep.subr.bf16.mxu1 %v2650_v0 }
 0xdf3   :  { %2503 = vmatpush3.bf16.msra.mxu1 %v2502_v50 }
 0xdf4   :  { %2510 = vmatprep.subr.bf16.mxu1 %v2650_v0 }
 0xebc   :  { %v1382_v2 = vpop.f32.mrb[10].mxu0 }
 0xebd   :  { %v1386_v3 = vadd.f32 %v2142_v1, %v1382_v2  ;;  %v2364_v6 = vpop.f32.mrb[11].mxu0  ;;  %v2150_v1 = vld [vmem:[%s3139_s0 + $0x30] sm:$0xff] }
 0xebf   :  { %2602 = vtanh.f32 %v1386_v3  ;;  %v2144_v19 = vmul.f32 -1.442695, %v1386_v3 }
 0xec0   :  { %v1506_v8 = vpop.f32.mrb[10].mxu1 }
 0xec1   :  { %v1510_v10 = vadd.f32 %v2146_v7, %v1506_v8  ;;  %v2375_v11 = vpop.f32.mrb[11].mxu1  ;;  %v2154_v7 = vld [vmem:[%s3140_s1 + $0x8] sm:$0xff] }
 0xec3   :  { %2604 = vtanh.f32 %v1510_v10  ;;  %v2148_v20 = vmul.f32 -1.442695, %v1510_v10 }
 0xec4   :  { %2606 = vpow2.f32 %v2144_v19 }
 0xec5   :  { %2608 = vpow2.f32 %v2148_v20 }
 0xec9   :  { %v2603_v15 = vpop.eup %2602 }
 0xeca   :  { %1401 = vrot.lane.b32.xlu0 %v2603_v15, %s2654_s10 }
 0xecd   :  { %v2605_v16 = vpop.eup %2604 }
 0xece   :  { %1525 = vrot.lane.b32.xlu1 %v2605_v16, %s2654_s10  ;;  %1396 = vrot.lane.b32.xlu0 %v1387_v17, %s2653_s5  ;;  %v2607_v5 = vpop.eup %2606 }
 0xecf   :  { %v1391_v21 = vadd.f32 1.0, %v2607_v5  ;;  %v2609_v22 = vpop.eup %2608 }
 0xed0   :  { %v1515_v12 = vadd.f32 1.0, %v2609_v22 }
 0xed1   :  { %2610 = vrcp.f32 %v1391_v21 }
 0xed2   :  { %1520 = vrot.lane.b32.xlu1 %v1511_v18, %s2653_s5  ;;  %2612 = vrcp.f32 %v1515_v12 }
 0xedb   :  { %v2611_v9 = vpop.eup %2610 }
 0xedc   :  { %v2613_v25 = vpop.eup %2612 }
 0xf3c   :  { %v1402_v23 = vpop.permute.xlu0 %1401 }
 0xf3d   :  { %v1404_v24 = vmul.f32 %v2611_v9, %v1402_v23 }
 0xf3f   :  { %1406 = vrot.lane.b32.xlu0 %v1404_v24, %s2653_s5 }
 0xf40   :  { %v1526_v27 = vpop.permute.xlu1 %1525  ;;  %v1397_v28 = vpop.permute.xlu0 %1396 }
 0xf41   :  { %v1528_v13 = vmul.f32 %v2613_v25, %v1526_v27  ;;  %v1399_v29 = vmul.f32 %v2611_v9, %v1397_v28 }
 0xf43   :  { %1530 = vrot.lane.b32.xlu1 %v1528_v13, %s2653_s5 }
 0xf44   :  { %v1521_v30 = vpop.permute.xlu1 %1520 }
 0xf45   :  { %v1523_v33 = vmul.f32 %v2613_v25, %v1521_v30 }
 0xfb1   :  { %v1407_v31 = vpop.permute.xlu0 %1406 }
 0xfb2   :  { %v1409_v32 = vadd.f32 %v1407_v31, %v1399_v29 }
 0xfb4   :  { %2614 = vtanh.f32 %v1409_v32 }
 0xfb5   :  { %v1531_v34 = vpop.permute.xlu1 %1530 }
 0xfb6   :  { %v1533_v35 = vadd.f32 %v1531_v34, %v1523_v33 }
 0xfb8   :  { %2616 = vtanh.f32 %v1533_v35 }
 0xfbe   :  { %v2615_v36 = vpop.eup %2614 }
 0xfbf   :  { %1412 = vrot.lane.b32.xlu0 %v2615_v36, %s2654_s10 }
 0xfc2   :  { %v2617_v37 = vpop.eup %2616 }
 0xfc3   :  { %1536 = vrot.lane.b32.xlu1 %v2617_v37, %s2654_s10 }
0x1031   :  { %v1413_v51 = vpop.permute.xlu0 %1412 }
0x1032   :  { %v1415_v52 = vmul.f32 %v2611_v9, %v1413_v51  ;;  %v1932_v51 = vld [vmem:[%s3140_s1] sm:$0xff] }
0x1034   :  { %1417 = vrot.lane.b32.xlu0 %v1415_v52, %s2653_s5 }
0x1035   :  { %v1537_v54 = vpop.permute.xlu1 %1536 }
0x1036   :  { %v2998_v55 = vmul.f32 %v2613_v25, %v1537_v54 }
0x1038   :  { %1541 = vrot.lane.b32.xlu1 %v2998_v55, %s2653_s5  ;;  %1422 = vrot.lane.b32.xlu0 %v1409_v32, %s2655_s11 }
0x103c   :  { %1546 = vrot.lane.b32.xlu1 %v1533_v35, %s2655_s11 }
0x10a6   :  { %v3004_v56 = vpop.permute.xlu0 %1417 }
0x10a7   :  { %1420 = vst.msk [vmem:[#allocation2] sm:$0xff] %vm43_vm0, %v3004_v56 }
0x10aa   :  { %v1542_v59 = vpop.permute.xlu1 %1541  ;;  %v1423_v60 = vpop.permute.xlu0 %1422 }
0x10ab   :  { %1544 = vst.msk [vmem:[#allocation4] sm:$0xff] %vm43_vm0, %v1542_v59  ;;  %1425 = vst.msk [vmem:[#allocation3] sm:$0xff] %vm43_vm0, %v1423_v60 }
0x10ae   :  { %v1547_v61 = vpop.permute.xlu1 %1546  ;;  %v1559_v62 = vld [vmem:[#allocation2] sm:$0xff] }
0x10af   :  { %1549 = vst.msk [vmem:[#allocation5] sm:$0xff] %vm43_vm0, %v1547_v61  ;;  %2385 = vmatmul.mubr.msk.f32.vlgmr.msra.gmra.mrb[12].mxu0 %vm43_vm0, %v1559_v62 }
0x10b0   :  { %2506 = vmatpush3.bf16.msra.mxu0 %v2493_v41  ;;  %2406 = vmatprep.mubr.msk.f32.mxu0 %vm2652_vm1, %v2651_v4 }
0x10b1   :  { %2507 = vmatprep.subr.bf16.mxu0 %v2650_v0 }
0x10b2   :  { %v1683_v63 = vld [vmem:[#allocation4] sm:$0xff]  ;;  %v1638_v15 = vld [vmem:[#allocation3] sm:$0xff] }
0x10b3   :  { %2396 = vmatmul.mubr.msk.f32.vlgmr.msra.gmra.mrb[12].mxu1 %vm43_vm0, %v1683_v63 }
0x10b4   :  { %2509 = vmatpush3.bf16.msra.mxu0 %v2496_v45  ;;  %2512 = vmatpush3.bf16.msra.mxu1 %v2499_v47  ;;  %v2158_v47 = vld [vmem:[%s3139_s0 + $0x38] sm:$0xff] }
0x10b5   :  { %2513 = vmatprep.subr.bf16.mxu1 %v2650_v0  ;;  %2417 = vmatprep.mubr.msk.f32.mxu1 %vm2652_vm1, %v2651_v4 }
0x10b6   :  { %v1762_v16 = vld [vmem:[#allocation5] sm:$0xff] }
0x10b8   :  { %2515 = vmatpush3.bf16.msra.mxu1 %v2502_v50 }
0x1182   :  { %v1633_v2 = vpop.f32.mrb[12].mxu0 }
0x1183   :  { %v1637_v3 = vadd.f32 %v2150_v1, %v1633_v2  ;;  %v2386_v6 = vpop.f32.mrb[13].mxu0 }
0x1185   :  { %2618 = vtanh.f32 %v1637_v3  ;;  %v2152_v17 = vmul.f32 -1.442695, %v1637_v3 }
0x1186   :  { %v1757_v8 = vpop.f32.mrb[12].mxu1 }
0x1187   :  { %v1761_v10 = vadd.f32 %v2154_v7, %v1757_v8  ;;  %v2397_v11 = vpop.f32.mrb[13].mxu1 }
0x1189   :  { %2620 = vtanh.f32 %v1761_v10  ;;  %v2156_v18 = vmul.f32 -1.442695, %v1761_v10 }
0x118a   :  { %2622 = vpow2.f32 %v2152_v17 }
0x118b   :  { %2624 = vpow2.f32 %v2156_v18 }
0x118f   :  { %v2619_v0 = vpop.eup %2618 }
0x1190   :  { %1652 = vrot.lane.b32.xlu0 %v2619_v0, %s2654_s10 }
0x1193   :  { %v2621_v4 = vpop.eup %2620 }
0x1194   :  { %1776 = vrot.lane.b32.xlu1 %v2621_v4, %s2654_s10  ;;  %1647 = vrot.lane.b32.xlu0 %v1638_v15, %s2653_s5  ;;  %v2623_v19 = vpop.eup %2622 }
0x1195   :  { %v1642_v20 = vadd.f32 1.0, %v2623_v19  ;;  %v2625_v5 = vpop.eup %2624 }
0x1196   :  { %v1766_v21 = vadd.f32 1.0, %v2625_v5 }
0x1197   :  { %2626 = vrcp.f32 %v1642_v20 }
0x1198   :  { %1771 = vrot.lane.b32.xlu1 %v1762_v16, %s2653_s5  ;;  %2628 = vrcp.f32 %v1766_v21 }
0x11a1   :  { %v2627_v22 = vpop.eup %2626 }
0x11a2   :  { %v2629_v23 = vpop.eup %2628 }
0x1202   :  { %v1653_v12 = vpop.permute.xlu0 %1652 }
0x1203   :  { %v1655_v9 = vmul.f32 %v2627_v22, %v1653_v12 }
0x1205   :  { %1657 = vrot.lane.b32.xlu0 %v1655_v9, %s2653_s5 }
0x1206   :  { %v1777_v24 = vpop.permute.xlu1 %1776  ;;  %v1648_v27 = vpop.permute.xlu0 %1647 }
0x1207   :  { %v1779_v25 = vmul.f32 %v2629_v23, %v1777_v24  ;;  %v1650_v13 = vmul.f32 %v2627_v22, %v1648_v27 }
0x1209   :  { %1781 = vrot.lane.b32.xlu1 %v1779_v25, %s2653_s5 }
0x120a   :  { %v1772_v28 = vpop.permute.xlu1 %1771 }
0x120b   :  { %v1774_v31 = vmul.f32 %v2629_v23, %v1772_v28 }
0x1277   :  { %v1658_v29 = vpop.permute.xlu0 %1657 }
0x1278   :  { %v1660_v30 = vadd.f32 %v1658_v29, %v1650_v13 }
0x127a   :  { %2630 = vtanh.f32 %v1660_v30 }
0x127b   :  { %v1782_v32 = vpop.permute.xlu1 %1781 }
0x127c   :  { %v1784_v33 = vadd.f32 %v1782_v32, %v1774_v31 }
0x127e   :  { %2632 = vtanh.f32 %v1784_v33 }
0x1284   :  { %v2631_v34 = vpop.eup %2630 }
0x1285   :  { %1663 = vrot.lane.b32.xlu0 %v2631_v34, %s2654_s10 }
0x1288   :  { %v2633_v35 = vpop.eup %2632 }
0x1289   :  { %1787 = vrot.lane.b32.xlu1 %v2633_v35, %s2654_s10 }
0x12f7   :  { %v1664_v36 = vpop.permute.xlu0 %1663 }
0x12f8   :  { %v1666_v37 = vmul.f32 %v2627_v22, %v1664_v36 }
0x12fa   :  { %1668 = vrot.lane.b32.xlu0 %v1666_v37, %s2653_s5 }
0x12fb   :  { %v1788_v38 = vpop.permute.xlu1 %1787 }
0x12fc   :  { %v3034_v40 = vmul.f32 %v2629_v23, %v1788_v38 }
0x12fe   :  { %1792 = vrot.lane.b32.xlu1 %v3034_v40, %s2653_s5  ;;  %1673 = vrot.lane.b32.xlu0 %v1660_v30, %s2655_s11 }
0x1302   :  { %1797 = vrot.lane.b32.xlu1 %v1784_v33, %s2655_s11 }
0x136c   :  { %v3040_v41 = vpop.permute.xlu0 %1668 }
0x136d   :  { %1671 = vst.msk [vmem:[#allocation2] sm:$0xff] %vm43_vm0, %v3040_v41 }
0x1370   :  { %v1793_v42 = vpop.permute.xlu1 %1792  ;;  %v1674_v43 = vpop.permute.xlu0 %1673 }
0x1371   :  { %1795 = vst.msk [vmem:[#allocation4] sm:$0xff] %vm43_vm0, %v1793_v42  ;;  %1676 = vst.msk [vmem:[#allocation3] sm:$0xff] %vm43_vm0, %v1674_v43 }
0x1374   :  { %v1798_v44 = vpop.permute.xlu1 %1797  ;;  %v1810_v45 = vld [vmem:[#allocation2] sm:$0xff] }
0x1375   :  { %1800 = vst.msk [vmem:[#allocation5] sm:$0xff] %vm43_vm0, %v1798_v44  ;;  %2407 = vmatmul.mubr.msk.f32.vlgmr.msra.gmra.mrb[14].mxu0 %vm43_vm0, %v1810_v45 }
0x1378   :  { %v1933_v46 = vld [vmem:[#allocation4] sm:$0xff]  ;;  %v1889_v62 = vld [vmem:[#allocation3] sm:$0xff] }
0x1379   :  { %2418 = vmatmul.mubr.msk.f32.vlgmr.msra.gmra.mrb[14].mxu1 %vm43_vm0, %v1933_v46 }
0x137c   :  { %v2012_v63 = vld [vmem:[#allocation5] sm:$0xff] }
0x1448   :  { %v1884_v48 = vpop.f32.mrb[14].mxu0 }
0x1449   :  { %v1888_v49 = vadd.f32 %v2158_v47, %v1884_v48  ;;  %v2408_v50 = vpop.f32.mrb[15].mxu0 }
0x144b   :  { %2634 = vtanh.f32 %v1888_v49  ;;  %v2160_v1 = vmul.f32 -1.442695, %v1888_v49 }
0x144c   :  { %v2007_v52 = vpop.f32.mrb[14].mxu1 }
0x144d   :  { %v2011_v54 = vadd.f32 %v2007_v52, %v1932_v51  ;;  %v2419_v59 = vpop.f32.mrb[15].mxu1 }
0x144f   :  { %2636 = vtanh.f32 %v2011_v54  ;;  %v2163_v2 = vmul.f32 -1.442695, %v2011_v54 }
0x1450   :  { %2638 = vpow2.f32 %v2160_v1 }
0x1451   :  { %2640 = vpow2.f32 %v2163_v2 }
0x1455   :  { %v2635_v60 = vpop.eup %2634 }
0x1456   :  { %1903 = vrot.lane.b32.xlu0 %v2635_v60, %s2654_s10 }
0x1459   :  { %v2637_v61 = vpop.eup %2636 }
0x145a   :  { %2026 = vrot.lane.b32.xlu1 %v2637_v61, %s2654_s10  ;;  %1898 = vrot.lane.b32.xlu0 %v1889_v62, %s2653_s5  ;;  %v2639_v3 = vpop.eup %2638 }
0x145b   :  { %v1893_v6 = vadd.f32 1.0, %v2639_v3  ;;  %v2641_v7 = vpop.eup %2640 }
0x145c   :  { %v2016_v8 = vadd.f32 1.0, %v2641_v7 }
0x145d   :  { %2642 = vrcp.f32 %v1893_v6 }
0x145e   :  { %2021 = vrot.lane.b32.xlu1 %v2012_v63, %s2653_s5  ;;  %2644 = vrcp.f32 %v2016_v8 }
0x1467   :  { %v2643_v10 = vpop.eup %2642 }
0x1468   :  { %v2645_v4 = vpop.eup %2644 }
0x14c8   :  { %v1904_v11 = vpop.permute.xlu0 %1903 }
0x14c9   :  { %v1906_v0 = vmul.f32 %v2643_v10, %v1904_v11 }
0x14cb   :  { %1908 = vrot.lane.b32.xlu0 %v1906_v0, %s2653_s5 }
0x14cc   :  { %v2027_v15 = vpop.permute.xlu1 %2026  ;;  %v1899_v17 = vpop.permute.xlu0 %1898 }
0x14cd   :  { %v2029_v16 = vmul.f32 %v2645_v4, %v2027_v15  ;;  %v1901_v18 = vmul.f32 %v2643_v10, %v1899_v17 }
0x14cf   :  { %2031 = vrot.lane.b32.xlu1 %v2029_v16, %s2653_s5 }
0x14d0   :  { %v2022_v19 = vpop.permute.xlu1 %2021 }
0x14d1   :  { %v2024_v21 = vmul.f32 %v2645_v4, %v2022_v19 }
0x153d   :  { %v1909_v20 = vpop.permute.xlu0 %1908 }
0x153e   :  { %v1911_v5 = vadd.f32 %v1909_v20, %v1901_v18 }
0x1540   :  { %2646 = vtanh.f32 %v1911_v5 }
0x1541   :  { %v2032_v22 = vpop.permute.xlu1 %2031 }
0x1542   :  { %v2034_v12 = vadd.f32 %v2032_v22, %v2024_v21 }
0x1544   :  { %2648 = vtanh.f32 %v2034_v12 }
0x154a   :  { %v2647_v9 = vpop.eup %2646 }
0x154b   :  { %1914 = vrot.lane.b32.xlu0 %v2647_v9, %s2654_s10 }
0x154e   :  { %v2649_v23 = vpop.eup %2648 }
0x154f   :  { %2037 = vrot.lane.b32.xlu1 %v2649_v23, %s2654_s10  ;;  %295 = vrot.lane.b32.xlu0 %v2764_v53, %s2654_s10 }
0x1553   :  { %547 = vrot.lane.b32.xlu1 %v2807_v39, %s2654_s10  ;;  %798 = vrot.lane.b32.xlu0 %v2850_v26, %s2654_s10 }
0x1557   :  { %1049 = vrot.lane.b32.xlu1 %v2893_v14, %s2654_s10  ;;  %1300 = vrot.lane.b32.xlu0 %v2936_v57, %s2654_s10 }
0x155b   :  { %1551 = vrot.lane.b32.xlu1 %v2998_v55, %s2654_s10  ;;  %1802 = vrot.lane.b32.xlu0 %v3034_v40, %s2654_s10 }
0x155f   :  { %1924 = vrot.lane.b32.xlu0 %v1911_v5, %s2655_s11 }
0x1563   :  { %2047 = vrot.lane.b32.xlu0 %v2034_v12, %s2655_s11 }
0x15bd   :  { %v1915_v53 = vpop.permute.xlu0 %1914 }
0x15be   :  { %v1917_v39 = vmul.f32 %v2643_v10, %v1915_v53 }
0x15c0   :  { %1919 = vrot.lane.b32.xlu1 %v1917_v39, %s2653_s5 }
0x15c1   :  { %v2038_v26 = vpop.permute.xlu1 %2037  ;;  %v296_v14 = vpop.permute.xlu0 %295 }
0x15c2   :  { %v2040_v24 = vmul.f32 %v2645_v4, %v2038_v26  ;;  %2109 = vst.msk [vmem:[%s3141_s4 + $0x38] sm:$0xff] %vm300_vm2, %v296_v14 }
0x15c4   :  { %2042 = vrot.lane.b32.xlu1 %v2040_v24, %s2653_s5 }
0x15c5   :  { %v548_v57 = vpop.permute.xlu1 %547  ;;  %v799_v55 = vpop.permute.xlu0 %798 }
0x15c6   :  { %2117 = vst.msk [vmem:[%s3141_s4 + $0x30] sm:$0xff] %vm300_vm2, %v548_v57  ;;  %2125 = vst.msk [vmem:[%s3141_s4 + $0x28] sm:$0xff] %vm300_vm2, %v799_v55 }
0x15c7   :  { %2153 = vst.msk [vmem:[%s3141_s4 + $0x30] sm:$0xff] %vm43_vm0, %v3040_v41  ;;  %2145 = vst.msk [vmem:[%s3141_s4 + $0x28] sm:$0xff] %vm43_vm0, %v3004_v56 }
0x15c8   :  { %2051 = vrot.lane.b32.xlu1 %v2040_v24, %s2654_s10 }
0x15c9   :  { %v1050_v25 = vpop.permute.xlu1 %1049  ;;  %v1301_v27 = vpop.permute.xlu0 %1300 }
0x15ca   :  { %2133 = vst.msk [vmem:[%s3141_s4 + $0x20] sm:$0xff] %vm300_vm2, %v1050_v25  ;;  %2141 = vst.msk [vmem:[%s3141_s4 + $0x18] sm:$0xff] %vm300_vm2, %v1301_v27 }
0x15cb   :  { %2137 = vst.msk [vmem:[%s3141_s4 + $0x20] sm:$0xff] %vm43_vm0, %v2942_v58 }
0x15cd   :  { %v1552_v56 = vpop.permute.xlu1 %1551  ;;  %v1803_v13 = vpop.permute.xlu0 %1802 }
0x15ce   :  { %2149 = vst.msk [vmem:[%s3141_s4 + $0x10] sm:$0xff] %vm300_vm2, %v1552_v56  ;;  %2157 = vst.msk [vmem:[%s3141_s4 + $0x8] sm:$0xff] %vm300_vm2, %v1803_v13 }
0x15d1   :  { %v1925_v28 = vpop.permute.xlu0 %1924 }
0x15d2   :  { %1927 = vst.msk [vmem:[#allocation3] sm:$0xff] %vm43_vm0, %v1925_v28 }
0x15d5   :  { %v2048_v29 = vpop.permute.xlu0 %2047 }
0x15d6   :  { %2050 = vst.msk [vmem:[#allocation5] sm:$0xff] %vm43_vm0, %v2048_v29 }
0x1632   :  { %v1920_v30 = vpop.permute.xlu1 %1919 }
0x1633   :  { %1922 = vst.msk [vmem:[#allocation2] sm:$0xff] %vm43_vm0, %v1920_v30  ;;  %2161 = vst.msk [vmem:[%s3141_s4 + $0x38] sm:$0xff] %vm43_vm0, %v1920_v30 }
0x1636   :  { %v2043_v58 = vpop.permute.xlu1 %2042 }
0x1637   :  { %2045 = vst.msk [vmem:[#allocation4] sm:$0xff] %vm43_vm0, %v2043_v58 }
0x163a   :  { %v2052_v31 = vpop.permute.xlu1 %2051 }
0x163b   :  { %2056 = vst.msk [vmem:[%s3141_s4] sm:$0xff] %vm300_vm2, %v2052_v31 }

</bundles_post_ra>
